<compile_context>
chip_gen: v7x
topology: tpu7x:2x2x1
jax: 0.10.0
libtpu: 0.0.40
codegen_flags: <defaults>
</compile_context>

<pallas_src>
import jax
import jax.numpy as jnp
from jax.experimental import pallas as pl
from jax.experimental.pallas import tpu as pltpu

# ---------------- small synthetic CLIP-ViT config ----------------
B = 2            # batch
C = 3            # image channels
IMG = 16         # image size (already resized/cropped)
P = 8            # patch size
GRID = IMG // P
N_PATCH = GRID * GRID        # 4
S = N_PATCH + 1              # 5 tokens (CLS + patches)
D = 32                       # hidden size
H = 4                        # attention heads
HD = D // H                  # head dim
FF = 4 * D                   # MLP intermediate
L = 2                        # encoder layers
CPP = C * P * P              # im2col feature size (c-major, then patch row, patch col)
EPS = 1e-5

CLIP_MEAN = (0.48145466, 0.4578275, 0.40821073)
CLIP_STD = (0.26862954, 0.26130258, 0.27577711)


# ---------------- fused Pallas kernel ----------------
def _ln(v, g, b):
    mu = jnp.mean(v, axis=-1, keepdims=True)
    var = jnp.mean((v - mu) ** 2, axis=-1, keepdims=True)
    return (v - mu) * jax.lax.rsqrt(var + EPS) * g + b


def _clip_fused_kernel(cols_ref, pw_ref, add_ref, preg_ref, preb_ref,
                       ln1g_ref, ln1b_ref, wqkv_ref, bqkv_ref, wo_ref, bo_ref,
                       ln2g_ref, ln2b_ref, w1_ref, b1_ref, w2_ref, b2_ref,
                       o_ref):
    # ---- patch embedding + CLS + positions + pre-LayerNorm ----
    # cols has a zero row at each CLS slot; class_emb / pos_emb / conv-bias are folded
    # into the single additive table add_ref -> one matmul + one add, no sliced stores.
    x = jnp.dot(cols_ref[...], pw_ref[...], preferred_element_type=jnp.float32)
    x = x + add_ref[...]                                    # (B*S, D)
    x = _ln(x, preg_ref[...], preb_ref[...])

    scale = HD ** -0.5

    def to_heads(t2):                                       # (B*S, D) -> (H*B, S, HD)
        t = jnp.stack([t2[:, hi * HD:(hi + 1) * HD] for hi in range(H)], axis=0)
        return t.reshape(H * B, S, HD)

    # ---- L encoder layers: static loop, stacked weights indexed per layer ----
    for l in range(L):
        # -- self-attention block --
        h = _ln(x, ln1g_ref[l], ln1b_ref[l])
        qkv = jnp.dot(h, wqkv_ref[l],
                      preferred_element_type=jnp.float32) + bqkv_ref[l]   # (B*S, 3D)
        q = to_heads(qkv[:, 0 * D:1 * D] * scale)           # scale after bias (HF semantics)
        k = to_heads(qkv[:, 1 * D:2 * D])
        v = to_heads(qkv[:, 2 * D:3 * D])

        s = jnp.einsum('nqd,nkd->nqk', q, k,
                       preferred_element_type=jnp.float32)  # (H*B, S, S), one batched dot
        s = s - jnp.max(s, axis=-1, keepdims=True)
        p = jnp.exp(s)
        p = p * pl.reciprocal(jnp.sum(p, axis=-1, keepdims=True), approx=True)
        o = jnp.einsum('nqk,nkd->nqd', p, v,
                       preferred_element_type=jnp.float32)  # (H*B, S, HD), one batched dot

        o = o.reshape(H, B, S, HD)
        attn = jnp.concatenate([o[hi] for hi in range(H)], axis=-1)       # (B, S, D)
        attn = attn.reshape(B * S, D)
        attn = jnp.dot(attn, wo_ref[l],
                       preferred_element_type=jnp.float32) + bo_ref[l]
        x = x + attn

        # -- MLP block (quick_gelu) --
        h = _ln(x, ln2g_ref[l], ln2b_ref[l])
        h1 = jnp.dot(h, w1_ref[l],
                     preferred_element_type=jnp.float32) + b1_ref[l]
        h1 = h1 * jax.nn.sigmoid(1.702 * h1)
        h2 = jnp.dot(h1, w2_ref[l],
                     preferred_element_type=jnp.float32) + b2_ref[l]
        x = x + h2

    o_ref[...] = x                                          # single full-block store


_VMEM_SPEC = pl.BlockSpec(memory_space=pltpu.MemorySpace.VMEM)


@jax.jit
def clip_vision_forward(pixel_values, kp):
    # raw pixels in [0,1]; CLIP mean/std normalization is folded into kp["patch_w"] /
    # kp["embed_add"]
    cols = im2col_with_cls_rows(pixel_values)               # (B*S, CPP)

    z2d = pl.pallas_call(
        _clip_fused_kernel,
        out_shape=jax.ShapeDtypeStruct((B * S, D), jnp.float32),
        in_specs=[_VMEM_SPEC] * 17,                         # full arrays resident in VMEM
        out_specs=_VMEM_SPEC,
    )(cols, kp["patch_w"], kp["embed_add"], kp["pre_g"], kp["pre_b"],
      kp["ln1_g"], kp["ln1_b"], kp["w_qkv"], kp["b_qkv"], kp["w_o"], kp["b_o"],
      kp["ln2_g"], kp["ln2_b"], kp["w1"], kp["b1"], kp["w2"], kp["b2"])
    return z2d.reshape(B, S, D)


# ---------------- glue: im2col + parameter prep ----------------
def im2col_with_cls_rows(pixel):
    # (B, C, IMG, IMG) -> (B*S, CPP); patches row-major, feature order (c, pr, pc),
    # matching Conv2d(stride=P).flatten(2).transpose(1, 2), with a ZERO row at every
    # CLS position so the in-kernel embed is a single unsliced matmul + add.
    x = pixel.reshape(B, C, GRID, P, GRID, P)
    x = x.transpose(0, 2, 4, 1, 3, 5).reshape(B, N_PATCH, CPP)
    cls = jnp.zeros((B, 1, CPP), pixel.dtype)
    return jnp.concatenate([cls, x], axis=1).reshape(B * S, CPP)


def init_params(key):
    def nrm(k, shape, scale=0.02):
        return scale * jax.random.normal(k, shape, jnp.float32)

    keys = iter(jax.random.split(key, 11))
    return {
        "patch_w": nrm(next(keys), (CPP, D)),          # conv weight, im2col layout, no bias
        "class_emb": nrm(next(keys), (D,)),
        "pos_emb": nrm(next(keys), (S, D)),
        "pre_g": jnp.ones((1, D), jnp.float32),
        "pre_b": jnp.zeros((1, D), jnp.float32),
        "ln1_g": jnp.ones((L, 1, D), jnp.float32),
        "ln1_b": jnp.zeros((L, 1, D), jnp.float32),
        "w_qkv": nrm(next(keys), (L, D, 3 * D)),       # columns = [Wq | Wk | Wv]
        "b_qkv": nrm(next(keys), (L, 1, 3 * D)),
        "w_o": nrm(next(keys), (L, D, D)),
        "b_o": nrm(next(keys), (L, 1, D)),
        "ln2_g": jnp.ones((L, 1, D), jnp.float32),
        "ln2_b": jnp.zeros((L, 1, D), jnp.float32),
        "w1": nrm(next(keys), (L, D, FF)),
        "b1": nrm(next(keys), (L, 1, FF)),
        "w2": nrm(next(keys), (L, FF, D)),
        "b2": nrm(next(keys), (L, 1, D)),
    }


def prepare_params(raw):
    """One-time prep (all f32): fold CLIP mean/std into the patch conv and pre-combine
    class-emb + position-emb + folded conv bias into one (B*S, D) additive table."""
    mean = jnp.asarray(CLIP_MEAN, jnp.float32)
    std = jnp.asarray(CLIP_STD, jnp.float32)
    ch = jnp.arange(CPP) // (P * P)                    # channel of each im2col feature
    inv_std_r = (1.0 / std)[ch]                        # (CPP,)
    mean_r = mean[ch]                                  # (CPP,)
    # conv((x - mean)/std) == (W * 1/std) @ x  +  (-(mean/std) @ W)
    patch_w_eff = raw["patch_w"] * inv_std_r[:, None]
    patch_b_eff = -(mean_r * inv_std_r)[None, :] @ raw["patch_w"]        # (1, D)

    # Per-token additive table: CLS row = class_emb + pos[0] (cols row is zero there);
    # patch rows = pos[1+i] + folded conv bias.
    add_tab = jnp.concatenate(
        [(raw["class_emb"] + raw["pos_emb"][0])[None, :],
         raw["pos_emb"][1:] + patch_b_eff], axis=0)                      # (S, D)
    embed_add = jnp.tile(add_tab, (B, 1))                                # (B*S, D)

    return {
        "patch_w": patch_w_eff, "embed_add": embed_add,
        "pre_g": raw["pre_g"], "pre_b": raw["pre_b"],
        "ln1_g": raw["ln1_g"], "ln1_b": raw["ln1_b"],
        "w_qkv": raw["w_qkv"], "b_qkv": raw["b_qkv"],
        "w_o": raw["w_o"], "b_o": raw["b_o"],
        "ln2_g": raw["ln2_g"], "ln2_b": raw["ln2_b"],
        "w1": raw["w1"], "b1": raw["b1"],
        "w2": raw["w2"], "b2": raw["b2"],
    }


if __name__ == "__main__":
    key = jax.random.PRNGKey(0)
    k_img, k_par = jax.random.split(key)
    pixel_values = jax.random.uniform(k_img, (B, C, IMG, IMG), jnp.float32)
    params = prepare_params(init_params(k_par))

    z = clip_vision_forward(pixel_values, params)
    jax.block_until_ready(z)
    assert z.shape == (B, S, D) and z.dtype == jnp.float32
    assert bool(jnp.all(jnp.isfinite(z)))
    print("KERNEL_OK")
</pallas_src>

<mosaic_0001>
module attributes {stable_mosaic.version = 11 : i64} {
  func.func @_clip_fused_kernel(%arg0: memref<10x192xf32, #tpu.memory_space<vmem>>, %arg1: memref<192x32xf32, #tpu.memory_space<vmem>>, %arg2: memref<10x32xf32, #tpu.memory_space<vmem>>, %arg3: memref<1x32xf32, #tpu.memory_space<vmem>>, %arg4: memref<1x32xf32, #tpu.memory_space<vmem>>, %arg5: memref<2x1x32xf32, #tpu.memory_space<vmem>>, %arg6: memref<2x1x32xf32, #tpu.memory_space<vmem>>, %arg7: memref<2x32x96xf32, #tpu.memory_space<vmem>>, %arg8: memref<2x1x96xf32, #tpu.memory_space<vmem>>, %arg9: memref<2x32x32xf32, #tpu.memory_space<vmem>>, %arg10: memref<2x1x32xf32, #tpu.memory_space<vmem>>, %arg11: memref<2x1x32xf32, #tpu.memory_space<vmem>>, %arg12: memref<2x1x32xf32, #tpu.memory_space<vmem>>, %arg13: memref<2x32x128xf32, #tpu.memory_space<vmem>>, %arg14: memref<2x1x128xf32, #tpu.memory_space<vmem>>, %arg15: memref<2x128x32xf32, #tpu.memory_space<vmem>>, %arg16: memref<2x1x32xf32, #tpu.memory_space<vmem>>, %arg17: memref<10x32xf32, #tpu.memory_space<vmem>>) attributes {dimension_semantics = [], scalar_prefetch = 0 : i64, scratch_operands = 0 : i64, tpu.core_type = #tpu.core_type<tc>} {
    %c0 = arith.constant 0 : index
    %c0_0 = arith.constant 0 : index
    %0 = vector.load %arg0[%c0, %c0_0] : memref<10x192xf32, #tpu.memory_space<vmem>>, vector<10x192xf32>
    %c0_1 = arith.constant 0 : index
    %c0_2 = arith.constant 0 : index
    %1 = vector.load %arg1[%c0_1, %c0_2] : memref<192x32xf32, #tpu.memory_space<vmem>>, vector<192x32xf32>
    %cst = arith.constant dense<0.000000e+00> : vector<10x32xf32>
    %2 = tpu.matmul %0, %1, %cst {dimension_numbers = #tpu.dot_dimension_numbers<[1], [0], [0], [1], [0, 0, 1, 1], [], []>} : vector<10x192xf32>, vector<192x32xf32>, vector<10x32xf32> -> vector<10x32xf32>
    %c0_3 = arith.constant 0 : index
    %c0_4 = arith.constant 0 : index
    %3 = vector.load %arg2[%c0_3, %c0_4] : memref<10x32xf32, #tpu.memory_space<vmem>>, vector<10x32xf32>
    %4 = arith.addf %2, %3 : vector<10x32xf32>
    %c0_5 = arith.constant 0 : index
    %c0_6 = arith.constant 0 : index
    %5 = vector.load %arg3[%c0_5, %c0_6] : memref<1x32xf32, #tpu.memory_space<vmem>>, vector<1x32xf32>
    %c0_7 = arith.constant 0 : index
    %c0_8 = arith.constant 0 : index
    %6 = vector.load %arg4[%c0_7, %c0_8] : memref<1x32xf32, #tpu.memory_space<vmem>>, vector<1x32xf32>
    %cst_9 = arith.constant dense<0.000000e+00> : vector<10xf32>
    %7 = vector.multi_reduction <add>, %4, %cst_9 [1] : vector<10x32xf32> to vector<10xf32>
    %8 = vector.shape_cast %7 : vector<10xf32> to vector<10x1xf32>
    %cst_10 = arith.constant 3.200000e+01 : f32
    %9 = vector.broadcast %cst_10 : f32 to vector<10x1xf32>
    %10 = arith.divf %8, %9 : vector<10x1xf32>
    %11 = vector.broadcast %10 : vector<10x1xf32> to vector<10x32xf32>
    %12 = arith.subf %4, %11 : vector<10x32xf32>
    %13 = arith.mulf %12, %12 : vector<10x32xf32>
    %cst_11 = arith.constant dense<0.000000e+00> : vector<10xf32>
    %14 = vector.multi_reduction <add>, %13, %cst_11 [1] : vector<10x32xf32> to vector<10xf32>
    %15 = vector.shape_cast %14 : vector<10xf32> to vector<10x1xf32>
    %cst_12 = arith.constant 3.200000e+01 : f32
    %16 = vector.broadcast %cst_12 : f32 to vector<10x1xf32>
    %17 = arith.divf %15, %16 : vector<10x1xf32>
    %18 = vector.broadcast %10 : vector<10x1xf32> to vector<10x32xf32>
    %19 = arith.subf %4, %18 : vector<10x32xf32>
    %cst_13 = arith.constant 9.99999974E-6 : f32
    %20 = vector.broadcast %cst_13 : f32 to vector<10x1xf32>
    %21 = arith.addf %17, %20 : vector<10x1xf32>
    %22 = math.rsqrt %21 : vector<10x1xf32>
    %23 = vector.broadcast %22 : vector<10x1xf32> to vector<10x32xf32>
    %24 = arith.mulf %19, %23 : vector<10x32xf32>
    %25 = vector.broadcast %5 : vector<1x32xf32> to vector<10x32xf32>
    %26 = arith.mulf %24, %25 : vector<10x32xf32>
    %27 = vector.broadcast %6 : vector<1x32xf32> to vector<10x32xf32>
    %28 = arith.addf %26, %27 : vector<10x32xf32>
    %c0_14 = arith.constant 0 : index
    %c0_15 = arith.constant 0 : index
    %c0_16 = arith.constant 0 : index
    %29 = vector.load %arg5[%c0_14, %c0_15, %c0_16] : memref<2x1x32xf32, #tpu.memory_space<vmem>>, vector<1x1x32xf32>
    %30 = vector.shape_cast %29 : vector<1x1x32xf32> to vector<1x32xf32>
    %c0_17 = arith.constant 0 : index
    %c0_18 = arith.constant 0 : index
    %c0_19 = arith.constant 0 : index
    %31 = vector.load %arg6[%c0_17, %c0_18, %c0_19] : memref<2x1x32xf32, #tpu.memory_space<vmem>>, vector<1x1x32xf32>
    %32 = vector.shape_cast %31 : vector<1x1x32xf32> to vector<1x32xf32>
    %cst_20 = arith.constant dense<0.000000e+00> : vector<10xf32>
    %33 = vector.multi_reduction <add>, %28, %cst_20 [1] : vector<10x32xf32> to vector<10xf32>
    %34 = vector.shape_cast %33 : vector<10xf32> to vector<10x1xf32>
    %cst_21 = arith.constant 3.200000e+01 : f32
    %35 = vector.broadcast %cst_21 : f32 to vector<10x1xf32>
    %36 = arith.divf %34, %35 : vector<10x1xf32>
    %37 = vector.broadcast %36 : vector<10x1xf32> to vector<10x32xf32>
    %38 = arith.subf %28, %37 : vector<10x32xf32>
    %39 = arith.mulf %38, %38 : vector<10x32xf32>
    %cst_22 = arith.constant dense<0.000000e+00> : vector<10xf32>
    %40 = vector.multi_reduction <add>, %39, %cst_22 [1] : vector<10x32xf32> to vector<10xf32>
    %41 = vector.shape_cast %40 : vector<10xf32> to vector<10x1xf32>
    %cst_23 = arith.constant 3.200000e+01 : f32
    %42 = vector.broadcast %cst_23 : f32 to vector<10x1xf32>
    %43 = arith.divf %41, %42 : vector<10x1xf32>
    %44 = vector.broadcast %36 : vector<10x1xf32> to vector<10x32xf32>
    %45 = arith.subf %28, %44 : vector<10x32xf32>
    %cst_24 = arith.constant 9.99999974E-6 : f32
    %46 = vector.broadcast %cst_24 : f32 to vector<10x1xf32>
    %47 = arith.addf %43, %46 : vector<10x1xf32>
    %48 = math.rsqrt %47 : vector<10x1xf32>
    %49 = vector.broadcast %48 : vector<10x1xf32> to vector<10x32xf32>
    %50 = arith.mulf %45, %49 : vector<10x32xf32>
    %51 = vector.broadcast %30 : vector<1x32xf32> to vector<10x32xf32>
    %52 = arith.mulf %50, %51 : vector<10x32xf32>
    %53 = vector.broadcast %32 : vector<1x32xf32> to vector<10x32xf32>
    %54 = arith.addf %52, %53 : vector<10x32xf32>
    %c0_25 = arith.constant 0 : index
    %c0_26 = arith.constant 0 : index
    %c0_27 = arith.constant 0 : index
    %55 = vector.load %arg7[%c0_25, %c0_26, %c0_27] : memref<2x32x96xf32, #tpu.memory_space<vmem>>, vector<1x32x96xf32>
    %56 = vector.shape_cast %55 : vector<1x32x96xf32> to vector<32x96xf32>
    %cst_28 = arith.constant dense<0.000000e+00> : vector<10x96xf32>
    %57 = tpu.matmul %54, %56, %cst_28 {dimension_numbers = #tpu.dot_dimension_numbers<[1], [0], [0], [1], [0, 0, 1, 1], [], []>} : vector<10x32xf32>, vector<32x96xf32>, vector<10x96xf32> -> vector<10x96xf32>
    %c0_29 = arith.constant 0 : index
    %c0_30 = arith.constant 0 : index
    %c0_31 = arith.constant 0 : index
    %58 = vector.load %arg8[%c0_29, %c0_30, %c0_31] : memref<2x1x96xf32, #tpu.memory_space<vmem>>, vector<1x1x96xf32>
    %59 = vector.shape_cast %58 : vector<1x1x96xf32> to vector<1x96xf32>
    %60 = vector.broadcast %59 : vector<1x96xf32> to vector<10x96xf32>
    %61 = arith.addf %57, %60 : vector<10x96xf32>
    %62 = vector.extract_strided_slice %61 {offsets = [0, 0], sizes = [10, 32], strides = [1, 1]} : vector<10x96xf32> to vector<10x32xf32>
    %cst_32 = arith.constant 0.353553385 : f32
    %63 = vector.broadcast %cst_32 : f32 to vector<10x32xf32>
    %64 = arith.mulf %62, %63 : vector<10x32xf32>
    %65 = vector.extract_strided_slice %64 {offsets = [0, 0], sizes = [10, 8], strides = [1, 1]} : vector<10x32xf32> to vector<10x8xf32>
    %66 = vector.extract_strided_slice %64 {offsets = [0, 8], sizes = [10, 8], strides = [1, 1]} : vector<10x32xf32> to vector<10x8xf32>
    %67 = vector.extract_strided_slice %64 {offsets = [0, 16], sizes = [10, 8], strides = [1, 1]} : vector<10x32xf32> to vector<10x8xf32>
    %68 = vector.extract_strided_slice %64 {offsets = [0, 24], sizes = [10, 8], strides = [1, 1]} : vector<10x32xf32> to vector<10x8xf32>
    %69 = vector.shape_cast %65 : vector<10x8xf32> to vector<1x10x8xf32>
    %70 = vector.shape_cast %66 : vector<10x8xf32> to vector<1x10x8xf32>
    %71 = vector.shape_cast %67 : vector<10x8xf32> to vector<1x10x8xf32>
    %72 = vector.shape_cast %68 : vector<10x8xf32> to vector<1x10x8xf32>
    %73 = tpu.concatenate %69, %70, %71, %72 in 0 : vector<1x10x8xf32>, vector<1x10x8xf32>, vector<1x10x8xf32>, vector<1x10x8xf32> -> vector<4x10x8xf32>
    %74 = vector.shape_cast %73 : vector<4x10x8xf32> to vector<8x5x8xf32>
    %75 = vector.extract_strided_slice %61 {offsets = [0, 32], sizes = [10, 32], strides = [1, 1]} : vector<10x96xf32> to vector<10x32xf32>
    %76 = vector.extract_strided_slice %75 {offsets = [0, 0], sizes = [10, 8], strides = [1, 1]} : vector<10x32xf32> to vector<10x8xf32>
    %77 = vector.extract_strided_slice %75 {offsets = [0, 8], sizes = [10, 8], strides = [1, 1]} : vector<10x32xf32> to vector<10x8xf32>
    %78 = vector.extract_strided_slice %75 {offsets = [0, 16], sizes = [10, 8], strides = [1, 1]} : vector<10x32xf32> to vector<10x8xf32>
    %79 = vector.extract_strided_slice %75 {offsets = [0, 24], sizes = [10, 8], strides = [1, 1]} : vector<10x32xf32> to vector<10x8xf32>
    %80 = vector.shape_cast %76 : vector<10x8xf32> to vector<1x10x8xf32>
    %81 = vector.shape_cast %77 : vector<10x8xf32> to vector<1x10x8xf32>
    %82 = vector.shape_cast %78 : vector<10x8xf32> to vector<1x10x8xf32>
    %83 = vector.shape_cast %79 : vector<10x8xf32> to vector<1x10x8xf32>
    %84 = tpu.concatenate %80, %81, %82, %83 in 0 : vector<1x10x8xf32>, vector<1x10x8xf32>, vector<1x10x8xf32>, vector<1x10x8xf32> -> vector<4x10x8xf32>
    %85 = vector.shape_cast %84 : vector<4x10x8xf32> to vector<8x5x8xf32>
    %86 = vector.extract_strided_slice %61 {offsets = [0, 64], sizes = [10, 32], strides = [1, 1]} : vector<10x96xf32> to vector<10x32xf32>
    %87 = vector.extract_strided_slice %86 {offsets = [0, 0], sizes = [10, 8], strides = [1, 1]} : vector<10x32xf32> to vector<10x8xf32>
    %88 = vector.extract_strided_slice %86 {offsets = [0, 8], sizes = [10, 8], strides = [1, 1]} : vector<10x32xf32> to vector<10x8xf32>
    %89 = vector.extract_strided_slice %86 {offsets = [0, 16], sizes = [10, 8], strides = [1, 1]} : vector<10x32xf32> to vector<10x8xf32>
    %90 = vector.extract_strided_slice %86 {offsets = [0, 24], sizes = [10, 8], strides = [1, 1]} : vector<10x32xf32> to vector<10x8xf32>
    %91 = vector.shape_cast %87 : vector<10x8xf32> to vector<1x10x8xf32>
    %92 = vector.shape_cast %88 : vector<10x8xf32> to vector<1x10x8xf32>
    %93 = vector.shape_cast %89 : vector<10x8xf32> to vector<1x10x8xf32>
    %94 = vector.shape_cast %90 : vector<10x8xf32> to vector<1x10x8xf32>
    %95 = tpu.concatenate %91, %92, %93, %94 in 0 : vector<1x10x8xf32>, vector<1x10x8xf32>, vector<1x10x8xf32>, vector<1x10x8xf32> -> vector<4x10x8xf32>
    %96 = vector.shape_cast %95 : vector<4x10x8xf32> to vector<8x5x8xf32>
    "tpu.trace_start"() <{level = 10 : i32, message = "nqd,nkd->nqk"}> : () -> ()
    %cst_33 = arith.constant dense<0.000000e+00> : vector<8x5x5xf32>
    %97 = tpu.matmul %74, %85, %cst_33 {dimension_numbers = #tpu.dot_dimension_numbers<[2], [2], [1], [1], [0, 0, 0, 1, 1, 1], [0], [0]>} : vector<8x5x8xf32>, vector<8x5x8xf32>, vector<8x5x5xf32> -> vector<8x5x5xf32>
    "tpu.trace_stop"() : () -> ()
    %cst_34 = arith.constant dense<0xFF800000> : vector<8x5xf32>
    %98 = vector.multi_reduction <maximumf>, %97, %cst_34 [2] : vector<8x5x5xf32> to vector<8x5xf32>
    %99 = vector.shape_cast %98 : vector<8x5xf32> to vector<8x5x1xf32>
    %100 = vector.broadcast %99 : vector<8x5x1xf32> to vector<8x5x5xf32>
    %101 = arith.subf %97, %100 : vector<8x5x5xf32>
    %102 = math.exp %101 : vector<8x5x5xf32>
    %cst_35 = arith.constant dense<0.000000e+00> : vector<8x5xf32>
    %103 = vector.multi_reduction <add>, %102, %cst_35 [2] : vector<8x5x5xf32> to vector<8x5xf32>
    %104 = vector.shape_cast %103 : vector<8x5xf32> to vector<8x5x1xf32>
    %105 = tpu.reciprocal %104 {approx = true} : vector<8x5x1xf32> -> vector<8x5x1xf32>
    %106 = vector.broadcast %105 : vector<8x5x1xf32> to vector<8x5x5xf32>
    %107 = arith.mulf %102, %106 : vector<8x5x5xf32>
    "tpu.trace_start"() <{level = 10 : i32, message = "nqk,nkd->nqd"}> : () -> ()
    %cst_36 = arith.constant dense<0.000000e+00> : vector<8x5x8xf32>
    %108 = tpu.matmul %107, %96, %cst_36 {dimension_numbers = #tpu.dot_dimension_numbers<[2], [1], [1], [2], [0, 0, 0, 1, 1, 2], [0], [0]>} : vector<8x5x5xf32>, vector<8x5x8xf32>, vector<8x5x8xf32> -> vector<8x5x8xf32>
    "tpu.trace_stop"() : () -> ()
    %109 = vector.shape_cast %108 : vector<8x5x8xf32> to vector<4x2x5x8xf32>
    %110 = vector.extract_strided_slice %109 {offsets = [0, 0, 0, 0], sizes = [1, 2, 5, 8], strides = [1, 1, 1, 1]} : vector<4x2x5x8xf32> to vector<1x2x5x8xf32>
    %111 = vector.shape_cast %110 : vector<1x2x5x8xf32> to vector<2x5x8xf32>
    %112 = vector.extract_strided_slice %109 {offsets = [1, 0, 0, 0], sizes = [1, 2, 5, 8], strides = [1, 1, 1, 1]} : vector<4x2x5x8xf32> to vector<1x2x5x8xf32>
    %113 = vector.shape_cast %112 : vector<1x2x5x8xf32> to vector<2x5x8xf32>
    %114 = vector.extract_strided_slice %109 {offsets = [2, 0, 0, 0], sizes = [1, 2, 5, 8], strides = [1, 1, 1, 1]} : vector<4x2x5x8xf32> to vector<1x2x5x8xf32>
    %115 = vector.shape_cast %114 : vector<1x2x5x8xf32> to vector<2x5x8xf32>
    %116 = vector.extract_strided_slice %109 {offsets = [3, 0, 0, 0], sizes = [1, 2, 5, 8], strides = [1, 1, 1, 1]} : vector<4x2x5x8xf32> to vector<1x2x5x8xf32>
    %117 = vector.shape_cast %116 : vector<1x2x5x8xf32> to vector<2x5x8xf32>
    %118 = tpu.concatenate %111, %113, %115, %117 in 2 : vector<2x5x8xf32>, vector<2x5x8xf32>, vector<2x5x8xf32>, vector<2x5x8xf32> -> vector<2x5x32xf32>
    %119 = vector.shape_cast %118 : vector<2x5x32xf32> to vector<10x32xf32>
    %c0_37 = arith.constant 0 : index
    %c0_38 = arith.constant 0 : index
    %c0_39 = arith.constant 0 : index
    %120 = vector.load %arg9[%c0_37, %c0_38, %c0_39] : memref<2x32x32xf32, #tpu.memory_space<vmem>>, vector<1x32x32xf32>
    %121 = vector.shape_cast %120 : vector<1x32x32xf32> to vector<32x32xf32>
    %cst_40 = arith.constant dense<0.000000e+00> : vector<10x32xf32>
    %122 = tpu.matmul %119, %121, %cst_40 {dimension_numbers = #tpu.dot_dimension_numbers<[1], [0], [0], [1], [0, 0, 1, 1], [], []>} : vector<10x32xf32>, vector<32x32xf32>, vector<10x32xf32> -> vector<10x32xf32>
    %c0_41 = arith.constant 0 : index
    %c0_42 = arith.constant 0 : index
    %c0_43 = arith.constant 0 : index
    %123 = vector.load %arg10[%c0_41, %c0_42, %c0_43] : memref<2x1x32xf32, #tpu.memory_space<vmem>>, vector<1x1x32xf32>
    %124 = vector.shape_cast %123 : vector<1x1x32xf32> to vector<1x32xf32>
    %125 = vector.broadcast %124 : vector<1x32xf32> to vector<10x32xf32>
    %126 = arith.addf %122, %125 : vector<10x32xf32>
    %127 = arith.addf %28, %126 : vector<10x32xf32>
    %c0_44 = arith.constant 0 : index
    %c0_45 = arith.constant 0 : index
    %c0_46 = arith.constant 0 : index
    %128 = vector.load %arg11[%c0_44, %c0_45, %c0_46] : memref<2x1x32xf32, #tpu.memory_space<vmem>>, vector<1x1x32xf32>
    %129 = vector.shape_cast %128 : vector<1x1x32xf32> to vector<1x32xf32>
    %c0_47 = arith.constant 0 : index
    %c0_48 = arith.constant 0 : index
    %c0_49 = arith.constant 0 : index
    %130 = vector.load %arg12[%c0_47, %c0_48, %c0_49] : memref<2x1x32xf32, #tpu.memory_space<vmem>>, vector<1x1x32xf32>
    %131 = vector.shape_cast %130 : vector<1x1x32xf32> to vector<1x32xf32>
    %cst_50 = arith.constant dense<0.000000e+00> : vector<10xf32>
    %132 = vector.multi_reduction <add>, %127, %cst_50 [1] : vector<10x32xf32> to vector<10xf32>
    %133 = vector.shape_cast %132 : vector<10xf32> to vector<10x1xf32>
    %cst_51 = arith.constant 3.200000e+01 : f32
    %134 = vector.broadcast %cst_51 : f32 to vector<10x1xf32>
    %135 = arith.divf %133, %134 : vector<10x1xf32>
    %136 = vector.broadcast %135 : vector<10x1xf32> to vector<10x32xf32>
    %137 = arith.subf %127, %136 : vector<10x32xf32>
    %138 = arith.mulf %137, %137 : vector<10x32xf32>
    %cst_52 = arith.constant dense<0.000000e+00> : vector<10xf32>
    %139 = vector.multi_reduction <add>, %138, %cst_52 [1] : vector<10x32xf32> to vector<10xf32>
    %140 = vector.shape_cast %139 : vector<10xf32> to vector<10x1xf32>
    %cst_53 = arith.constant 3.200000e+01 : f32
    %141 = vector.broadcast %cst_53 : f32 to vector<10x1xf32>
    %142 = arith.divf %140, %141 : vector<10x1xf32>
    %143 = vector.broadcast %135 : vector<10x1xf32> to vector<10x32xf32>
    %144 = arith.subf %127, %143 : vector<10x32xf32>
    %cst_54 = arith.constant 9.99999974E-6 : f32
    %145 = vector.broadcast %cst_54 : f32 to vector<10x1xf32>
    %146 = arith.addf %142, %145 : vector<10x1xf32>
    %147 = math.rsqrt %146 : vector<10x1xf32>
    %148 = vector.broadcast %147 : vector<10x1xf32> to vector<10x32xf32>
    %149 = arith.mulf %144, %148 : vector<10x32xf32>
    %150 = vector.broadcast %129 : vector<1x32xf32> to vector<10x32xf32>
    %151 = arith.mulf %149, %150 : vector<10x32xf32>
    %152 = vector.broadcast %131 : vector<1x32xf32> to vector<10x32xf32>
    %153 = arith.addf %151, %152 : vector<10x32xf32>
    %c0_55 = arith.constant 0 : index
    %c0_56 = arith.constant 0 : index
    %c0_57 = arith.constant 0 : index
    %154 = vector.load %arg13[%c0_55, %c0_56, %c0_57] : memref<2x32x128xf32, #tpu.memory_space<vmem>>, vector<1x32x128xf32>
    %155 = vector.shape_cast %154 : vector<1x32x128xf32> to vector<32x128xf32>
    %cst_58 = arith.constant dense<0.000000e+00> : vector<10x128xf32>
    %156 = tpu.matmul %153, %155, %cst_58 {dimension_numbers = #tpu.dot_dimension_numbers<[1], [0], [0], [1], [0, 0, 1, 1], [], []>} : vector<10x32xf32>, vector<32x128xf32>, vector<10x128xf32> -> vector<10x128xf32>
    %c0_59 = arith.constant 0 : index
    %c0_60 = arith.constant 0 : index
    %c0_61 = arith.constant 0 : index
    %157 = vector.load %arg14[%c0_59, %c0_60, %c0_61] : memref<2x1x128xf32, #tpu.memory_space<vmem>>, vector<1x1x128xf32>
    %158 = vector.shape_cast %157 : vector<1x1x128xf32> to vector<1x128xf32>
    %159 = vector.broadcast %158 : vector<1x128xf32> to vector<10x128xf32>
    %160 = arith.addf %156, %159 : vector<10x128xf32>
    %cst_62 = arith.constant 1.702000e+00 : f32
    %161 = vector.broadcast %cst_62 : f32 to vector<10x128xf32>
    %162 = arith.mulf %161, %160 : vector<10x128xf32>
    %163 = arith.negf %162 : vector<10x128xf32>
    %164 = math.exp %163 : vector<10x128xf32>
    %cst_63 = arith.constant 1.000000e+00 : f32
    %165 = vector.broadcast %cst_63 : f32 to vector<10x128xf32>
    %166 = arith.addf %165, %164 : vector<10x128xf32>
    %167 = arith.divf %165, %166 : vector<10x128xf32>
    %168 = arith.mulf %160, %167 : vector<10x128xf32>
    %c0_64 = arith.constant 0 : index
    %c0_65 = arith.constant 0 : index
    %c0_66 = arith.constant 0 : index
    %169 = vector.load %arg15[%c0_64, %c0_65, %c0_66] : memref<2x128x32xf32, #tpu.memory_space<vmem>>, vector<1x128x32xf32>
    %170 = vector.shape_cast %169 : vector<1x128x32xf32> to vector<128x32xf32>
    %cst_67 = arith.constant dense<0.000000e+00> : vector<10x32xf32>
    %171 = tpu.matmul %168, %170, %cst_67 {dimension_numbers = #tpu.dot_dimension_numbers<[1], [0], [0], [1], [0, 0, 1, 1], [], []>} : vector<10x128xf32>, vector<128x32xf32>, vector<10x32xf32> -> vector<10x32xf32>
    %c0_68 = arith.constant 0 : index
    %c0_69 = arith.constant 0 : index
    %c0_70 = arith.constant 0 : index
    %172 = vector.load %arg16[%c0_68, %c0_69, %c0_70] : memref<2x1x32xf32, #tpu.memory_space<vmem>>, vector<1x1x32xf32>
    %173 = vector.shape_cast %172 : vector<1x1x32xf32> to vector<1x32xf32>
    %174 = vector.broadcast %173 : vector<1x32xf32> to vector<10x32xf32>
    %175 = arith.addf %171, %174 : vector<10x32xf32>
    %176 = arith.addf %127, %175 : vector<10x32xf32>
    %c1 = arith.constant 1 : index
    %c0_71 = arith.constant 0 : index
    %c0_72 = arith.constant 0 : index
    %177 = vector.load %arg5[%c1, %c0_71, %c0_72] : memref<2x1x32xf32, #tpu.memory_space<vmem>>, vector<1x1x32xf32>
    %178 = vector.shape_cast %177 : vector<1x1x32xf32> to vector<1x32xf32>
    %c1_73 = arith.constant 1 : index
    %c0_74 = arith.constant 0 : index
    %c0_75 = arith.constant 0 : index
    %179 = vector.load %arg6[%c1_73, %c0_74, %c0_75] : memref<2x1x32xf32, #tpu.memory_space<vmem>>, vector<1x1x32xf32>
    %180 = vector.shape_cast %179 : vector<1x1x32xf32> to vector<1x32xf32>
    %cst_76 = arith.constant dense<0.000000e+00> : vector<10xf32>
    %181 = vector.multi_reduction <add>, %176, %cst_76 [1] : vector<10x32xf32> to vector<10xf32>
    %182 = vector.shape_cast %181 : vector<10xf32> to vector<10x1xf32>
    %cst_77 = arith.constant 3.200000e+01 : f32
    %183 = vector.broadcast %cst_77 : f32 to vector<10x1xf32>
    %184 = arith.divf %182, %183 : vector<10x1xf32>
    %185 = vector.broadcast %184 : vector<10x1xf32> to vector<10x32xf32>
    %186 = arith.subf %176, %185 : vector<10x32xf32>
    %187 = arith.mulf %186, %186 : vector<10x32xf32>
    %cst_78 = arith.constant dense<0.000000e+00> : vector<10xf32>
    %188 = vector.multi_reduction <add>, %187, %cst_78 [1] : vector<10x32xf32> to vector<10xf32>
    %189 = vector.shape_cast %188 : vector<10xf32> to vector<10x1xf32>
    %cst_79 = arith.constant 3.200000e+01 : f32
    %190 = vector.broadcast %cst_79 : f32 to vector<10x1xf32>
    %191 = arith.divf %189, %190 : vector<10x1xf32>
    %192 = vector.broadcast %184 : vector<10x1xf32> to vector<10x32xf32>
    %193 = arith.subf %176, %192 : vector<10x32xf32>
    %cst_80 = arith.constant 9.99999974E-6 : f32
    %194 = vector.broadcast %cst_80 : f32 to vector<10x1xf32>
    %195 = arith.addf %191, %194 : vector<10x1xf32>
    %196 = math.rsqrt %195 : vector<10x1xf32>
    %197 = vector.broadcast %196 : vector<10x1xf32> to vector<10x32xf32>
    %198 = arith.mulf %193, %197 : vector<10x32xf32>
    %199 = vector.broadcast %178 : vector<1x32xf32> to vector<10x32xf32>
    %200 = arith.mulf %198, %199 : vector<10x32xf32>
    %201 = vector.broadcast %180 : vector<1x32xf32> to vector<10x32xf32>
    %202 = arith.addf %200, %201 : vector<10x32xf32>
    %c1_81 = arith.constant 1 : index
    %c0_82 = arith.constant 0 : index
    %c0_83 = arith.constant 0 : index
    %203 = vector.load %arg7[%c1_81, %c0_82, %c0_83] : memref<2x32x96xf32, #tpu.memory_space<vmem>>, vector<1x32x96xf32>
    %204 = vector.shape_cast %203 : vector<1x32x96xf32> to vector<32x96xf32>
    %cst_84 = arith.constant dense<0.000000e+00> : vector<10x96xf32>
    %205 = tpu.matmul %202, %204, %cst_84 {dimension_numbers = #tpu.dot_dimension_numbers<[1], [0], [0], [1], [0, 0, 1, 1], [], []>} : vector<10x32xf32>, vector<32x96xf32>, vector<10x96xf32> -> vector<10x96xf32>
    %c1_85 = arith.constant 1 : index
    %c0_86 = arith.constant 0 : index
    %c0_87 = arith.constant 0 : index
    %206 = vector.load %arg8[%c1_85, %c0_86, %c0_87] : memref<2x1x96xf32, #tpu.memory_space<vmem>>, vector<1x1x96xf32>
    %207 = vector.shape_cast %206 : vector<1x1x96xf32> to vector<1x96xf32>
    %208 = vector.broadcast %207 : vector<1x96xf32> to vector<10x96xf32>
    %209 = arith.addf %205, %208 : vector<10x96xf32>
    %210 = vector.extract_strided_slice %209 {offsets = [0, 0], sizes = [10, 32], strides = [1, 1]} : vector<10x96xf32> to vector<10x32xf32>
    %cst_88 = arith.constant 0.353553385 : f32
    %211 = vector.broadcast %cst_88 : f32 to vector<10x32xf32>
    %212 = arith.mulf %210, %211 : vector<10x32xf32>
    %213 = vector.extract_strided_slice %212 {offsets = [0, 0], sizes = [10, 8], strides = [1, 1]} : vector<10x32xf32> to vector<10x8xf32>
    %214 = vector.extract_strided_slice %212 {offsets = [0, 8], sizes = [10, 8], strides = [1, 1]} : vector<10x32xf32> to vector<10x8xf32>
    %215 = vector.extract_strided_slice %212 {offsets = [0, 16], sizes = [10, 8], strides = [1, 1]} : vector<10x32xf32> to vector<10x8xf32>
    %216 = vector.extract_strided_slice %212 {offsets = [0, 24], sizes = [10, 8], strides = [1, 1]} : vector<10x32xf32> to vector<10x8xf32>
    %217 = vector.shape_cast %213 : vector<10x8xf32> to vector<1x10x8xf32>
    %218 = vector.shape_cast %214 : vector<10x8xf32> to vector<1x10x8xf32>
    %219 = vector.shape_cast %215 : vector<10x8xf32> to vector<1x10x8xf32>
    %220 = vector.shape_cast %216 : vector<10x8xf32> to vector<1x10x8xf32>
    %221 = tpu.concatenate %217, %218, %219, %220 in 0 : vector<1x10x8xf32>, vector<1x10x8xf32>, vector<1x10x8xf32>, vector<1x10x8xf32> -> vector<4x10x8xf32>
    %222 = vector.shape_cast %221 : vector<4x10x8xf32> to vector<8x5x8xf32>
    %223 = vector.extract_strided_slice %209 {offsets = [0, 32], sizes = [10, 32], strides = [1, 1]} : vector<10x96xf32> to vector<10x32xf32>
    %224 = vector.extract_strided_slice %223 {offsets = [0, 0], sizes = [10, 8], strides = [1, 1]} : vector<10x32xf32> to vector<10x8xf32>
    %225 = vector.extract_strided_slice %223 {offsets = [0, 8], sizes = [10, 8], strides = [1, 1]} : vector<10x32xf32> to vector<10x8xf32>
    %226 = vector.extract_strided_slice %223 {offsets = [0, 16], sizes = [10, 8], strides = [1, 1]} : vector<10x32xf32> to vector<10x8xf32>
    %227 = vector.extract_strided_slice %223 {offsets = [0, 24], sizes = [10, 8], strides = [1, 1]} : vector<10x32xf32> to vector<10x8xf32>
    %228 = vector.shape_cast %224 : vector<10x8xf32> to vector<1x10x8xf32>
    %229 = vector.shape_cast %225 : vector<10x8xf32> to vector<1x10x8xf32>
    %230 = vector.shape_cast %226 : vector<10x8xf32> to vector<1x10x8xf32>
    %231 = vector.shape_cast %227 : vector<10x8xf32> to vector<1x10x8xf32>
    %232 = tpu.concatenate %228, %229, %230, %231 in 0 : vector<1x10x8xf32>, vector<1x10x8xf32>, vector<1x10x8xf32>, vector<1x10x8xf32> -> vector<4x10x8xf32>
    %233 = vector.shape_cast %232 : vector<4x10x8xf32> to vector<8x5x8xf32>
    %234 = vector.extract_strided_slice %209 {offsets = [0, 64], sizes = [10, 32], strides = [1, 1]} : vector<10x96xf32> to vector<10x32xf32>
    %235 = vector.extract_strided_slice %234 {offsets = [0, 0], sizes = [10, 8], strides = [1, 1]} : vector<10x32xf32> to vector<10x8xf32>
    %236 = vector.extract_strided_slice %234 {offsets = [0, 8], sizes = [10, 8], strides = [1, 1]} : vector<10x32xf32> to vector<10x8xf32>
    %237 = vector.extract_strided_slice %234 {offsets = [0, 16], sizes = [10, 8], strides = [1, 1]} : vector<10x32xf32> to vector<10x8xf32>
    %238 = vector.extract_strided_slice %234 {offsets = [0, 24], sizes = [10, 8], strides = [1, 1]} : vector<10x32xf32> to vector<10x8xf32>
    %239 = vector.shape_cast %235 : vector<10x8xf32> to vector<1x10x8xf32>
    %240 = vector.shape_cast %236 : vector<10x8xf32> to vector<1x10x8xf32>
    %241 = vector.shape_cast %237 : vector<10x8xf32> to vector<1x10x8xf32>
    %242 = vector.shape_cast %238 : vector<10x8xf32> to vector<1x10x8xf32>
    %243 = tpu.concatenate %239, %240, %241, %242 in 0 : vector<1x10x8xf32>, vector<1x10x8xf32>, vector<1x10x8xf32>, vector<1x10x8xf32> -> vector<4x10x8xf32>
    %244 = vector.shape_cast %243 : vector<4x10x8xf32> to vector<8x5x8xf32>
    "tpu.trace_start"() <{level = 10 : i32, message = "nqd,nkd->nqk"}> : () -> ()
    %cst_89 = arith.constant dense<0.000000e+00> : vector<8x5x5xf32>
    %245 = tpu.matmul %222, %233, %cst_89 {dimension_numbers = #tpu.dot_dimension_numbers<[2], [2], [1], [1], [0, 0, 0, 1, 1, 1], [0], [0]>} : vector<8x5x8xf32>, vector<8x5x8xf32>, vector<8x5x5xf32> -> vector<8x5x5xf32>
    "tpu.trace_stop"() : () -> ()
    %cst_90 = arith.constant dense<0xFF800000> : vector<8x5xf32>
    %246 = vector.multi_reduction <maximumf>, %245, %cst_90 [2] : vector<8x5x5xf32> to vector<8x5xf32>
    %247 = vector.shape_cast %246 : vector<8x5xf32> to vector<8x5x1xf32>
    %248 = vector.broadcast %247 : vector<8x5x1xf32> to vector<8x5x5xf32>
    %249 = arith.subf %245, %248 : vector<8x5x5xf32>
    %250 = math.exp %249 : vector<8x5x5xf32>
    %cst_91 = arith.constant dense<0.000000e+00> : vector<8x5xf32>
    %251 = vector.multi_reduction <add>, %250, %cst_91 [2] : vector<8x5x5xf32> to vector<8x5xf32>
    %252 = vector.shape_cast %251 : vector<8x5xf32> to vector<8x5x1xf32>
    %253 = tpu.reciprocal %252 {approx = true} : vector<8x5x1xf32> -> vector<8x5x1xf32>
    %254 = vector.broadcast %253 : vector<8x5x1xf32> to vector<8x5x5xf32>
    %255 = arith.mulf %250, %254 : vector<8x5x5xf32>
    "tpu.trace_start"() <{level = 10 : i32, message = "nqk,nkd->nqd"}> : () -> ()
    %cst_92 = arith.constant dense<0.000000e+00> : vector<8x5x8xf32>
    %256 = tpu.matmul %255, %244, %cst_92 {dimension_numbers = #tpu.dot_dimension_numbers<[2], [1], [1], [2], [0, 0, 0, 1, 1, 2], [0], [0]>} : vector<8x5x5xf32>, vector<8x5x8xf32>, vector<8x5x8xf32> -> vector<8x5x8xf32>
    "tpu.trace_stop"() : () -> ()
    %257 = vector.shape_cast %256 : vector<8x5x8xf32> to vector<4x2x5x8xf32>
    %258 = vector.extract_strided_slice %257 {offsets = [0, 0, 0, 0], sizes = [1, 2, 5, 8], strides = [1, 1, 1, 1]} : vector<4x2x5x8xf32> to vector<1x2x5x8xf32>
    %259 = vector.shape_cast %258 : vector<1x2x5x8xf32> to vector<2x5x8xf32>
    %260 = vector.extract_strided_slice %257 {offsets = [1, 0, 0, 0], sizes = [1, 2, 5, 8], strides = [1, 1, 1, 1]} : vector<4x2x5x8xf32> to vector<1x2x5x8xf32>
    %261 = vector.shape_cast %260 : vector<1x2x5x8xf32> to vector<2x5x8xf32>
    %262 = vector.extract_strided_slice %257 {offsets = [2, 0, 0, 0], sizes = [1, 2, 5, 8], strides = [1, 1, 1, 1]} : vector<4x2x5x8xf32> to vector<1x2x5x8xf32>
    %263 = vector.shape_cast %262 : vector<1x2x5x8xf32> to vector<2x5x8xf32>
    %264 = vector.extract_strided_slice %257 {offsets = [3, 0, 0, 0], sizes = [1, 2, 5, 8], strides = [1, 1, 1, 1]} : vector<4x2x5x8xf32> to vector<1x2x5x8xf32>
    %265 = vector.shape_cast %264 : vector<1x2x5x8xf32> to vector<2x5x8xf32>
    %266 = tpu.concatenate %259, %261, %263, %265 in 2 : vector<2x5x8xf32>, vector<2x5x8xf32>, vector<2x5x8xf32>, vector<2x5x8xf32> -> vector<2x5x32xf32>
    %267 = vector.shape_cast %266 : vector<2x5x32xf32> to vector<10x32xf32>
    %c1_93 = arith.constant 1 : index
    %c0_94 = arith.constant 0 : index
    %c0_95 = arith.constant 0 : index
    %268 = vector.load %arg9[%c1_93, %c0_94, %c0_95] : memref<2x32x32xf32, #tpu.memory_space<vmem>>, vector<1x32x32xf32>
    %269 = vector.shape_cast %268 : vector<1x32x32xf32> to vector<32x32xf32>
    %cst_96 = arith.constant dense<0.000000e+00> : vector<10x32xf32>
    %270 = tpu.matmul %267, %269, %cst_96 {dimension_numbers = #tpu.dot_dimension_numbers<[1], [0], [0], [1], [0, 0, 1, 1], [], []>} : vector<10x32xf32>, vector<32x32xf32>, vector<10x32xf32> -> vector<10x32xf32>
    %c1_97 = arith.constant 1 : index
    %c0_98 = arith.constant 0 : index
    %c0_99 = arith.constant 0 : index
    %271 = vector.load %arg10[%c1_97, %c0_98, %c0_99] : memref<2x1x32xf32, #tpu.memory_space<vmem>>, vector<1x1x32xf32>
    %272 = vector.shape_cast %271 : vector<1x1x32xf32> to vector<1x32xf32>
    %273 = vector.broadcast %272 : vector<1x32xf32> to vector<10x32xf32>
    %274 = arith.addf %270, %273 : vector<10x32xf32>
    %275 = arith.addf %176, %274 : vector<10x32xf32>
    %c1_100 = arith.constant 1 : index
    %c0_101 = arith.constant 0 : index
    %c0_102 = arith.constant 0 : index
    %276 = vector.load %arg11[%c1_100, %c0_101, %c0_102] : memref<2x1x32xf32, #tpu.memory_space<vmem>>, vector<1x1x32xf32>
    %277 = vector.shape_cast %276 : vector<1x1x32xf32> to vector<1x32xf32>
    %c1_103 = arith.constant 1 : index
    %c0_104 = arith.constant 0 : index
    %c0_105 = arith.constant 0 : index
    %278 = vector.load %arg12[%c1_103, %c0_104, %c0_105] : memref<2x1x32xf32, #tpu.memory_space<vmem>>, vector<1x1x32xf32>
    %279 = vector.shape_cast %278 : vector<1x1x32xf32> to vector<1x32xf32>
    %cst_106 = arith.constant dense<0.000000e+00> : vector<10xf32>
    %280 = vector.multi_reduction <add>, %275, %cst_106 [1] : vector<10x32xf32> to vector<10xf32>
    %281 = vector.shape_cast %280 : vector<10xf32> to vector<10x1xf32>
    %cst_107 = arith.constant 3.200000e+01 : f32
    %282 = vector.broadcast %cst_107 : f32 to vector<10x1xf32>
    %283 = arith.divf %281, %282 : vector<10x1xf32>
    %284 = vector.broadcast %283 : vector<10x1xf32> to vector<10x32xf32>
    %285 = arith.subf %275, %284 : vector<10x32xf32>
    %286 = arith.mulf %285, %285 : vector<10x32xf32>
    %cst_108 = arith.constant dense<0.000000e+00> : vector<10xf32>
    %287 = vector.multi_reduction <add>, %286, %cst_108 [1] : vector<10x32xf32> to vector<10xf32>
    %288 = vector.shape_cast %287 : vector<10xf32> to vector<10x1xf32>
    %cst_109 = arith.constant 3.200000e+01 : f32
    %289 = vector.broadcast %cst_109 : f32 to vector<10x1xf32>
    %290 = arith.divf %288, %289 : vector<10x1xf32>
    %291 = vector.broadcast %283 : vector<10x1xf32> to vector<10x32xf32>
    %292 = arith.subf %275, %291 : vector<10x32xf32>
    %cst_110 = arith.constant 9.99999974E-6 : f32
    %293 = vector.broadcast %cst_110 : f32 to vector<10x1xf32>
    %294 = arith.addf %290, %293 : vector<10x1xf32>
    %295 = math.rsqrt %294 : vector<10x1xf32>
    %296 = vector.broadcast %295 : vector<10x1xf32> to vector<10x32xf32>
    %297 = arith.mulf %292, %296 : vector<10x32xf32>
    %298 = vector.broadcast %277 : vector<1x32xf32> to vector<10x32xf32>
    %299 = arith.mulf %297, %298 : vector<10x32xf32>
    %300 = vector.broadcast %279 : vector<1x32xf32> to vector<10x32xf32>
    %301 = arith.addf %299, %300 : vector<10x32xf32>
    %c1_111 = arith.constant 1 : index
    %c0_112 = arith.constant 0 : index
    %c0_113 = arith.constant 0 : index
    %302 = vector.load %arg13[%c1_111, %c0_112, %c0_113] : memref<2x32x128xf32, #tpu.memory_space<vmem>>, vector<1x32x128xf32>
    %303 = vector.shape_cast %302 : vector<1x32x128xf32> to vector<32x128xf32>
    %cst_114 = arith.constant dense<0.000000e+00> : vector<10x128xf32>
    %304 = tpu.matmul %301, %303, %cst_114 {dimension_numbers = #tpu.dot_dimension_numbers<[1], [0], [0], [1], [0, 0, 1, 1], [], []>} : vector<10x32xf32>, vector<32x128xf32>, vector<10x128xf32> -> vector<10x128xf32>
    %c1_115 = arith.constant 1 : index
    %c0_116 = arith.constant 0 : index
    %c0_117 = arith.constant 0 : index
    %305 = vector.load %arg14[%c1_115, %c0_116, %c0_117] : memref<2x1x128xf32, #tpu.memory_space<vmem>>, vector<1x1x128xf32>
    %306 = vector.shape_cast %305 : vector<1x1x128xf32> to vector<1x128xf32>
    %307 = vector.broadcast %306 : vector<1x128xf32> to vector<10x128xf32>
    %308 = arith.addf %304, %307 : vector<10x128xf32>
    %cst_118 = arith.constant 1.702000e+00 : f32
    %309 = vector.broadcast %cst_118 : f32 to vector<10x128xf32>
    %310 = arith.mulf %309, %308 : vector<10x128xf32>
    %311 = arith.negf %310 : vector<10x128xf32>
    %312 = math.exp %311 : vector<10x128xf32>
    %cst_119 = arith.constant 1.000000e+00 : f32
    %313 = vector.broadcast %cst_119 : f32 to vector<10x128xf32>
    %314 = arith.addf %313, %312 : vector<10x128xf32>
    %315 = arith.divf %313, %314 : vector<10x128xf32>
    %316 = arith.mulf %308, %315 : vector<10x128xf32>
    %c1_120 = arith.constant 1 : index
    %c0_121 = arith.constant 0 : index
    %c0_122 = arith.constant 0 : index
    %317 = vector.load %arg15[%c1_120, %c0_121, %c0_122] : memref<2x128x32xf32, #tpu.memory_space<vmem>>, vector<1x128x32xf32>
    %318 = vector.shape_cast %317 : vector<1x128x32xf32> to vector<128x32xf32>
    %cst_123 = arith.constant dense<0.000000e+00> : vector<10x32xf32>
    %319 = tpu.matmul %316, %318, %cst_123 {dimension_numbers = #tpu.dot_dimension_numbers<[1], [0], [0], [1], [0, 0, 1, 1], [], []>} : vector<10x128xf32>, vector<128x32xf32>, vector<10x32xf32> -> vector<10x32xf32>
    %c1_124 = arith.constant 1 : index
    %c0_125 = arith.constant 0 : index
    %c0_126 = arith.constant 0 : index
    %320 = vector.load %arg16[%c1_124, %c0_125, %c0_126] : memref<2x1x32xf32, #tpu.memory_space<vmem>>, vector<1x1x32xf32>
    %321 = vector.shape_cast %320 : vector<1x1x32xf32> to vector<1x32xf32>
    %322 = vector.broadcast %321 : vector<1x32xf32> to vector<10x32xf32>
    %323 = arith.addf %319, %322 : vector<10x32xf32>
    %324 = arith.addf %275, %323 : vector<10x32xf32>
    %c0_127 = arith.constant 0 : index
    %c0_128 = arith.constant 0 : index
    %325 = vector.load %arg17[%c0_127, %c0_128] : memref<10x32xf32, #tpu.memory_space<vmem>>, vector<10x32xf32>
    tpu.vector_store %arg17[%c0_127, %c0_128], %324 {strides = array<i32>} : memref<10x32xf32, #tpu.memory_space<vmem>>, vector<10x32xf32>,
    return
  }
}

</mosaic_0001>

<bundles_post_ra>
// kernel: clip_vision_forward.1
= control target key start
LH: loop header
LB: loop body
LE: loop exit
PB: predicated region body
PF: predicated region fallthrough
CT: control target
= control target key end

     0   :  { %v7461_v0 = vmov 0.0|0.0   ;;  %vm86_vm0 = vcmask 523264   ;;  %vm170_vm1 = vcmask 261120   ;;  %vm174_vm2 = vcmask 254976   ;;  %s7465_s18 = smov 104   ;;  %s7467_s19 = smov 96   ;;  %s8788_s1 = inlined_call_operand.vmem [shape: f32[192,32], index: 1, kind: input, shape index: {}]   ;;  %s8789_s0 = inlined_call_operand.vmem [shape: f32[10,192], index: 0, kind: input, shape index: {}]   ;;  %s8790_s2 = inlined_call_operand.vmem [shape: f32[10,32], index: 2, kind: input, shape index: {}]   ;;  %s8791_s3 = inlined_call_operand.vmem [shape: f32[1,32], index: 3, kind: input, shape index: {}]   ;;  %s8792_s4 = inlined_call_operand.vmem [shape: f32[1,32], index: 4, kind: input, shape index: {}]   ;;  %s8793_s7 = inlined_call_operand.vmem [shape: f32[2,32,96], index: 7, kind: input, shape index: {}]   ;;  %s8794_s5 = inlined_call_operand.vmem [shape: f32[2,1,32], index: 5, kind: input, shape index: {}]   ;;  %s8795_s6 = inlined_call_operand.vmem [shape: f32[2,1,32], index: 6, kind: input, shape index: {}]   ;;  %s8796_s8 = inlined_call_operand.vmem [shape: f32[2,1,96], index: 8, kind: input, shape index: {}]   ;;  %s8797_s9 = inlined_call_operand.vmem [shape: f32[2,32,32], index: 9, kind: input, shape index: {}]   ;;  %s8798_s10 = inlined_call_operand.vmem [shape: f32[2,1,32], index: 10, kind: input, shape index: {}]   ;;  %s8799_s13 = inlined_call_operand.vmem [shape: f32[2,32,128], index: 13, kind: input, shape index: {}]   ;;  %s8800_s11 = inlined_call_operand.vmem [shape: f32[2,1,32], index: 11, kind: input, shape index: {}]   ;;  %s8801_s12 = inlined_call_operand.vmem [shape: f32[2,1,32], index: 12, kind: input, shape index: {}]   ;;  %s8802_s15 = inlined_call_operand.vmem [shape: f32[2,128,32], index: 15, kind: input, shape index: {}]   ;;  %s8803_s14 = inlined_call_operand.vmem [shape: f32[2,1,128], index: 14, kind: input, shape index: {}]   ;;  %s8804_s16 = inlined_call_operand.vmem [shape: f32[2,1,32], index: 16, kind: input, shape index: {}]   ;;  %s8805_s17 = inlined_call_operand.vmem [shape: f32[10,32], index: 17, kind: output, shape index: {}]  }
   0x1   :  { %8808 = sst [smem:[#allocation2_spill]] %s8788_s1  ;;  %7201 = vmatprep.subr.bf16.mxu0 %v7461_v0  ;;  %v84_v41 = vld [vmem:[%s8790_s2] sm:$0xff]  ;;  %v85_v45 = vld [vmem:[%s8790_s2 + $0x8] sm:$0x3]  ;;  %s7463_s2 = smov 120   ;;  %vm7468_vm3 = vmmov 0  }
   0x2   :  { %8809 = sst [smem:[#allocation3_spill]] %s8789_s0  ;;  %s8810_s26 = sld [smem:[#allocation2_spill]]  ;;  %vm1029_vm4 = vcmask 64512   ;;  %vm2182_vm5 = vcmask 36864   ;;  %vm2277_vm6 = vcmask 1044480   ;;  %vm2273_vm7 = vcmask 39936  }
   0x3   :  { %s8811_s29 = sld [smem:[#allocation3_spill]]  ;;  %s7471_s0 = smov 16   ;;  %vm2915_vm8 = vcmask 130048   ;;  %vm2918_vm9 = vcmask 195584  }
   0x4   :  { %s7472_s20 = smov 24  }
   0x8   :  { %v60_v1 = vld [vmem:[%s8810_s26] sm:$0xff]  ;;  %v61_v2 = vld [vmem:[%s8810_s26 + $0x8] sm:$0xff]  ;;  %v62_v3 = vld [vmem:[%s8810_s26 + $0x10] sm:$0xff] }
   0x9   :  { %v7202_v4 = vpack.c.bf16 %v61_v2, %v60_v1  ;;  %v63_v5 = vld [vmem:[%s8810_s26 + $0x18] sm:$0xff]  ;;  %v64_v7 = vld [vmem:[%s8810_s26 + $0x20] sm:$0xff]  ;;  %v65_v8 = vld [vmem:[%s8810_s26 + $0x28] sm:$0xff] }
   0xa   :  { %v7205_v6 = vpack.c.bf16 %v63_v5, %v62_v3  ;;  %v7208_v9 = vpack.c.bf16 %v65_v8, %v64_v7  ;;  %v66_v10 = vld [vmem:[%s8810_s26 + $0x30] sm:$0xff]  ;;  %v67_v11 = vld [vmem:[%s8810_s26 + $0x38] sm:$0xff]  ;;  %v57_v12 = vld [vmem:[%s8811_s29 + $0x8] sm:$0xff] }
   0xb   :  { %7203 = vmatpush1.bf16.msra.mxu0 %v7202_v4  ;;  %6615 = vmatprep.mubr.msk.f32.mxu0 %vm86_vm0, %v57_v12  ;;  %v7211_v13 = vpack.c.bf16 %v67_v11, %v66_v10  ;;  %v68_v14 = vld [vmem:[%s8810_s26 + $0x40] sm:$0xff]  ;;  %v69_v15 = vld [vmem:[%s8810_s26 + $0x48] sm:$0xff]  ;;  %v70_v17 = vld [vmem:[%s8810_s26 + $0x50] sm:$0xff] }
   0xc   :  { %7204 = vmatprep.subr.bf16.mxu0 %v7461_v0  ;;  %v7214_v16 = vpack.c.bf16 %v69_v15, %v68_v14  ;;  %v71_v18 = vld [vmem:[%s8810_s26 + $0x58] sm:$0xff]  ;;  %v72_v20 = vld [vmem:[%s8810_s26 + $0x60] sm:$0xff]  ;;  %v73_v21 = vld [vmem:[%s8810_s26 + $0x68] sm:$0xff] }
   0xd   :  { %v7217_v19 = vpack.c.bf16 %v71_v18, %v70_v17  ;;  %v7220_v22 = vpack.c.bf16 %v73_v21, %v72_v20  ;;  %v74_v23 = vld [vmem:[%s8810_s26 + $0x70] sm:$0xff]  ;;  %v75_v24 = vld [vmem:[%s8810_s26 + $0x78] sm:$0xff]  ;;  %v76_v26 = vld [vmem:[%s8810_s26 + $0x80] sm:$0xff] }
   0xe   :  { %v7223_v25 = vpack.c.bf16 %v75_v24, %v74_v23  ;;  %v77_v27 = vld [vmem:[%s8810_s26 + $0x88] sm:$0xff]  ;;  %v78_v29 = vld [vmem:[%s8810_s26 + $0x90] sm:$0xff]  ;;  %v79_v30 = vld [vmem:[%s8810_s26 + $0x98] sm:$0xff] }
   0xf   :  { %7206 = vmatpush1.bf16.msra.mxu0 %v7205_v6  ;;  %v7226_v28 = vpack.c.bf16 %v77_v27, %v76_v26  ;;  %v7229_v31 = vpack.c.bf16 %v79_v30, %v78_v29  ;;  %v80_v32 = vld [vmem:[%s8810_s26 + $0xa0] sm:$0xff]  ;;  %v81_v33 = vld [vmem:[%s8810_s26 + $0xa8] sm:$0xff]  ;;  %v82_v35 = vld [vmem:[%s8810_s26 + $0xb0] sm:$0xff] }
  0x10   :  { %7207 = vmatprep.subr.bf16.mxu0 %v7461_v0  ;;  %v7232_v34 = vpack.c.bf16 %v81_v33, %v80_v32  ;;  %v83_v36 = vld [vmem:[%s8810_s26 + $0xb8] sm:$0xff]  ;;  %v56_v38 = vld [vmem:[%s8811_s29] sm:$0xff]  ;;  %v58_v40 = vld [vmem:[%s8811_s29 + $0x10] sm:$0x3] }
  0x11   :  { %v7235_v37 = vpack.c.bf16 %v83_v36, %v82_v35  ;;  %v59_v39 = vld [vmem:[%s8811_s29 + $0x18] sm:$0x3]  ;;  %v6617_v4 = vld [vmem:[%s8791_s3] ss:$0 sm:$0xff]  ;;  %v260_v26 = vld [vmem:[%s8793_s7 + $0x8] sm:$0xff]  ;;  %s7464_s29 = smov 112  }
  0x12   :  { %v6618_v6 = vld [vmem:[%s8792_s4] ss:$0 sm:$0xff]  ;;  %v261_v27 = vld [vmem:[%s8793_s7 + $0x10] sm:$0xff]  ;;  %v262_v29 = vld [vmem:[%s8793_s7 + $0x18] sm:$0xff]  ;;  %s7469_s3 = smov 64   ;;  %s7470_s4 = smov 8  }
  0x13   :  { %7209 = vmatpush1.bf16.msra.mxu0 %v7208_v9  ;;  %v7241_v30 = vpack.c.bf16 %v262_v29, %v261_v27 }
  0x14   :  { %7210 = vmatprep.subr.bf16.mxu0 %v7461_v0 }
  0x17   :  { %7212 = vmatpush1.bf16.msra.mxu0 %v7211_v13 }
  0x18   :  { %7213 = vmatprep.subr.bf16.mxu0 %v7461_v0 }
  0x1b   :  { %7215 = vmatpush1.bf16.msra.mxu0 %v7214_v16 }
  0x1c   :  { %7216 = vmatprep.subr.bf16.mxu0 %v7461_v0 }
  0x1f   :  { %7218 = vmatpush1.bf16.msra.mxu0 %v7217_v19 }
  0x20   :  { %7219 = vmatprep.subr.bf16.mxu0 %v7461_v0 }
  0x23   :  { %7221 = vmatpush1.bf16.msra.mxu0 %v7220_v22 }
  0x24   :  { %7222 = vmatprep.subr.bf16.mxu0 %v7461_v0 }
  0x27   :  { %7224 = vmatpush1.bf16.msra.mxu0 %v7223_v25  ;;  %v259_v25 = vld [vmem:[%s8793_s7] sm:$0xff] }
  0x28   :  { %7225 = vmatprep.subr.bf16.mxu0 %v7461_v0 }
  0x2b   :  { %7227 = vmatpush1.bf16.msra.mxu0 %v7226_v28  ;;  %v7237_v28 = vpack.c.bf16 %v260_v26, %v259_v25 }
  0x2c   :  { %7228 = vmatprep.subr.bf16.mxu0 %v7461_v0 }
  0x2f   :  { %7230 = vmatpush1.bf16.msra.mxu0 %v7229_v31 }
  0x30   :  { %7231 = vmatprep.subr.bf16.mxu0 %v7461_v0 }
  0x33   :  { %7233 = vmatpush1.bf16.msra.mxu0 %v7232_v34 }
  0x34   :  { %7234 = vmatprep.subr.bf16.mxu0 %v7461_v0 }
  0x37   :  { %7236 = vmatpush1.bf16.msra.mxu0 %v7235_v37 }
  0x38   :  { %7238 = vmatprep.subr.bf16.mxu0 %v7237_v28 }
  0x3a   :  { %158 = vmatmul.mubr.f32.vlgmr.msra.gmra.mrb[0].mxu0 %v56_v38  ;;  %v6619_v38 = vld [vmem:[%s8794_s5] ss:$0 sm:$0xff] }
  0x3b   :  { %6616 = vmatprep.mubr.msk.f32.mxu0 %vm86_vm0, %v59_v39  ;;  %7240 = vmatpush3.bf16.msra.mxu0 %v7237_v28 }
  0x3c   :  { %7242 = vmatprep.subr.bf16.mxu0 %v7241_v30 }
  0x3e   :  { %163 = vmatmul.mubr.f32.gmra.mrb[2].mxu0 %v58_v40  ;;  %v6620_v40 = vld [vmem:[%s8795_s6] ss:$0 sm:$0xff] }
  0x3f   :  { %7244 = vmatpush3.bf16.msra.mxu0 %v7241_v30 }
 0x10d   :  { %v159_v42 = vpop.f32.mrb[0].mxu0 }
 0x10e   :  { %v160_v43 = vadd.f32 %v159_v42, %v84_v41  ;;  %v161_v44 = vpop.f32.mrb[1].mxu0 }
 0x110   :  { %v171_v46 = vsel %vm170_vm1, %v160_v43, 0.0 }
 0x111   :  { %v164_v47 = vpop.f32.mrb[2].mxu0  ;;  %172 = vadd.xlane.f32.xlu0 %v171_v46 }
 0x112   :  { %v165_v48 = vadd.f32 %v164_v47, %v85_v45  ;;  %v166_v49 = vpop.f32.mrb[3].mxu0  ;;  %v7462_v47 = vmov 1966171168  }
 0x113   :  { %v371_v49 = vlaneseq }
 0x114   :  { %v175_v50 = vsel %vm174_vm2, %v165_v48, 0.0 }
 0x115   :  { %176 = vadd.xlane.f32.xlu0 %v175_v50 }
 0x19e   :  { %v173_v51 = vpop.xlane.xlu0 %172 }
 0x19f   :  { %v179_v52 = vmul.f32 0.03125, %v173_v51  ;;  %v372_v51 = vshrl.u32 %v371_v49, 7 }
 0x1a1   :  { %v181_v53 = vsub.f32 %v160_v43, %v179_v52  ;;  %v6621_v52 = vld [vmem:[%s8796_s8] ss:$0 sm:$0xff] }
 0x1a2   :  { %v177_v54 = vpop.xlane.xlu0 %176 }
 0x1a3   :  { %v180_v55 = vmul.f32 0.03125, %v177_v54  ;;  %v183_v56 = vmul.f32 %v181_v53, %v181_v53 }
 0x1a5   :  { %v182_v57 = vsub.f32 %v165_v48, %v180_v55  ;;  %v185_v58 = vsel %vm170_vm1, %v183_v56, 0.0  ;;  %v369_v48 = vunpack.c.l.s4 %v7462_v47 }
 0x1a6   :  { %186 = vadd.xlane.f32.xlu1 %v185_v58 }
 0x1a7   :  { %v184_v59 = vmul.f32 %v182_v57, %v182_v57  ;;  %v370_v50 = vunpack.c.0.s8 %v369_v48 }
 0x1a9   :  { %v188_v60 = vsel %vm174_vm2, %v184_v59, 0.0  ;;  %v7712_v54 = vsub.s32 %v370_v50, %v372_v51 }
 0x1aa   :  { %189 = vadd.xlane.f32.xlu1 %v188_v60 }
 0x233   :  { %v187_v61 = vpop.xlane.xlu1 %186 }
 0x234   :  { %v191_v62 = vmul.f32 0.03125, %v187_v61 }
 0x236   :  { %v193_v63 = vadd.f32 1e-05, %v191_v62 }
 0x237   :  { %v190_v0 = vpop.xlane.xlu1 %189 }
 0x238   :  { %7361 = vrsqrt.f32 %v193_v63  ;;  %v192_v1 = vmul.f32 0.03125, %v190_v0 }
 0x23a   :  { %v194_v2 = vadd.f32 1e-05, %v192_v1 }
 0x23c   :  { %7363 = vrsqrt.f32 %v194_v2 }
 0x242   :  { %v7362_v3 = vpop.eup %7361 }
 0x243   :  { %v197_v5 = vmul.f32 %v7362_v3, %v181_v53 }
 0x245   :  { %v205_v7 = vmul.f32 %v6617_v4, %v197_v5 }
 0x246   :  { %v7364_v8 = vpop.eup %7363 }
 0x247   :  { %v7677_v9 = vadd.f32 %v6618_v6, %v205_v7  ;;  %v198_v10 = vmul.f32 %v7364_v8, %v182_v57 }
 0x249   :  { %v217_v11 = vsel %vm170_vm1, %v7677_v9, 0.0  ;;  %v206_v12 = vmul.f32 %v6617_v4, %v198_v10 }
 0x24a   :  { %218 = vadd.xlane.f32.xlu0 %v217_v11 }
 0x24b   :  { %v7681_v13 = vadd.f32 %v6618_v6, %v206_v12 }
 0x24d   :  { %v220_v14 = vsel %vm174_vm2, %v7681_v13, 0.0 }
 0x24e   :  { %221 = vadd.xlane.f32.xlu1 %v220_v14 }
 0x2d7   :  { %v219_v15 = vpop.xlane.xlu0 %218 }
 0x2d8   :  { %v223_v16 = vmul.f32 0.03125, %v219_v15 }
 0x2da   :  { %v225_v17 = vsub.f32 %v7677_v9, %v223_v16 }
 0x2db   :  { %v222_v18 = vpop.xlane.xlu1 %221 }
 0x2dc   :  { %v224_v19 = vmul.f32 0.03125, %v222_v18  ;;  %v227_v20 = vmul.f32 %v225_v17, %v225_v17 }
 0x2de   :  { %v226_v21 = vsub.f32 %v7681_v13, %v224_v19  ;;  %v229_v22 = vsel %vm170_vm1, %v227_v20, 0.0 }
 0x2df   :  { %230 = vadd.xlane.f32.xlu0 %v229_v22 }
 0x2e0   :  { %v228_v23 = vmul.f32 %v226_v21, %v226_v21 }
 0x2e2   :  { %v232_v24 = vsel %vm174_vm2, %v228_v23, 0.0 }
 0x2e3   :  { %233 = vadd.xlane.f32.xlu1 %v232_v24 }
 0x36c   :  { %v231_v31 = vpop.xlane.xlu0 %230 }
 0x36d   :  { %v235_v32 = vmul.f32 0.03125, %v231_v31 }
 0x36f   :  { %v237_v33 = vadd.f32 1e-05, %v235_v32 }
 0x370   :  { %v234_v34 = vpop.xlane.xlu1 %233 }
 0x371   :  { %7365 = vrsqrt.f32 %v237_v33  ;;  %v236_v35 = vmul.f32 0.03125, %v234_v34 }
 0x373   :  { %v238_v36 = vadd.f32 1e-05, %v236_v35 }
 0x375   :  { %7367 = vrsqrt.f32 %v238_v36 }
 0x37b   :  { %v7366_v37 = vpop.eup %7365 }
 0x37c   :  { %v241_v39 = vmul.f32 %v7366_v37, %v225_v17 }
 0x37e   :  { %v249_v41 = vmul.f32 %v6619_v38, %v241_v39 }
 0x37f   :  { %v7368_v42 = vpop.eup %7367 }
 0x380   :  { %v242_v43 = vmul.f32 %v7368_v42, %v226_v21  ;;  %v257_v44 = vadd.f32 %v6620_v40, %v249_v41  ;;  %v7466_v21 = vmov 0.0  }
 0x381   :  { %6916 = vmatprep.subr.mxu1 %v7466_v21  ;;  %6971 = vmatprep.subr.mxu0 %v7466_v21 }
 0x382   :  { %v250_v45 = vmul.f32 %v6619_v38, %v242_v43  ;;  %6913 = vmatprep.mubr.msk.f32.mxu0 %vm170_vm1, %v257_v44  ;;  %6918 = vmatprep.mubr.msk.f32.mxu1 %vm7468_vm3, %v7466_v21 }
 0x384   :  { %v258_v46 = vadd.f32 %v6620_v40, %v250_v45 }
 0x386   :  { %6914 = vmatmul.mubr.msk.f32.vlgmr.msra.gmra.mrb[4].mxu0 %vm170_vm1, %v258_v46 }
 0x387   :  { %6973 = vmatprep.mubr.msk.f32.mxu0 %vm7468_vm3, %v7466_v21 }
 0x459   :  { %v6915_v53 = vpop.f32.mrb[4].mxu0 }
 0x45a   :  { %v348_v55 = vadd.f32 %v6915_v53, %v6621_v52  ;;  %v342_v56 = vpop.f32.mrb[5].mxu0 }
 0x45b   :  { %v343_v57 = vadd.f32 %v6621_v52, %v342_v56 }
 0x45c   :  { %655 = vrot.lane.b32.xlu1 %v348_v55, %s7463_s2  ;;  %v720_v60 = vrot.slane %v348_v55, %v7712_v54  ;;  %v7735_v18 = vmul.f32 0.35355338, %v348_v55 }
 0x45d   :  { %653 = vrot.lane.b32.xlu0 %v343_v57, %s7463_s2  ;;  %v665_v58 = vcombine.high %v343_v57, %v343_v57  ;;  %v672_v59 = vrot.slane %v343_v57, %v7712_v54  ;;  %v7724_v4 = vmul.f32 0.35355338, %v343_v57 }
 0x45e   :  { %v721_v3 = vcombine.high %v720_v60, %v720_v60  ;;  %v728_v15 = vrot.slane %v720_v60, %v7712_v54  ;;  %v422_v42 = vrot.slane %v7735_v18, %v7712_v54 }
 0x45f   :  { %v679_v61 = vrot.slane %v665_v58, %v7712_v54  ;;  %v680_v62 = vcombine.high %v672_v59, %v672_v59  ;;  %v688_v63 = vrot.slane %v672_v59, %v7712_v54  ;;  %v367_v32 = vcombine.high %v7724_v4, %v7724_v4 }
 0x460   :  { %657 = vrot.lane.b32.xlu1 %v343_v57, %s7464_s29  ;;  %v735_v16 = vrot.slane %v721_v3, %v7712_v54  ;;  %v374_v33 = vrot.slane %v7724_v4, %v7712_v54  ;;  %v430_v48 = vrot.slane %v422_v42, %v7712_v54  ;;  %v423_v58 = vcombine.high %v422_v42, %v422_v42 }
 0x461   :  { %661 = vrot.lane.b32.xlu0 %v343_v57, %s7465_s18  ;;  %v695_v0 = vrot.slane %v679_v61, %v7712_v54  ;;  %v702_v1 = vrot.slane %v680_v62, %v7712_v54  ;;  %v681_v2 = vcombine.high %v679_v61, %v679_v61  ;;  %v381_v34 = vrot.slane %v367_v32, %v7712_v54 }
 0x462   :  { %v1165_v26 = vrot.slane %v735_v16, %v7712_v54  ;;  %v382_v35 = vcombine.high %v374_v33, %v374_v33  ;;  %v390_v41 = vrot.slane %v374_v33, %v7712_v54 }
 0x463   :  { %v988_v5 = vcombine.low %v688_v63, %v702_v1  ;;  %v6625_v6 = vcombine.high %v688_v63, %v702_v1  ;;  %v711_v7 = vcombine.high %v695_v0, %v695_v0  ;;  %v709_v8 = vrot.slane %v681_v2, %v7712_v54 }
 0x464   :  { %659 = vrot.lane.b32.xlu1 %v348_v55, %s7464_s29  ;;  %v1010_v12 = vrot.slane %v695_v0, %v7712_v54  ;;  %v1180_v30 = vrot.slane %v1165_v26, %v7712_v54  ;;  %v383_v36 = vcombine.high %v381_v34, %v381_v34  ;;  %v404_v37 = vrot.slane %v382_v35, %v7712_v54 }
 0x465   :  { %355 = vrot.lane.b32.xlu0 %v7724_v4, %s7463_s2  ;;  %v996_v10 = vrot.slane %v988_v5, %v7712_v54  ;;  %v1003_v11 = vrot.slane %v6625_v6, %v7712_v54  ;;  %v713_v14 = vcombine.high %v709_v8, %v709_v8  ;;  %v1143_v17 = vcombine.low %v709_v8, %v711_v7 }
 0x466   :  { %v1025_v23 = vrot.slane %v1010_v12, %v7712_v54  ;;  %v411_v39 = vrot.slane %v383_v36, %v7712_v54  ;;  %v397_v43 = vrot.slane %v381_v34, %v7712_v54  ;;  %v949_v44 = vcombine.low %v390_v41, %v404_v37 }
 0x467   :  { %v1011_v19 = vcombine.low %v996_v10, %v1003_v11  ;;  %v1144_v20 = vcombine.low %v713_v14, %v728_v15  ;;  %v1151_v24 = vrot.slane %v1143_v17, %v7712_v54  ;;  %v6624_v45 = vcombine.high %v390_v41, %v404_v37 }
 0x468   :  { %663 = vrot.lane.b32.xlu1 %v348_v55, %s7465_s18  ;;  %v415_v47 = vcombine.high %v411_v39, %v411_v39  ;;  %v413_v51 = vcombine.high %v397_v43, %v397_v43  ;;  %v957_v53 = vrot.slane %v949_v44, %v7712_v54  ;;  %v971_v3 = vrot.slane %v397_v43, %v7712_v54 }
 0x469   :  { %357 = vrot.lane.b32.xlu0 %v7735_v18, %s7463_s2  ;;  %v1018_v22 = vrot.slane %v1011_v19, %v7712_v54  ;;  %v1158_v25 = vrot.slane %v1144_v20, %v7712_v54  ;;  %v964_v55 = vrot.slane %v6624_v45, %v7712_v54  ;;  %v437_v7 = vrot.slane %v423_v58, %v7712_v54 }
 0x46a   :  { %v1105_v57 = vcombine.low %v415_v47, %v430_v48  ;;  %v1104_v60 = vcombine.low %v411_v39, %v413_v51  ;;  %v986_v20 = vrot.slane %v971_v3, %v7712_v54 }
 0x46b   :  { %v7747_v27 = vcombine.low %v1018_v22, %v1025_v23  ;;  %v1166_v28 = vcombine.low %v1151_v24, %v1158_v25  ;;  %v972_v63 = vcombine.low %v957_v53, %v964_v55  ;;  %v1126_v26 = vrot.slane %v437_v7, %v7712_v54 }
 0x46c   :  { %v1119_v2 = vrot.slane %v1105_v57, %v7712_v54  ;;  %v1112_v8 = vrot.slane %v1104_v60, %v7712_v54 }
 0x46d   :  { %1027 = vrot.lane.b32.xlu1 %v7747_v27, %s7467_s19  ;;  %v1173_v29 = vrot.slane %v1166_v28, %v7712_v54  ;;  %v979_v12 = vrot.slane %v972_v63, %v7712_v54  ;;  %v1141_v41 = vrot.slane %v1126_v26, %v7712_v54 }
 0x46e   :  { %v1127_v15 = vcombine.low %v1112_v8, %v1119_v2 }
 0x46f   :  { %v7753_v31 = vcombine.low %v1173_v29, %v1180_v30  ;;  %v987_v32 = vcombine.low %v979_v12, %v986_v20 }
 0x470   :  { %v1134_v34 = vrot.slane %v1127_v15, %v7712_v54 }
 0x471   :  { %359 = vrot.lane.b32.xlu1 %v7724_v4, %s7464_s29  ;;  %1182 = vrot.lane.b32.xlu0 %v7753_v31, %s7467_s19 }
 0x472   :  { %v1142_v48 = vcombine.low %v1134_v34, %v1141_v41 }
 0x475   :  { %361 = vrot.lane.b32.xlu0 %v7735_v18, %s7464_s29 }
 0x4ce   :  { %v656_v38 = vpop.permute.xlu1 %655 }
 0x4cf   :  { %v654_v40 = vpop.permute.xlu0 %653  ;;  %v791_v16 = vrot.slane %v656_v38, %v7712_v54 }
 0x4d0   :  { %v743_v49 = vrot.slane %v654_v40, %v7712_v54  ;;  %v736_v52 = vcombine.high %v654_v40, %v654_v40 }
 0x4d1   :  { %v792_v35 = vcombine.high %v791_v16, %v791_v16 }
 0x4d2   :  { %v658_v46 = vpop.permute.xlu1 %657  ;;  %v751_v59 = vcombine.high %v743_v49, %v743_v49  ;;  %v750_v61 = vrot.slane %v736_v52, %v7712_v54  ;;  %v759_v14 = vrot.slane %v743_v49, %v7712_v54 }
 0x4d3   :  { %v662_v50 = vpop.permute.xlu0 %661  ;;  %v807_v62 = vcombine.high %v658_v46, %v658_v46  ;;  %v814_v17 = vrot.slane %v658_v46, %v7712_v54  ;;  %v799_v46 = vrot.slane %v791_v16, %v7712_v54  ;;  %v806_v49 = vrot.slane %v792_v35, %v7712_v54 }
 0x4d4   :  { %v773_v5 = vrot.slane %v751_v59, %v7712_v54  ;;  %v878_v6 = vcombine.high %v662_v50, %v662_v50  ;;  %v752_v10 = vcombine.high %v750_v61, %v750_v61  ;;  %v766_v28 = vrot.slane %v750_v61, %v7712_v54 }
 0x4d5   :  { %v821_v11 = vrot.slane %v807_v62, %v7712_v54  ;;  %v885_v33 = vrot.slane %v662_v50, %v7712_v54  ;;  %v822_v36 = vcombine.high %v814_v17, %v814_v17  ;;  %v830_v53 = vrot.slane %v814_v17, %v7712_v54 }
 0x4d6   :  { %v660_v56 = vpop.permute.xlu1 %659  ;;  %v1297_v22 = vcombine.low %v759_v14, %v773_v5  ;;  %v6631_v23 = vcombine.high %v759_v14, %v773_v5  ;;  %v892_v24 = vrot.slane %v878_v6, %v7712_v54  ;;  %v780_v29 = vrot.slane %v752_v10, %v7712_v54 }
 0x4d7   :  { %v7781_v0 = vpop.permute.xlu0 %355  ;;  %v823_v30 = vcombine.high %v821_v11, %v821_v11  ;;  %v782_v42 = vcombine.high %v766_v28, %v766_v28  ;;  %v7811_v44 = vrot.slane %v821_v11, %v7712_v54  ;;  %v893_v47 = vcombine.high %v885_v33, %v885_v33 }
 0x4d8   :  { %v1305_v37 = vrot.slane %v1297_v22, %v7712_v54  ;;  %v1312_v38 = vrot.slane %v6631_v23, %v7712_v54  ;;  %v894_v39 = vcombine.high %v892_v24, %v892_v24  ;;  %v784_v43 = vcombine.high %v780_v29, %v780_v29 }
 0x4d9   :  { %v851_v45 = vrot.slane %v823_v30, %v7712_v54  ;;  %v844_v50 = vrot.slane %v822_v36, %v7712_v54  ;;  %v862_v51 = vrot.slane %v660_v56, %v7712_v54  ;;  %v1319_v52 = vrot.slane %v766_v28, %v7712_v54 }
 0x4da   :  { %v664_v1 = vpop.permute.xlu1 %663  ;;  %v922_v55 = vrot.slane %v894_v39, %v7712_v54  ;;  %v1320_v58 = vcombine.low %v1305_v37, %v1312_v38  ;;  %v1451_v59 = vcombine.low %v780_v29, %v782_v42  ;;  %v853_v60 = vcombine.high %v7811_v44, %v7811_v44 }
 0x4db   :  { %v7795_v25 = vpop.permute.xlu0 %357  ;;  %v933_v57 = vrot.slane %v664_v1, %v7712_v54  ;;  %v855_v61 = vcombine.high %v851_v45, %v851_v45  ;;  %v1452_v62 = vcombine.low %v784_v43, %v799_v46  ;;  %v908_v56 = vrot.slane %v892_v24, %v7712_v54 }
 0x4dc   :  { %v915_v63 = vrot.slane %v893_v47, %v7712_v54  ;;  %v1327_v2 = vrot.slane %v1320_v58, %v7712_v54  ;;  %v1334_v1 = vrot.slane %v1319_v52, %v7712_v54  ;;  %v1605_v3 = vcombine.low %v830_v53, %v844_v50 }
 0x4dd   :  { %v6637_v5 = vcombine.high %v830_v53, %v844_v50  ;;  %v901_v6 = vrot.slane %v885_v33, %v7712_v54  ;;  %v870_v7 = vrot.slane %v862_v51, %v7712_v54  ;;  %v863_v8 = vcombine.high %v862_v51, %v862_v51 }
 0x4de   :  { %v926_v10 = vcombine.high %v922_v55, %v922_v55  ;;  %v941_v11 = vrot.slane %v933_v57, %v7712_v54  ;;  %v7836_v12 = vcombine.low %v1327_v2, %v1334_v1  ;;  %v1473_v14 = vrot.slane %v806_v49, %v7712_v54 }
 0x4df   :  { %v1028_v19 = vpop.permute.xlu1 %1027  ;;  %v1760_v15 = vcombine.low %v855_v61, %v870_v7  ;;  %v1459_v16 = vrot.slane %v1451_v59, %v7712_v54  ;;  %v1466_v17 = vrot.slane %v1452_v62, %v7712_v54  ;;  %v1913_v20 = vcombine.low %v901_v6, %v915_v63 }
 0x4e0   :  { %6917 = vmatpush3.xpose.msk.msra.mxu1 %vm1029_vm4, %v1028_v19  ;;  %v924_v19 = vcombine.high %v908_v56, %v908_v56  ;;  %v6643_v22 = vcombine.high %v901_v6, %v915_v63  ;;  %1336 = vrot.lane.b32.xlu1 %v7836_v12, %s7467_s19  ;;  %v1613_v23 = vrot.slane %v1605_v3, %v7712_v54 }
 0x4e1   :  { %6921 = vmatprep.subr.mxu1 %v7466_v21  ;;  %v1620_v24 = vrot.slane %v6637_v5, %v7712_v54  ;;  %v1759_v26 = vcombine.low %v851_v45, %v853_v60  ;;  %v1474_v28 = vcombine.low %v1459_v16, %v1466_v17  ;;  %v877_v29 = vrot.slane %v863_v8, %v7712_v54 }
 0x4e2   :  { %v934_v30 = vcombine.high %v933_v57, %v933_v57  ;;  %v1774_v33 = vrot.slane %v1760_v15, %v7712_v54  ;;  %v1488_v35 = vrot.slane %v1473_v14, %v7712_v54  ;;  %v1921_v36 = vrot.slane %v1913_v20, %v7712_v54 }
 0x4e3   :  { %6919 = vmatmul.mubr.msk.f32.vlgmr.msra.gmra.mrb[0].mxu1 %vm1029_vm4, %v987_v32  ;;  %v1183_v40 = vpop.permute.xlu0 %1182  ;;  %v2068_v32 = vcombine.low %v926_v10, %v941_v11  ;;  %v1481_v34 = vrot.slane %v1474_v28, %v7712_v54  ;;  %v1928_v37 = vrot.slane %v6643_v22, %v7712_v54  ;;  %v2067_v38 = vcombine.low %v922_v55, %v924_v19  ;;  %v360_v3 = vpop.permute.xlu1 %359 }
 0x4e4   :  { %6923 = vmatprep.mubr.msk.f32.mxu1 %vm7468_vm3, %v7466_v21  ;;  %6922 = vmatpush3.xpose.msk.msra.mxu1 %vm1029_vm4, %v1183_v40  ;;  %v1627_v39 = vrot.slane %v7811_v44, %v7712_v54  ;;  %v1628_v41 = vcombine.low %v1613_v23, %v1620_v24  ;;  %v1767_v42 = vrot.slane %v1759_v26, %v7712_v54 }
 0x4e5   :  { %6926 = vmatprep.subr.mxu1 %v7466_v21  ;;  %363 = vrot.lane.b32.xlu1 %v7724_v4, %s7465_s18  ;;  %v7855_v40 = vcombine.low %v1481_v34, %v1488_v35  ;;  %v1781_v43 = vrot.slane %v877_v29, %v7712_v54  ;;  %v948_v45 = vrot.slane %v934_v30, %v7712_v54 }
 0x4e6   :  { %v2082_v46 = vrot.slane %v2068_v32, %v7712_v54  ;;  %v1635_v47 = vrot.slane %v1628_v41, %v7712_v54  ;;  %v1642_v4 = vrot.slane %v1627_v39, %v7712_v54  ;;  %v1935_v44 = vrot.slane %v908_v56, %v7712_v54 }
 0x4e7   :  { %6924 = vmatmul.mubr.msk.f32.vlgmr.msra.gmra.mrb[2].mxu1 %vm1029_vm4, %v1142_v48  ;;  %1490 = vrot.lane.b32.xlu0 %v7855_v40, %s7467_s19  ;;  %v1782_v48 = vcombine.low %v1767_v42, %v1774_v33  ;;  %v1936_v49 = vcombine.low %v1921_v36, %v1928_v37  ;;  %v2075_v50 = vrot.slane %v2067_v38, %v7712_v54  ;;  %v362_v30 = vpop.permute.xlu0 %361 }
 0x4e8   :  { %6928 = vmatprep.mubr.msk.f32.mxu1 %vm7468_vm3, %v7466_v21  ;;  %v7867_v51 = vcombine.low %v1635_v47, %v1642_v4  ;;  %v2089_v57 = vrot.slane %v948_v45, %v7712_v54  ;;  %v1796_v58 = vrot.slane %v1781_v43, %v7712_v54  ;;  %v1950_v59 = vrot.slane %v1935_v44, %v7712_v54 }
 0x4e9   :  { %v1789_v52 = vrot.slane %v1782_v48, %v7712_v54  ;;  %v1943_v53 = vrot.slane %v1936_v49, %v7712_v54  ;;  %v2090_v55 = vcombine.low %v2075_v50, %v2082_v46  ;;  %v445_v2 = vrot.slane %v7781_v0, %v7712_v54 }
 0x4ea   :  { %1644 = vrot.lane.b32.xlu1 %v7867_v51, %s7467_s19  ;;  %v2104_v56 = vrot.slane %v2089_v57, %v7712_v54  ;;  %v509_v7 = vcombine.high %v360_v3, %v360_v3  ;;  %v516_v14 = vrot.slane %v360_v3, %v7712_v54  ;;  %v493_v19 = vrot.slane %v7795_v25, %v7712_v54 }
 0x4eb   :  { %365 = vrot.lane.b32.xlu0 %v7735_v18, %s7465_s18  ;;  %v7878_v60 = vcombine.low %v1789_v52, %v1796_v58  ;;  %v7880_v61 = vcombine.low %v1943_v53, %v1950_v59  ;;  %v2097_v62 = vrot.slane %v2090_v55, %v7712_v54  ;;  %v438_v18 = vcombine.high %v7781_v0, %v7781_v0 }
 0x4ec   :  { %v453_v5 = vcombine.high %v445_v2, %v445_v2  ;;  %v461_v10 = vrot.slane %v445_v2, %v7712_v54  ;;  %v523_v15 = vrot.slane %v509_v7, %v7712_v54  ;;  %v524_v22 = vcombine.high %v516_v14, %v516_v14 }
 0x4ed   :  { %v7888_v63 = vcombine.low %v2097_v62, %v2104_v56  ;;  %v452_v1 = vrot.slane %v438_v18, %v7712_v54  ;;  %v501_v29 = vrot.slane %v493_v19, %v7712_v54  ;;  %v494_v36 = vcombine.high %v493_v19, %v493_v19 }
 0x4ee   :  { %1798 = vrot.lane.b32.xlu1 %v7878_v60, %s7467_s19  ;;  %v475_v8 = vrot.slane %v453_v5, %v7712_v54  ;;  %v525_v23 = vcombine.high %v523_v15, %v523_v15  ;;  %v546_v33 = vrot.slane %v524_v22, %v7712_v54  ;;  %v532_v25 = vrot.slane %v516_v14, %v7712_v54 }
 0x4ef   :  { %1952 = vrot.lane.b32.xlu0 %v7880_v61, %s7467_s19  ;;  %v454_v6 = vcombine.high %v452_v1, %v452_v1  ;;  %v468_v16 = vrot.slane %v452_v1, %v7712_v54  ;;  %v539_v38 = vrot.slane %v523_v15, %v7712_v54  ;;  %v564_v39 = vrot.slane %v362_v30, %v7712_v54 }
 0x4f0   :  { %v1258_v17 = vcombine.low %v461_v10, %v475_v8  ;;  %v6630_v0 = vcombine.high %v461_v10, %v475_v8  ;;  %v553_v34 = vrot.slane %v525_v23, %v7712_v54  ;;  %v1566_v43 = vcombine.low %v532_v25, %v546_v33 }
 0x4f1   :  { %v482_v11 = vrot.slane %v454_v6, %v7712_v54  ;;  %v484_v24 = vcombine.high %v468_v16, %v468_v16  ;;  %v1280_v41 = vrot.slane %v468_v16, %v7712_v54  ;;  %v6636_v45 = vcombine.high %v532_v25, %v546_v33 }
 0x4f2   :  { %2106 = vrot.lane.b32.xlu1 %v7888_v63, %s7467_s19  ;;  %v1266_v26 = vrot.slane %v1258_v17, %v7712_v54  ;;  %v1273_v28 = vrot.slane %v6630_v0, %v7712_v54  ;;  %v557_v46 = vcombine.high %v553_v34, %v553_v34  ;;  %v508_v48 = vrot.slane %v494_v36, %v7712_v54 }
 0x4f3   :  { %v486_v20 = vcombine.high %v482_v11, %v482_v11  ;;  %v1412_v35 = vcombine.low %v482_v11, %v484_v24  ;;  %v555_v44 = vcombine.high %v539_v38, %v539_v38  ;;  %v572_v49 = vrot.slane %v564_v39, %v7712_v54 }
 0x4f4   :  { %v1281_v37 = vcombine.low %v1266_v26, %v1273_v28  ;;  %v1295_v50 = vrot.slane %v1280_v41, %v7712_v54  ;;  %v1574_v53 = vrot.slane %v1566_v43, %v7712_v54  ;;  %v1581_v55 = vrot.slane %v6636_v45, %v7712_v54 }
 0x4f5   :  { %v1413_v32 = vcombine.low %v486_v20, %v501_v29  ;;  %v1420_v47 = vrot.slane %v1412_v35, %v7712_v54  ;;  %v1721_v57 = vcombine.low %v557_v46, %v572_v49  ;;  %v1434_v59 = vrot.slane %v508_v48, %v7712_v54 }
 0x4f6   :  { %v1288_v4 = vrot.slane %v1281_v37, %v7712_v54  ;;  %v1720_v62 = vcombine.low %v553_v34, %v555_v44  ;;  %v565_v56 = vcombine.high %v564_v39, %v564_v39  ;;  %v1589_v1 = vcombine.low %v1574_v53, %v1581_v55 }
 0x4f7   :  { %v1427_v42 = vrot.slane %v1413_v32, %v7712_v54  ;;  %v1735_v3 = vrot.slane %v1721_v57, %v7712_v54  ;;  %v1449_v8 = vrot.slane %v1434_v59, %v7712_v54  ;;  %v1588_v10 = vrot.slane %v539_v38, %v7712_v54 }
 0x4f8   :  { %v1296_v18 = vcombine.low %v1288_v4, %v1295_v50  ;;  %v1728_v11 = vrot.slane %v1720_v62, %v7712_v54  ;;  %v579_v14 = vrot.slane %v565_v56, %v7712_v54  ;;  %v1596_v19 = vrot.slane %v1589_v1, %v7712_v54 }
 0x4f9   :  { %v1435_v52 = vcombine.low %v1420_v47, %v1427_v42  ;;  %v1603_v28 = vrot.slane %v1588_v10, %v7712_v54 }
 0x4fa   :  { %v1743_v20 = vcombine.low %v1728_v11, %v1735_v3  ;;  %v1742_v29 = vrot.slane %v579_v14, %v7712_v54 }
 0x4fb   :  { %v1442_v2 = vrot.slane %v1435_v52, %v7712_v54  ;;  %v1604_v38 = vcombine.low %v1596_v19, %v1603_v28 }
 0x4fc   :  { %v1750_v37 = vrot.slane %v1743_v20, %v7712_v54  ;;  %v1757_v4 = vrot.slane %v1742_v29, %v7712_v54 }
 0x4fd   :  { %v1450_v0 = vcombine.low %v1442_v2, %v1449_v8 }
 0x4fe   :  { %v1758_v52 = vcombine.low %v1750_v37, %v1757_v4 }
 0x552   :  { %v1337_v58 = vpop.permute.xlu1 %1336 }
 0x553   :  { %6927 = vmatpush3.xpose.msk.msra.mxu1 %vm1029_vm4, %v1337_v58 }
 0x554   :  { %6931 = vmatprep.subr.mxu1 %v7466_v21 }
 0x556   :  { %6929 = vmatmul.mubr.msk.f32.vlgmr.msra.gmra.mrb[4].mxu1 %vm1029_vm4, %v1296_v18 }
 0x557   :  { %v364_v5 = vpop.permute.xlu1 %363  ;;  %6933 = vmatprep.mubr.msk.f32.mxu1 %vm7468_vm3, %v7466_v21 }
 0x558   :  { %v580_v6 = vcombine.high %v364_v5, %v364_v5  ;;  %v587_v7 = vrot.slane %v364_v5, %v7712_v54 }
 0x559   :  { %v1491_v17 = vpop.permute.xlu0 %1490 }
 0x55a   :  { %v594_v15 = vrot.slane %v580_v6, %v7712_v54  ;;  %v595_v16 = vcombine.high %v587_v7, %v587_v7  ;;  %6932 = vmatpush3.xpose.msk.msra.mxu1 %vm1029_vm4, %v1491_v17  ;;  %v603_v23 = vrot.slane %v587_v7, %v7712_v54 }
 0x55b   :  { %6936 = vmatprep.subr.mxu1 %v7466_v21 }
 0x55c   :  { %v596_v22 = vcombine.high %v594_v15, %v594_v15  ;;  %v610_v24 = vrot.slane %v594_v15, %v7712_v54  ;;  %v617_v26 = vrot.slane %v595_v16, %v7712_v54  ;;  %v1645_v35 = vpop.permute.xlu1 %1644 }
 0x55d   :  { %v366_v36 = vpop.permute.xlu0 %365  ;;  %6934 = vmatmul.mubr.msk.f32.vlgmr.msra.gmra.mrb[6].mxu1 %vm1029_vm4, %v1450_v0 }
 0x55e   :  { %v624_v30 = vrot.slane %v596_v22, %v7712_v54  ;;  %v626_v32 = vcombine.high %v610_v24, %v610_v24  ;;  %v1874_v33 = vcombine.low %v603_v23, %v617_v26  ;;  %v6642_v34 = vcombine.high %v603_v23, %v617_v26  ;;  %6937 = vmatpush3.xpose.msk.msra.mxu1 %vm1029_vm4, %v1645_v35 }
 0x55f   :  { %v635_v25 = vrot.slane %v366_v36, %v7712_v54  ;;  %6938 = vmatprep.mubr.msk.f32.mxu1 %vm7468_vm3, %v7466_v21  ;;  %v1896_v42 = vrot.slane %v610_v24, %v7712_v54  ;;  %6941 = vmatprep.subr.mxu1 %v7466_v21 }
 0x560   :  { %v1882_v39 = vrot.slane %v1874_v33, %v7712_v54  ;;  %v1889_v41 = vrot.slane %v6642_v34, %v7712_v54  ;;  %v628_v43 = vcombine.high %v624_v30, %v624_v30  ;;  %v2028_v45 = vcombine.low %v624_v30, %v626_v32  ;;  %v1799_v44 = vpop.permute.xlu1 %1798 }
 0x561   :  { %v636_v46 = vcombine.high %v635_v25, %v635_v25  ;;  %v643_v47 = vrot.slane %v635_v25, %v7712_v54  ;;  %6939 = vmatmul.mubr.msk.f32.vlgmr.msra.gmra.mrb[8].mxu1 %vm1029_vm4, %v1604_v38  ;;  %v1911_v55 = vrot.slane %v1896_v42, %v7712_v54  ;;  %v1953_v56 = vpop.permute.xlu0 %1952 }
 0x562   :  { %v1897_v48 = vcombine.low %v1882_v39, %v1889_v41  ;;  %6942 = vmatpush3.xpose.msk.msra.mxu1 %vm1029_vm4, %v1799_v44  ;;  %6943 = vmatprep.mubr.msk.f32.mxu1 %vm7468_vm3, %v7466_v21  ;;  %v2036_v57 = vrot.slane %v2028_v45, %v7712_v54 }
 0x563   :  { %v650_v49 = vrot.slane %v636_v46, %v7712_v54  ;;  %v2029_v50 = vcombine.low %v628_v43, %v643_v47  ;;  %6946 = vmatprep.subr.mxu1 %v7466_v21 }
 0x564   :  { %v1904_v53 = vrot.slane %v1897_v48, %v7712_v54  ;;  %v2107_v3 = vpop.permute.xlu1 %2106 }
 0x565   :  { %v2043_v58 = vrot.slane %v2029_v50, %v7712_v54  ;;  %v2050_v59 = vrot.slane %v650_v49, %v7712_v54  ;;  %6944 = vmatmul.mubr.msk.f32.vlgmr.msra.gmra.mrb[10].mxu1 %vm1029_vm4, %v1758_v52 }
 0x566   :  { %v1912_v62 = vcombine.low %v1904_v53, %v1911_v55  ;;  %6947 = vmatpush3.xpose.msk.msra.mxu1 %vm1029_vm4, %v1953_v56  ;;  %6948 = vmatprep.mubr.msk.f32.mxu1 %vm7468_vm3, %v7466_v21 }
 0x567   :  { %v2051_v18 = vcombine.low %v2036_v57, %v2043_v58  ;;  %6951 = vmatprep.subr.mxu1 %v7466_v21  ;;  %v2065_v1 = vrot.slane %v2050_v59, %v7712_v54 }
 0x569   :  { %v2058_v2 = vrot.slane %v2051_v18, %v7712_v54  ;;  %6949 = vmatmul.mubr.msk.f32.vlgmr.msra.gmra.mrb[12].mxu1 %vm1029_vm4, %v1912_v62 }
 0x56a   :  { %6952 = vmatpush3.xpose.msk.msra.mxu1 %vm1029_vm4, %v2107_v3  ;;  %6953 = vmatprep.mubr.msk.f32.mxu1 %vm7468_vm3, %v7466_v21 }
 0x56b   :  { %v2066_v5 = vcombine.low %v2058_v2, %v2065_v1  ;;  %6956 = vmatprep.subr.mxu1 %v7466_v21 }
 0x56d   :  { %6954 = vmatmul.mubr.msk.f32.vlgmr.msra.gmra.mrb[14].mxu1 %vm1029_vm4, %v2066_v5 }
 0x56e   :  { %6958 = vmatprep.mubr.msk.f32.mxu1 %vm7468_vm3, %v7466_v21 }
 0x5b6   :  { %v1100_v6 = vpop.f32.mrb[0].mxu1 }
 0x5b7   :  { %v6920_v7 = vpop.f32.mrb[1].mxu1  ;;  %v2183_v8 = vsel %vm2182_vm5, %v1100_v6, -inf }
 0x5b8   :  { %2184 = vmax.xlane.f32.xlu0 %v2183_v8 }
 0x5ba   :  { %v1254_v10 = vpop.f32.mrb[2].mxu1 }
 0x5bb   :  { %v6925_v11 = vpop.f32.mrb[3].mxu1  ;;  %v2186_v14 = vsel %vm2182_vm5, %v1254_v10, -inf }
 0x5bc   :  { %2187 = vmax.xlane.f32.xlu1 %v2186_v14 }
 0x629   :  { %v1408_v15 = vpop.f32.mrb[4].mxu1 }
 0x62a   :  { %v6930_v16 = vpop.f32.mrb[5].mxu1  ;;  %v2189_v17 = vsel %vm2182_vm5, %v1408_v15, -inf }
 0x62b   :  { %2190 = vmax.xlane.f32.xlu0 %v2189_v17 }
 0x630   :  { %v1562_v0 = vpop.f32.mrb[6].mxu1 }
 0x631   :  { %v6935_v19 = vpop.f32.mrb[7].mxu1  ;;  %v2192_v20 = vsel %vm2182_vm5, %v1562_v0, -inf }
 0x632   :  { %2193 = vmax.xlane.f32.xlu0 %v2192_v20 }
 0x634   :  { %v1716_v22 = vpop.f32.mrb[8].mxu1 }
 0x635   :  { %v6940_v23 = vpop.f32.mrb[9].mxu1  ;;  %v2195_v24 = vsel %vm2182_vm5, %v1716_v22, -inf }
 0x636   :  { %2196 = vmax.xlane.f32.xlu0 %v2195_v24 }
 0x638   :  { %v1870_v26 = vpop.f32.mrb[10].mxu1 }
 0x639   :  { %v6945_v28 = vpop.f32.mrb[11].mxu1  ;;  %v2198_v29 = vsel %vm2182_vm5, %v1870_v26, -inf }
 0x63a   :  { %2199 = vmax.xlane.f32.xlu1 %v2198_v29 }
 0x63c   :  { %v2024_v30 = vpop.f32.mrb[12].mxu1 }
 0x63d   :  { %v6950_v32 = vpop.f32.mrb[13].mxu1  ;;  %v2201_v33 = vsel %vm2182_vm5, %v2024_v30, -inf }
 0x63e   :  { %2202 = vmax.xlane.f32.xlu0 %v2201_v33 }
 0x640   :  { %v2178_v34 = vpop.f32.mrb[14].mxu1 }
 0x641   :  { %v6955_v35 = vpop.f32.mrb[15].mxu1  ;;  %v2204_v36 = vsel %vm2182_vm5, %v2178_v34, -inf }
 0x642   :  { %2205 = vmax.xlane.f32.xlu1 %v2204_v36 }
 0x645   :  { %v2185_v37 = vpop.xlane.xlu0 %2184 }
 0x646   :  { %v2207_v25 = vsub.f32 %v1100_v6, %v2185_v37 }
 0x648   :  { %v2215_v38 = vmul.f32 1.442695, %v2207_v25 }
 0x64a   :  { %7369 = vpow2.f32 %v2215_v38 }
 0x653   :  { %2350 = vrot.lane.b32.xlu1 %v7753_v31, %s7469_s3  ;;  %v2188_v31 = vpop.xlane.xlu1 %2187 }
 0x654   :  { %2271 = vrot.lane.b32.xlu0 %v7747_v27, %s7469_s3  ;;  %v2208_v39 = vsub.f32 %v1254_v10, %v2188_v31  ;;  %v8003_v27 = vpop.eup %7369 }
 0x656   :  { %v2217_v41 = vmul.f32 1.442695, %v2208_v39 }
 0x657   :  { %2427 = vrot.lane.b32.xlu1 %v7836_v12, %s7469_s3  ;;  %v2231_v12 = vsel %vm2182_vm5, %v8003_v27, 0.0 }
 0x658   :  { %2581 = vrot.lane.b32.xlu0 %v7867_v51, %s7469_s3  ;;  %7371 = vpow2.f32 %v2217_v41 }
 0x65b   :  { %2504 = vrot.lane.b32.xlu1 %v7855_v40, %s7469_s3 }
 0x65f   :  { %2658 = vrot.lane.b32.xlu1 %v7878_v60, %s7469_s3 }
 0x662   :  { %v8007_v51 = vpop.eup %7371 }
 0x663   :  { %v2234_v40 = vsel %vm2182_vm5, %v8007_v51, 0.0 }
 0x677   :  { %2232 = vadd.xlane.f32.xlu0 %v2231_v12 }
 0x683   :  { %2235 = vadd.xlane.f32.xlu1 %v2234_v40 }
 0x6b8   :  { %v2191_v60 = vpop.xlane.xlu0 %2190 }
 0x6b9   :  { %v2209_v42 = vsub.f32 %v1408_v15, %v2191_v60 }
 0x6bb   :  { %v2219_v43 = vmul.f32 1.442695, %v2209_v42 }
 0x6bd   :  { %7373 = vpow2.f32 %v2219_v43 }
 0x6bf   :  { %v2194_v45 = vpop.xlane.xlu0 %2193 }
 0x6c0   :  { %v2210_v46 = vsub.f32 %v1562_v0, %v2194_v45 }
 0x6c2   :  { %v2221_v47 = vmul.f32 1.442695, %v2210_v46 }
 0x6c3   :  { %v2197_v4 = vpop.xlane.xlu0 %2196 }
 0x6c4   :  { %7375 = vpow2.f32 %v2221_v47  ;;  %v2211_v48 = vsub.f32 %v1716_v22, %v2197_v4 }
 0x6c6   :  { %v2223_v44 = vmul.f32 1.442695, %v2211_v48 }
 0x6c7   :  { %v8011_v49 = vpop.eup %7373  ;;  %v2200_v50 = vpop.xlane.xlu1 %2199 }
 0x6c8   :  { %7377 = vpow2.f32 %v2223_v44  ;;  %v2212_v52 = vsub.f32 %v1870_v26, %v2200_v50  ;;  %v2237_v53 = vsel %vm2182_vm5, %v8011_v49, 0.0 }
 0x6c9   :  { %2238 = vadd.xlane.f32.xlu0 %v2237_v53 }
 0x6ca   :  { %v2225_v55 = vmul.f32 1.442695, %v2212_v52 }
 0x6cb   :  { %v2203_v57 = vpop.xlane.xlu0 %2202 }
 0x6cc   :  { %7379 = vpow2.f32 %v2225_v55  ;;  %v2213_v58 = vsub.f32 %v2024_v30, %v2203_v57 }
 0x6ce   :  { %v8015_v59 = vpop.eup %7375  ;;  %v2227_v62 = vmul.f32 1.442695, %v2213_v58 }
 0x6cf   :  { %v2272_v56 = vpop.permute.xlu0 %2271  ;;  %v2240_v18 = vsel %vm2182_vm5, %v8015_v59, 0.0  ;;  %v2206_v2 = vpop.xlane.xlu1 %2205 }
 0x6d0   :  { %7381 = vpow2.f32 %v2227_v62  ;;  %2241 = vadd.xlane.f32.xlu1 %v2240_v18  ;;  %v2214_v1 = vsub.f32 %v2178_v34, %v2206_v2  ;;  %6957 = vmatpush3.msk.msra.mxu1 %vm2277_vm6, %v2272_v56  ;;  %v3001_v56 = vld [vmem:[%s8797_s9] sm:$0xff]  ;;  %v3002_v18 = vld [vmem:[%s8797_s9 + $0x8] sm:$0xff]  ;;  %v3003_v2 = vld [vmem:[%s8797_s9 + $0x10] sm:$0xff] }
 0x6d1   :  { %6961 = vmatprep.subr.mxu1 %v7466_v21 }
 0x6d2   :  { %v7378_v3 = vpop.eup %7377  ;;  %v2229_v5 = vmul.f32 1.442695, %v2214_v1  ;;  %v7245_v1 = vpack.c.bf16 %v3002_v18, %v3001_v56 }
 0x6d3   :  { %v2243_v6 = vsel %vm2182_vm5, %v7378_v3, 0.0  ;;  %v2351_v7 = vpop.permute.xlu1 %2350  ;;  %v2582_v19 = vpop.permute.xlu0 %2581 }
 0x6d4   :  { %7383 = vpow2.f32 %v2229_v5  ;;  %2244 = vadd.xlane.f32.xlu0 %v2243_v6 }
 0x6d6   :  { %v8022_v8 = vpop.eup %7379 }
 0x6d7   :  { %v2246_v10 = vsel %vm2182_vm5, %v8022_v8, 0.0  ;;  %v2428_v11 = vpop.permute.xlu1 %2427 }
 0x6d8   :  { %2247 = vadd.xlane.f32.xlu1 %v2246_v10 }
 0x6da   :  { %v8026_v14 = vpop.eup %7381 }
 0x6db   :  { %v2505_v15 = vpop.permute.xlu1 %2504  ;;  %v2249_v16 = vsel %vm2182_vm5, %v8026_v14, 0.0 }
 0x6dc   :  { %2250 = vadd.xlane.f32.xlu0 %v2249_v16  ;;  %6972 = vmatpush3.msk.msra.mxu0 %vm2277_vm6, %v2505_v15 }
 0x6dd   :  { %6981 = vmatprep.subr.mxu0 %v7466_v21 }
 0x6de   :  { %v8032_v17 = vpop.eup %7383 }
 0x6df   :  { %v2252_v0 = vsel %vm2182_vm5, %v8032_v17, 0.0  ;;  %v2659_v22 = vpop.permute.xlu1 %2658 }
 0x6e0   :  { %2253 = vadd.xlane.f32.xlu1 %v2252_v0 }
 0x6f1   :  { %2812 = vrot.lane.b32.xlu1 %v7888_v63, %s7469_s3 }
 0x6f2   :  { %2735 = vrot.lane.b32.xlu0 %v7880_v61, %s7469_s3 }
 0x704   :  { %v2233_v20 = vpop.xlane.xlu0 %2232 }
 0x705   :  { %7385 = vrcp.f32 %v2233_v20 }
 0x70f   :  { %v7386_v23 = vpop.eup %7385 }
 0x710   :  { %v2263_v24 = vmul.f32 %v7386_v23, %v8003_v27  ;;  %v2236_v26 = vpop.xlane.xlu1 %2235 }
 0x711   :  { %7387 = vrcp.f32 %v2236_v26 }
 0x712   :  { %6959 = vmatmul.mubr.msk.f32.vlgmr.msra.gmra.mrb[16].mxu1 %vm2273_vm7, %v2263_v24 }
 0x713   :  { %6962 = vmatpush3.msk.msra.mxu1 %vm2277_vm6, %v2351_v7  ;;  %6963 = vmatprep.mubr.msk.f32.mxu1 %vm7468_vm3, %v7466_v21 }
 0x714   :  { %6966 = vmatprep.subr.mxu1 %v7466_v21 }
 0x71b   :  { %v7388_v61 = vpop.eup %7387 }
 0x71c   :  { %v2264_v63 = vmul.f32 %v7388_v61, %v8007_v51 }
 0x71e   :  { %6964 = vmatmul.mubr.msk.f32.vlgmr.msra.gmra.mrb[18].mxu1 %vm2273_vm7, %v2264_v63 }
 0x71f   :  { %6967 = vmatpush3.msk.msra.mxu1 %vm2277_vm6, %v2428_v11  ;;  %6968 = vmatprep.mubr.msk.f32.mxu1 %vm7468_vm3, %v7466_v21 }
 0x720   :  { %6976 = vmatprep.subr.mxu1 %v7466_v21 }
 0x756   :  { %v2239_v28 = vpop.xlane.xlu0 %2238 }
 0x757   :  { %7389 = vrcp.f32 %v2239_v28 }
 0x75d   :  { %v2242_v29 = vpop.xlane.xlu1 %2241 }
 0x75e   :  { %7391 = vrcp.f32 %v2242_v29 }
 0x761   :  { %v7390_v30 = vpop.eup %7389  ;;  %v2245_v32 = vpop.xlane.xlu0 %2244 }
 0x762   :  { %v2265_v33 = vmul.f32 %v7390_v30, %v8011_v49  ;;  %7393 = vrcp.f32 %v2245_v32 }
 0x764   :  { %6969 = vmatmul.mubr.msk.f32.vlgmr.msra.gmra.mrb[20].mxu1 %vm2273_vm7, %v2265_v33 }
 0x765   :  { %v2248_v34 = vpop.xlane.xlu1 %2247  ;;  %6977 = vmatpush3.msk.msra.mxu1 %vm2277_vm6, %v2582_v19  ;;  %6978 = vmatprep.mubr.msk.f32.mxu1 %vm7468_vm3, %v7466_v21 }
 0x766   :  { %7395 = vrcp.f32 %v2248_v34  ;;  %6986 = vmatprep.subr.mxu1 %v7466_v21 }
 0x768   :  { %v7392_v35 = vpop.eup %7391 }
 0x769   :  { %v2266_v36 = vmul.f32 %v7392_v35, %v8015_v59  ;;  %v2251_v37 = vpop.xlane.xlu0 %2250 }
 0x76a   :  { %7397 = vrcp.f32 %v2251_v37 }
 0x76b   :  { %6974 = vmatmul.mubr.msk.f32.vlgmr.msra.gmra.mrb[6].mxu0 %vm2273_vm7, %v2266_v36 }
 0x76c   :  { %v7394_v25 = vpop.eup %7393  ;;  %6982 = vmatpush3.msk.msra.mxu0 %vm2277_vm6, %v2659_v22  ;;  %6983 = vmatprep.mubr.msk.f32.mxu0 %vm7468_vm3, %v7466_v21 }
 0x76d   :  { %v2267_v38 = vmul.f32 %v7394_v25, %v7378_v3  ;;  %v2736_v31 = vpop.permute.xlu0 %2735  ;;  %v2254_v39 = vpop.xlane.xlu1 %2253  ;;  %6991 = vmatprep.subr.mxu0 %v7466_v21  ;;  %v3004_v3 = vld [vmem:[%s8797_s9 + $0x18] sm:$0xff] }
 0x76e   :  { %7399 = vrcp.f32 %v2254_v39  ;;  %v7249_v5 = vpack.c.bf16 %v3004_v3, %v3003_v2 }
 0x76f   :  { %6979 = vmatmul.mubr.msk.f32.vlgmr.msra.gmra.mrb[22].mxu1 %vm2273_vm7, %v2267_v38 }
 0x770   :  { %v7396_v41 = vpop.eup %7395  ;;  %6987 = vmatpush3.msk.msra.mxu1 %vm2277_vm6, %v2736_v31  ;;  %6988 = vmatprep.mubr.msk.f32.mxu1 %vm7468_vm3, %v7466_v21 }
 0x771   :  { %v2268_v27 = vmul.f32 %v7396_v41, %v8022_v8  ;;  %v2813_v12 = vpop.permute.xlu1 %2812 }
 0x773   :  { %6984 = vmatmul.mubr.msk.f32.vlgmr.msra.gmra.mrb[8].mxu0 %vm2273_vm7, %v2268_v27 }
 0x774   :  { %v7398_v51 = vpop.eup %7397  ;;  %6992 = vmatpush3.msk.msra.mxu0 %vm2277_vm6, %v2813_v12  ;;  %6993 = vmatprep.mubr.msk.f32.mxu0 %vm7468_vm3, %v7466_v21 }
 0x775   :  { %v2269_v40 = vmul.f32 %v7398_v51, %v8026_v14  ;;  %7246 = vmatprep.subr.bf16.mxu0 %v7245_v1 }
 0x777   :  { %6989 = vmatmul.mubr.msk.f32.vlgmr.msra.gmra.mrb[24].mxu1 %vm2273_vm7, %v2269_v40 }
 0x778   :  { %v7400_v60 = vpop.eup %7399 }
 0x779   :  { %v2270_v42 = vmul.f32 %v7400_v60, %v8032_v17 }
 0x77b   :  { %6994 = vmatmul.mubr.msk.f32.vlgmr.msra.gmra.mrb[10].mxu0 %vm2273_vm7, %v2270_v42 }
 0x77c   :  { %7248 = vmatpush3.bf16.msra.mxu0 %v7245_v1 }
 0x77d   :  { %7250 = vmatprep.subr.bf16.mxu0 %v7249_v5 }
 0x780   :  { %7252 = vmatpush3.bf16.msra.mxu0 %v7249_v5 }
 0x7e5   :  { %v2346_v43 = vpop.f32.mrb[16].mxu1 }
 0x7e6   :  { %v6960_v45 = vpop.f32.mrb[17].mxu1 }
 0x7f1   :  { %v2423_v46 = vpop.f32.mrb[18].mxu1 }
 0x7f2   :  { %v6965_v47 = vpop.f32.mrb[19].mxu1 }
 0x837   :  { %v2500_v4 = vpop.f32.mrb[20].mxu1 }
 0x838   :  { %2891 = vrot.lane.b32.xlu0 %v2500_v4, %s7470_s4  ;;  %v6970_v48 = vpop.f32.mrb[21].mxu1 }
 0x83e   :  { %v2577_v44 = vpop.f32.mrb[6].mxu0 }
 0x83f   :  { %2893 = vrot.lane.b32.xlu1 %v2577_v44, %s7470_s4  ;;  %v6975_v49 = vpop.f32.mrb[7].mxu0  ;;  %v6664_v44 = vld [vmem:[%s8798_s10] ss:$0 sm:$0xff] }
 0x842   :  { %v2654_v50 = vpop.f32.mrb[22].mxu1 }
 0x843   :  { %2899 = vrot.lane.b32.xlu0 %v2654_v50, %s7471_s0  ;;  %v6980_v52 = vpop.f32.mrb[23].mxu1 }
 0x846   :  { %v2731_v53 = vpop.f32.mrb[8].mxu0 }
 0x847   :  { %2901 = vrot.lane.b32.xlu1 %v2731_v53, %s7471_s0  ;;  %v6985_v55 = vpop.f32.mrb[9].mxu0 }
 0x84a   :  { %v2808_v57 = vpop.f32.mrb[24].mxu1 }
 0x84b   :  { %2907 = vrot.lane.b32.xlu0 %v2808_v57, %s7472_s20  ;;  %v6990_v58 = vpop.f32.mrb[25].mxu1 }
 0x84e   :  { %v2885_v59 = vpop.f32.mrb[10].mxu0 }
 0x84f   :  { %2909 = vrot.lane.b32.xlu1 %v2885_v59, %s7472_s20  ;;  %v6995_v62 = vpop.f32.mrb[11].mxu0 }
 0x8aa   :  { %v2892_v6 = vpop.permute.xlu0 %2891 }
 0x8ab   :  { %v2913_v10 = vsel %vm1029_vm4, %v2346_v43, %v2892_v6 }
 0x8b1   :  { %v2894_v7 = vpop.permute.xlu1 %2893 }
 0x8b2   :  { %v2914_v19 = vsel %vm1029_vm4, %v2423_v46, %v2894_v7  ;;  %v3201_v7 = vld [vmem:[%s8799_s13] sm:$0xff] }
 0x8b5   :  { %v2900_v8 = vpop.permute.xlu0 %2899 }
 0x8b6   :  { %v2916_v11 = vsel %vm2915_vm8, %v2913_v10, %v2900_v8  ;;  %v3202_v8 = vld [vmem:[%s8799_s13 + $0x8] sm:$0xff]  ;;  %v3203_v10 = vld [vmem:[%s8799_s13 + $0x10] sm:$0xff] }
 0x8b9   :  { %v2902_v14 = vpop.permute.xlu1 %2901 }
 0x8ba   :  { %v2917_v20 = vsel %vm2915_vm8, %v2914_v19, %v2902_v14  ;;  %v3204_v14 = vld [vmem:[%s8799_s13 + $0x18] sm:$0xff] }
 0x8bd   :  { %v2908_v15 = vpop.permute.xlu0 %2907 }
 0x8be   :  { %v2919_v16 = vsel %vm2918_vm9, %v2916_v11, %v2908_v15  ;;  %v7253_v11 = vpack.c.bf16 %v3202_v8, %v3201_v7  ;;  %v7257_v15 = vpack.c.bf16 %v3204_v14, %v3203_v10 }
 0x8bf   :  { %v2923_v17 = vcombine.high %v2919_v16, %v2919_v16  ;;  %v2930_v0 = vrot.slane %v2919_v16, %v7712_v54 }
 0x8c0   :  { %7254 = vmatprep.subr.bf16.mxu0 %v7253_v11 }
 0x8c1   :  { %v2938_v22 = vcombine.high %v2930_v0, %v2930_v0  ;;  %v2910_v23 = vpop.permute.xlu1 %2909  ;;  %v2937_v24 = vrot.slane %v2923_v17, %v7712_v54  ;;  %v2945_v61 = vrot.slane %v2930_v0, %v7712_v54 }
 0x8c2   :  { %v2920_v26 = vsel %vm2918_vm9, %v2917_v20, %v2910_v23 }
 0x8c3   :  { %v2959_v63 = vrot.slane %v2938_v22, %v7712_v54  ;;  %v2962_v28 = vcombine.high %v2920_v26, %v2920_v26  ;;  %v2969_v29 = vrot.slane %v2920_v26, %v7712_v54  ;;  %v2952_v35 = vrot.slane %v2937_v24, %v7712_v54  ;;  %v6668_v24 = vld [vmem:[%s8800_s11] ss:$0 sm:$0xff] }
 0x8c5   :  { %v3012_v30 = vcombine.low %v2945_v61, %v2959_v63  ;;  %v6665_v32 = vcombine.high %v2945_v61, %v2959_v63  ;;  %v2976_v33 = vrot.slane %v2962_v28, %v7712_v54  ;;  %v2977_v34 = vcombine.high %v2969_v29, %v2969_v29  ;;  %v6669_v61 = vld [vmem:[%s8801_s12] ss:$0 sm:$0xff] }
 0x8c6   :  { %v2984_v36 = vrot.slane %v2969_v29, %v7712_v54 }
 0x8c7   :  { %v2998_v37 = vrot.slane %v2977_v34, %v7712_v54  ;;  %v3022_v25 = vrot.slane %v3012_v30, %v7712_v54  ;;  %v3029_v38 = vrot.slane %v6665_v32, %v7712_v54  ;;  %v2991_v41 = vrot.slane %v2976_v33, %v7712_v54  ;;  %v3309_v34 = vld [vmem:[%s8802_s15] sm:$0xff] }
 0x8c8   :  { %v2999_v31 = vcombine.high %v2984_v36, %v2984_v36  ;;  %v3014_v39 = vcombine.low %v2952_v35, %v2984_v36  ;;  %v3310_v35 = vld [vmem:[%s8802_s15 + $0x8] sm:$0xff] }
 0x8c9   :  { %v3000_v27 = vcombine.high %v2998_v37, %v2998_v37  ;;  %v3044_v40 = vcombine.low %v3022_v25, %v3029_v38  ;;  %v7261_v36 = vpack.c.bf16 %v3310_v35, %v3309_v34  ;;  %v3312_v25 = vld [vmem:[%s8802_s15 + $0x18] sm:$0xff]  ;;  %v6682_v34 = vld [vmem:[%s8793_s7 + $0x30] sm:$0xff] }
 0x8ca   :  { %v3015_v12 = vcombine.low %v2998_v37, %v2999_v31  ;;  %v3036_v60 = vrot.slane %v3014_v39, %v7712_v54  ;;  %v3311_v37 = vld [vmem:[%s8802_s15 + $0x10] sm:$0xff]  ;;  %v3313_v31 = vld [vmem:[%s8802_s15 + $0x20] sm:$0xff]  ;;  %v3314_v39 = vld [vmem:[%s8802_s15 + $0x28] sm:$0xff] }
 0x8cb   :  { %v3061_v51 = vcombine.low %v3000_v27, %v2991_v41  ;;  %v3052_v46 = vrot.slane %v3044_v40, %v7712_v54  ;;  %7262 = vmatprep.subr.bf16.mxu1 %v7261_v36  ;;  %v7265_v38 = vpack.c.bf16 %v3312_v25, %v3311_v37  ;;  %v7269_v41 = vpack.c.bf16 %v3314_v39, %v3313_v31  ;;  %v3315_v27 = vld [vmem:[%s8802_s15 + $0x30] sm:$0xff]  ;;  %v3317_v40 = vld [vmem:[%s8802_s15 + $0x40] sm:$0xff] }
 0x8cc   :  { %v3043_v42 = vrot.slane %v3015_v12, %v7712_v54  ;;  %7264 = vmatpush3.bf16.msra.mxu1 %v7261_v36  ;;  %v3316_v12 = vld [vmem:[%s8802_s15 + $0x38] sm:$0xff] }
 0x8cd   :  { %v3068_v45 = vrot.slane %v3061_v51, %v7712_v54  ;;  %7266 = vmatprep.subr.bf16.mxu1 %v7265_v38  ;;  %v7273_v51 = vpack.c.bf16 %v3316_v12, %v3315_v27  ;;  %v6683_v36 = vld [vmem:[%s8793_s7 + $0x38] sm:$0xff] }
 0x8ce   :  { %v3045_v43 = vcombine.low %v3036_v60, %v3043_v42  ;;  %v3318_v60 = vld [vmem:[%s8802_s15 + $0x48] sm:$0xff]  ;;  %v7297_v37 = vpack.c.bf16 %v6683_v36, %v6682_v34 }
 0x8cf   :  { %v3075_v48 = vrot.slane %v3068_v45, %v7712_v54  ;;  %v7277_v42 = vpack.c.bf16 %v3318_v60, %v3317_v40  ;;  %v3320_v45 = vld [vmem:[%s8802_s15 + $0x58] sm:$0xff] }
 0x8d0   :  { %v3059_v47 = vrot.slane %v3045_v43, %v7712_v54  ;;  %7268 = vmatpush3.bf16.msra.mxu1 %v7265_v38  ;;  %v3319_v43 = vld [vmem:[%s8802_s15 + $0x50] sm:$0xff] }
 0x8d1   :  { %7270 = vmatprep.subr.bf16.mxu1 %v7269_v41 }
 0x8d2   :  { %v3060_v4 = vcombine.low %v3052_v46, %v3059_v47  ;;  %v7281_v46 = vpack.c.bf16 %v3320_v45, %v3319_v43  ;;  %v3321_v47 = vld [vmem:[%s8802_s15 + $0x60] sm:$0xff] }
 0x8d3   :  { %v6679_v43 = vld [vmem:[%s8795_s6 + $0x1] ss:$0 sm:$0xff] }
 0x8d4   :  { %7004 = vmatprep.mubr.msk.f32.mxu0 %vm170_vm1, %v3060_v4  ;;  %7272 = vmatpush3.bf16.msra.mxu1 %v7269_v41  ;;  %v3322_v4 = vld [vmem:[%s8802_s15 + $0x68] sm:$0xff] }
 0x8d5   :  { %7005 = vmatmul.mubr.msk.f32.vlgmr.msra.gmra.mrb[12].mxu0 %vm170_vm1, %v3075_v48  ;;  %7274 = vmatprep.subr.bf16.mxu1 %v7273_v51  ;;  %v3323_v48 = vld [vmem:[%s8802_s15 + $0x70] sm:$0xff] }
 0x8d6   :  { %7256 = vmatpush3.bf16.msra.mxu0 %v7253_v11  ;;  %v6675_v11 = vld [vmem:[%s8804_s16] ss:$0 sm:$0xff] }
 0x8d7   :  { %7258 = vmatprep.subr.bf16.mxu0 %v7257_v15 }
 0x8d8   :  { %7276 = vmatpush3.bf16.msra.mxu1 %v7273_v51  ;;  %v6678_v51 = vld [vmem:[%s8794_s5 + $0x1] ss:$0 sm:$0xff] }
 0x8d9   :  { %7278 = vmatprep.subr.bf16.mxu1 %v7277_v42 }
 0x8da   :  { %7260 = vmatpush3.bf16.msra.mxu0 %v7257_v15 }
 0x8dc   :  { %7280 = vmatpush3.bf16.msra.mxu1 %v7277_v42 }
 0x8dd   :  { %7282 = vmatprep.subr.bf16.mxu1 %v7281_v46 }
 0x8e0   :  { %7284 = vmatpush3.bf16.msra.mxu1 %v7281_v46 }
 0x9a8   :  { %v7006_v49 = vpop.f32.mrb[12].mxu0 }
 0x9a9   :  { %v3152_v50 = vadd.f32 %v7006_v49, %v6664_v44  ;;  %v3146_v52 = vpop.f32.mrb[13].mxu0  ;;  %v3324_v49 = vld [vmem:[%s8802_s15 + $0x78] sm:$0xff] }
 0x9aa   :  { %v3147_v53 = vadd.f32 %v6664_v44, %v3146_v52  ;;  %v7285_v44 = vpack.c.bf16 %v3322_v4, %v3321_v47  ;;  %v6670_v52 = vld [vmem:[%s8803_s14] ss:$0 sm:$0xff] }
 0x9ab   :  { %v8125_v55 = vadd.f32 %v3152_v50, %v7681_v13  ;;  %v7289_v50 = vpack.c.bf16 %v3324_v49, %v3323_v48  ;;  %v6685_v48 = vld [vmem:[%s8796_s8 + $0x1] ss:$0 sm:$0xff] }
 0x9ac   :  { %v8128_v57 = vadd.f32 %v3147_v53, %v7677_v9  ;;  %7286 = vmatprep.subr.bf16.mxu1 %v7285_v44 }
 0x9ad   :  { %v3162_v58 = vsel %vm174_vm2, %v8125_v55, 0.0  ;;  %7288 = vmatpush3.bf16.msra.mxu1 %v7285_v44 }
 0x9ae   :  { %3163 = vadd.xlane.f32.xlu1 %v3162_v58  ;;  %v3159_v59 = vsel %vm170_vm1, %v8128_v57, 0.0  ;;  %7290 = vmatprep.subr.bf16.mxu1 %v7289_v50 }
 0x9af   :  { %3160 = vadd.xlane.f32.xlu0 %v3159_v59 }
 0x9b1   :  { %7292 = vmatpush3.bf16.msra.mxu1 %v7289_v50 }
 0x9b2   :  { %7094 = vmatprep.subr.mxu1 %v7466_v21 }
 0xa3b   :  { %v3164_v62 = vpop.xlane.xlu1 %3163 }
 0xa3c   :  { %v3166_v56 = vmul.f32 0.03125, %v3164_v62  ;;  %v3161_v18 = vpop.xlane.xlu0 %3160 }
 0xa3d   :  { %v3165_v2 = vmul.f32 0.03125, %v3161_v18 }
 0xa3e   :  { %v3168_v1 = vsub.f32 %v8125_v55, %v3166_v56 }
 0xa3f   :  { %v3167_v13 = vsub.f32 %v8128_v57, %v3165_v2 }
 0xa40   :  { %v3170_v5 = vmul.f32 %v3168_v1, %v3168_v1 }
 0xa41   :  { %v3169_v3 = vmul.f32 %v3167_v13, %v3167_v13 }
 0xa42   :  { %v3174_v6 = vsel %vm174_vm2, %v3170_v5, 0.0 }
 0xa43   :  { %v3171_v9 = vsel %vm170_vm1, %v3169_v3, 0.0 }
 0xa44   :  { %3172 = vadd.xlane.f32.xlu0 %v3171_v9 }
 0xa48   :  { %3175 = vadd.xlane.f32.xlu0 %v3174_v6 }
 0xad1   :  { %v3173_v16 = vpop.xlane.xlu0 %3172 }
 0xad2   :  { %v3177_v17 = vmul.f32 0.03125, %v3173_v16 }
 0xad4   :  { %v3179_v0 = vadd.f32 1e-05, %v3177_v17 }
 0xad5   :  { %v3176_v19 = vpop.xlane.xlu0 %3175 }
 0xad6   :  { %7401 = vrsqrt.f32 %v3179_v0  ;;  %v3178_v20 = vmul.f32 0.03125, %v3176_v19 }
 0xad8   :  { %v3180_v22 = vadd.f32 1e-05, %v3178_v20 }
 0xada   :  { %7403 = vrsqrt.f32 %v3180_v22 }
 0xae0   :  { %v7402_v23 = vpop.eup %7401 }
 0xae1   :  { %v3183_v26 = vmul.f32 %v7402_v23, %v3167_v13 }
 0xae3   :  { %v3191_v63 = vmul.f32 %v6668_v24, %v3183_v26 }
 0xae4   :  { %v7404_v28 = vpop.eup %7403 }
 0xae5   :  { %v3184_v29 = vmul.f32 %v7404_v28, %v3168_v1  ;;  %v3199_v30 = vadd.f32 %v6669_v61, %v3191_v63 }
 0xae7   :  { %v3192_v32 = vmul.f32 %v6668_v24, %v3184_v29  ;;  %7015 = vmatprep.mubr.msk.f32.mxu0 %vm170_vm1, %v3199_v30 }
 0xae9   :  { %v3200_v33 = vadd.f32 %v6669_v61, %v3192_v32  ;;  %v6680_v32 = vld [vmem:[%s8793_s7 + $0x20] sm:$0xff] }
 0xaeb   :  { %7016 = vmatmul.mubr.msk.f32.vlgmr.msra.gmra.mrb[14].mxu0 %vm170_vm1, %v3200_v33  ;;  %v6681_v33 = vld [vmem:[%s8793_s7 + $0x28] sm:$0xff] }
 0xaec   :  { %v7293_v35 = vpack.c.bf16 %v6681_v33, %v6680_v32 }
 0xaee   :  { %7294 = vmatprep.subr.bf16.mxu0 %v7293_v35 }
 0xaef   :  { %7296 = vmatpush3.bf16.msra.mxu0 %v7293_v35 }
 0xaf0   :  { %7298 = vmatprep.subr.bf16.mxu0 %v7297_v37 }
 0xaf3   :  { %7300 = vmatpush3.bf16.msra.mxu0 %v7297_v37 }
 0xaf4   :  { %7064 = vmatprep.subr.mxu0 %v7466_v21 }
 0xbbe   :  { %v7017_v53 = vpop.f32.mrb[14].mxu0 }
 0xbbf   :  { %v3290_v58 = vadd.f32 %v7017_v53, %v6670_v52  ;;  %v3284_v59 = vpop.f32.mrb[15].mxu0 }
 0xbc0   :  { %v3285_v62 = vadd.f32 %v6670_v52, %v3284_v59 }
 0xbc1   :  { %v6674_v56 = vmul.f32 -1.702, %v3290_v58 }
 0xbc2   :  { %v6673_v18 = vmul.f32 -1.702, %v3285_v62 }
 0xbc3   :  { %v3299_v2 = vmul.f32 1.442695, %v6674_v56 }
 0xbc4   :  { %v3297_v1 = vmul.f32 1.442695, %v6673_v18 }
 0xbc5   :  { %7405 = vpow2.f32 %v3299_v2 }
 0xbc6   :  { %7407 = vpow2.f32 %v3297_v1 }
 0xbcf   :  { %v7406_v13 = vpop.eup %7405 }
 0xbd0   :  { %v7408_v3 = vpop.eup %7407  ;;  %v3302_v9 = vadd.f32 1.0, %v7406_v13 }
 0xbd1   :  { %v3301_v5 = vadd.f32 1.0, %v7408_v3 }
 0xbd2   :  { %7409 = vrcp.f32 %v3302_v9 }
 0xbd3   :  { %7411 = vrcp.f32 %v3301_v5 }
 0xbdc   :  { %v7410_v6 = vpop.eup %7409 }
 0xbdd   :  { %v7412_v7 = vpop.eup %7411  ;;  %v3308_v10 = vmul.f32 %v7410_v6, %v3290_v58 }
 0xbde   :  { %v3307_v8 = vmul.f32 %v7412_v7, %v3285_v62 }
 0xbe0   :  { %7050 = vmatprep.mubr.f32.mxu1 %v3307_v8 }
 0xbe1   :  { %7051 = vmatmul.mubr.f32.vlgmr.msra.gmra.mrb[26].mxu1 %v3308_v10 }
 0xbe2   :  { %7096 = vmatprep.mubr.msk.f32.mxu1 %vm7468_vm3, %v7466_v21 }
 0xcb4   :  { %v7052_v14 = vpop.f32.mrb[26].mxu1 }
 0xcb5   :  { %v3404_v15 = vadd.f32 %v7052_v14, %v6675_v11  ;;  %v3398_v16 = vpop.f32.mrb[27].mxu1 }
 0xcb6   :  { %v3399_v17 = vadd.f32 %v6675_v11, %v3398_v16 }
 0xcb7   :  { %v8216_v0 = vadd.f32 %v3404_v15, %v8125_v55 }
 0xcb8   :  { %v8219_v19 = vadd.f32 %v3399_v17, %v8128_v57 }
 0xcb9   :  { %v3416_v20 = vsel %vm174_vm2, %v8216_v0, 0.0 }
 0xcba   :  { %3417 = vadd.xlane.f32.xlu1 %v3416_v20  ;;  %v3413_v22 = vsel %vm170_vm1, %v8219_v19, 0.0 }
 0xcbb   :  { %3414 = vadd.xlane.f32.xlu0 %v3413_v22 }
 0xd47   :  { %v3418_v23 = vpop.xlane.xlu1 %3417 }
 0xd48   :  { %v3420_v24 = vmul.f32 0.03125, %v3418_v23  ;;  %v3415_v26 = vpop.xlane.xlu0 %3414 }
 0xd49   :  { %v3419_v61 = vmul.f32 0.03125, %v3415_v26 }
 0xd4a   :  { %v3422_v63 = vsub.f32 %v8216_v0, %v3420_v24 }
 0xd4b   :  { %v3421_v55 = vsub.f32 %v8219_v19, %v3419_v61 }
 0xd4c   :  { %v3424_v28 = vmul.f32 %v3422_v63, %v3422_v63 }
 0xd4d   :  { %v3423_v29 = vmul.f32 %v3421_v55, %v3421_v55 }
 0xd4e   :  { %v3428_v57 = vsel %vm174_vm2, %v3424_v28, 0.0 }
 0xd4f   :  { %3429 = vadd.xlane.f32.xlu1 %v3428_v57  ;;  %v3425_v30 = vsel %vm170_vm1, %v3423_v29, 0.0 }
 0xd50   :  { %3426 = vadd.xlane.f32.xlu0 %v3425_v30 }
 0xddc   :  { %v3430_v25 = vpop.xlane.xlu1 %3429 }
 0xddd   :  { %v3432_v38 = vmul.f32 0.03125, %v3430_v25  ;;  %v3427_v31 = vpop.xlane.xlu0 %3426 }
 0xdde   :  { %v3431_v39 = vmul.f32 0.03125, %v3427_v31 }
 0xddf   :  { %v3434_v41 = vadd.f32 1e-05, %v3432_v38 }
 0xde0   :  { %v3433_v27 = vadd.f32 1e-05, %v3431_v39 }
 0xde1   :  { %7413 = vrsqrt.f32 %v3434_v41 }
 0xde2   :  { %7415 = vrsqrt.f32 %v3433_v27 }
 0xdeb   :  { %v7414_v12 = vpop.eup %7413 }
 0xdec   :  { %v7416_v40 = vpop.eup %7415  ;;  %v3438_v60 = vmul.f32 %v7414_v12, %v3422_v63 }
 0xded   :  { %v3437_v42 = vmul.f32 %v7416_v40, %v3421_v55 }
 0xdee   :  { %v3446_v45 = vmul.f32 %v6678_v51, %v3438_v60 }
 0xdef   :  { %v3445_v46 = vmul.f32 %v6678_v51, %v3437_v42 }
 0xdf0   :  { %v3454_v4 = vadd.f32 %v6679_v43, %v3446_v45 }
 0xdf1   :  { %v3453_v47 = vadd.f32 %v6679_v43, %v3445_v46 }
 0xdf3   :  { %7061 = vmatprep.mubr.msk.f32.mxu0 %vm170_vm1, %v3453_v47 }
 0xdf4   :  { %7062 = vmatmul.mubr.msk.f32.vlgmr.msra.gmra.mrb[16].mxu0 %vm170_vm1, %v3454_v4 }
 0xdf5   :  { %7066 = vmatprep.mubr.msk.f32.mxu0 %vm7468_vm3, %v7466_v21 }
 0xec7   :  { %v7063_v44 = vpop.f32.mrb[16].mxu0 }
 0xec8   :  { %v3546_v49 = vadd.f32 %v7063_v44, %v6685_v48  ;;  %v3540_v50 = vpop.f32.mrb[17].mxu0 }
 0xec9   :  { %v3541_v52 = vadd.f32 %v6685_v48, %v3540_v50 }
 0xeca   :  { %3853 = vrot.lane.b32.xlu1 %v3546_v49, %s7463_s2  ;;  %v8256_v53 = vmul.f32 0.35355338, %v3546_v49  ;;  %v3918_v56 = vrot.slane %v3546_v49, %v7712_v54 }
 0xecb   :  { %3851 = vrot.lane.b32.xlu0 %v3541_v52, %s7463_s2  ;;  %v8259_v58 = vmul.f32 0.35355338, %v3541_v52  ;;  %v3863_v59 = vcombine.high %v3541_v52, %v3541_v52  ;;  %v3870_v62 = vrot.slane %v3541_v52, %v7712_v54 }
 0xecc   :  { %v3620_v2 = vrot.slane %v8256_v53, %v7712_v54  ;;  %v3919_v8 = vcombine.high %v3918_v56, %v3918_v56  ;;  %v3926_v20 = vrot.slane %v3918_v56, %v7712_v54 }
 0xecd   :  { %v3565_v18 = vcombine.high %v8259_v58, %v8259_v58  ;;  %v3877_v1 = vrot.slane %v3863_v59, %v7712_v54  ;;  %v3878_v13 = vcombine.high %v3870_v62, %v3870_v62  ;;  %v3886_v3 = vrot.slane %v3870_v62, %v7712_v54 }
 0xece   :  { %3855 = vrot.lane.b32.xlu1 %v3541_v52, %s7464_s29  ;;  %v3621_v10 = vcombine.high %v3620_v2, %v3620_v2  ;;  %v3933_v55 = vrot.slane %v3919_v8, %v7712_v54  ;;  %v3628_v57 = vrot.slane %v3620_v2, %v7712_v54  ;;  %v3572_v48 = vrot.slane %v8259_v58, %v7712_v54 }
 0xecf   :  { %3857 = vrot.lane.b32.xlu0 %v3546_v49, %s7464_s29  ;;  %v3579_v9 = vrot.slane %v3565_v18, %v7712_v54  ;;  %v3893_v5 = vrot.slane %v3877_v1, %v7712_v54  ;;  %v3900_v6 = vrot.slane %v3878_v13, %v7712_v54  ;;  %v3879_v7 = vcombine.high %v3877_v1, %v3877_v1 }
 0xed0   :  { %v3635_v33 = vrot.slane %v3621_v10, %v7712_v54  ;;  %v4362_v39 = vrot.slane %v3933_v55, %v7712_v54  ;;  %v3580_v44 = vcombine.high %v3572_v48, %v3572_v48  ;;  %v3588_v50 = vrot.slane %v3572_v48, %v7712_v54 }
 0xed1   :  { %v3581_v11 = vcombine.high %v3579_v9, %v3579_v9  ;;  %v4186_v14 = vcombine.low %v3886_v3, %v3900_v6  ;;  %v6689_v15 = vcombine.high %v3886_v3, %v3900_v6  ;;  %v3909_v16 = vcombine.high %v3893_v5, %v3893_v5 }
 0xed2   :  { %3859 = vrot.lane.b32.xlu1 %v3541_v52, %s7465_s18  ;;  %v3907_v17 = vrot.slane %v3879_v7, %v7712_v54  ;;  %v8278_v22 = vrot.slane %v3579_v9, %v7712_v54  ;;  %v4208_v61 = vrot.slane %v3893_v5, %v7712_v54  ;;  %v4323_v51 = vrot.slane %v3635_v33, %v7712_v54 }
 0xed3   :  { %3553 = vrot.lane.b32.xlu0 %v8259_v58, %s7463_s2  ;;  %v3609_v23 = vrot.slane %v3581_v11, %v7712_v54  ;;  %v4194_v24 = vrot.slane %v4186_v14, %v7712_v54  ;;  %v4201_v26 = vrot.slane %v6689_v15, %v7712_v54  ;;  %v4377_v43 = vrot.slane %v4362_v39, %v7712_v54 }
 0xed4   :  { %v3911_v63 = vcombine.high %v3907_v17, %v3907_v17  ;;  %v4340_v28 = vcombine.low %v3907_v17, %v3909_v16  ;;  %v3611_v29 = vcombine.high %v8278_v22, %v8278_v22  ;;  %v4223_v37 = vrot.slane %v4208_v61, %v7712_v54 }
 0xed5   :  { %v3613_v30 = vcombine.high %v3609_v23, %v3609_v23  ;;  %v4209_v32 = vcombine.low %v4194_v24, %v4201_v26  ;;  %v4338_v46 = vrot.slane %v4323_v51, %v7712_v54  ;;  %v4169_v11 = vrot.slane %v8278_v22, %v7712_v54 }
 0xed6   :  { %3861 = vrot.lane.b32.xlu1 %v3546_v49, %s7465_s18  ;;  %v4341_v34 = vcombine.low %v3911_v63, %v3926_v20  ;;  %v4301_v25 = vcombine.low %v3609_v23, %v3611_v29  ;;  %v4348_v38 = vrot.slane %v4340_v28, %v7712_v54  ;;  %v3602_v49 = vrot.slane %v3580_v44, %v7712_v54 }
 0xed7   :  { %3555 = vrot.lane.b32.xlu0 %v8256_v53, %s7463_s2  ;;  %v4302_v35 = vcombine.low %v3613_v30, %v3628_v57  ;;  %v4216_v36 = vrot.slane %v4209_v32, %v7712_v54  ;;  %v4184_v63 = vrot.slane %v4169_v11, %v7712_v54 }
 0xed8   :  { %v4355_v31 = vrot.slane %v4341_v34, %v7712_v54  ;;  %v4309_v27 = vrot.slane %v4301_v25, %v7712_v54  ;;  %v4147_v52 = vcombine.low %v3588_v50, %v3602_v49  ;;  %v6688_v59 = vcombine.high %v3588_v50, %v3602_v49 }
 0xed9   :  { %v8299_v41 = vcombine.low %v4216_v36, %v4223_v37  ;;  %v4316_v12 = vrot.slane %v4302_v35, %v7712_v54 }
 0xeda   :  { %v4363_v40 = vcombine.low %v4348_v38, %v4355_v31  ;;  %v4155_v18 = vrot.slane %v4147_v52, %v7712_v54  ;;  %v4162_v2 = vrot.slane %v6688_v59, %v7712_v54 }
 0xedb   :  { %4225 = vrot.lane.b32.xlu1 %v8299_v41, %s7467_s19  ;;  %v4324_v60 = vcombine.low %v4309_v27, %v4316_v12 }
 0xedc   :  { %v4370_v42 = vrot.slane %v4363_v40, %v7712_v54  ;;  %v4170_v6 = vcombine.low %v4155_v18, %v4162_v2 }
 0xedd   :  { %v4331_v45 = vrot.slane %v4324_v60, %v7712_v54 }
 0xede   :  { %v8310_v47 = vcombine.low %v4370_v42, %v4377_v43  ;;  %v4177_v20 = vrot.slane %v4170_v6, %v7712_v54 }
 0xedf   :  { %3557 = vrot.lane.b32.xlu1 %v8259_v58, %s7464_s29  ;;  %v8314_v4 = vcombine.low %v4331_v45, %v4338_v46 }
 0xee0   :  { %4379 = vrot.lane.b32.xlu0 %v8310_v47, %s7467_s19  ;;  %v4185_v32 = vcombine.low %v4177_v20, %v4184_v63 }
 0xee3   :  { %3561 = vrot.lane.b32.xlu1 %v8259_v58, %s7465_s18 }
 0xee7   :  { %3559 = vrot.lane.b32.xlu1 %v8256_v53, %s7464_s29 }
 0xeeb   :  { %3563 = vrot.lane.b32.xlu1 %v8256_v53, %s7465_s18 }
 0xf3c   :  { %v3854_v62 = vpop.permute.xlu1 %3853 }
 0xf3d   :  { %v3852_v56 = vpop.permute.xlu0 %3851  ;;  %v8331_v53 = vrot.slane %v3854_v62, %v7712_v54 }
 0xf3e   :  { %v3934_v1 = vcombine.high %v3852_v56, %v3852_v56  ;;  %v3941_v9 = vrot.slane %v3852_v56, %v7712_v54 }
 0xf3f   :  { %v3990_v10 = vcombine.high %v8331_v53, %v8331_v53  ;;  %v3997_v57 = vrot.slane %v8331_v53, %v7712_v54 }
 0xf40   :  { %v3856_v13 = vpop.permute.xlu1 %3855  ;;  %v3948_v7 = vrot.slane %v3934_v1, %v7712_v54  ;;  %v3949_v14 = vcombine.high %v3941_v9, %v3941_v9  ;;  %v3957_v33 = vrot.slane %v3941_v9, %v7712_v54 }
 0xf41   :  { %v4005_v3 = vcombine.high %v3856_v13, %v3856_v13  ;;  %v3858_v58 = vpop.permute.xlu0 %3857  ;;  %v4012_v15 = vrot.slane %v3856_v13, %v7712_v54  ;;  %v8345_v26 = vrot.slane %v3990_v10, %v7712_v54 }
 0xf42   :  { %v3950_v23 = vcombine.high %v3948_v7, %v3948_v7  ;;  %v8348_v61 = vrot.slane %v3948_v7, %v7712_v54  ;;  %v3971_v22 = vrot.slane %v3949_v14, %v7712_v54  ;;  %v4060_v35 = vrot.slane %v3858_v58, %v7712_v54 }
 0xf43   :  { %v4019_v5 = vrot.slane %v4005_v3, %v7712_v54  ;;  %v4020_v55 = vcombine.high %v4012_v15, %v4012_v15  ;;  %v4670_v37 = vrot.slane %v8345_v26, %v7712_v54  ;;  %v8364_v25 = vrot.slane %v4012_v15, %v7712_v54 }
 0xf44   :  { %v3860_v8 = vpop.permute.xlu1 %3859  ;;  %v3978_v34 = vrot.slane %v3950_v23, %v7712_v54  ;;  %v3980_v12 = vcombine.high %v8348_v61, %v8348_v61  ;;  %v4494_v51 = vcombine.low %v3957_v33, %v3971_v22  ;;  %v6695_v40 = vcombine.high %v3957_v33, %v3971_v22 }
 0xf45   :  { %v4021_v16 = vcombine.high %v4019_v5, %v4019_v5  ;;  %v8341_v17 = vpop.permute.xlu0 %3553  ;;  %v4076_v28 = vcombine.high %v3860_v8, %v3860_v8  ;;  %v8367_v38 = vrot.slane %v4019_v5, %v7712_v54  ;;  %v4042_v60 = vrot.slane %v4020_v55, %v7712_v54 }
 0xf46   :  { %v3636_v29 = vcombine.high %v8341_v17, %v8341_v17  ;;  %v4083_v43 = vrot.slane %v3860_v8, %v7712_v54  ;;  %v3982_v48 = vcombine.high %v3978_v34, %v3978_v34  ;;  %v4516_v44 = vrot.slane %v8348_v61, %v7712_v54 }
 0xf47   :  { %v4049_v30 = vrot.slane %v4021_v16, %v7712_v54  ;;  %v4090_v36 = vrot.slane %v4076_v28, %v7712_v54  ;;  %v4051_v52 = vcombine.high %v8367_v38, %v8367_v38  ;;  %v4068_v59 = vrot.slane %v4060_v35, %v7712_v54 }
 0xf48   :  { %v3862_v24 = vpop.permute.xlu1 %3861  ;;  %v3650_v31 = vrot.slane %v3636_v29, %v7712_v54  ;;  %v4502_v18 = vrot.slane %v4494_v51, %v7712_v54  ;;  %v4509_v2 = vrot.slane %v6695_v40, %v7712_v54  ;;  %v4648_v1 = vcombine.low %v3978_v34, %v3980_v12 }
 0xf49   :  { %v3556_v39 = vpop.permute.xlu0 %3555  ;;  %v4053_v42 = vcombine.high %v4049_v30, %v4049_v30  ;;  %v4092_v49 = vcombine.high %v4090_v36, %v4090_v36  ;;  %v4061_v13 = vcombine.high %v4060_v35, %v4060_v35  ;;  %v4802_v3 = vcombine.low %v8364_v25, %v4042_v60 }
 0xf4a   :  { %v3652_v45 = vcombine.high %v3650_v31, %v3650_v31  ;;  %v8376_v46 = vrot.slane %v3650_v31, %v7712_v54  ;;  %v3691_v50 = vrot.slane %v3556_v39, %v7712_v54  ;;  %v6701_v58 = vcombine.high %v8364_v25, %v4042_v60 }
 0xf4b   :  { %v4957_v9 = vcombine.low %v4053_v42, %v4068_v59  ;;  %v4091_v5 = vcombine.high %v4083_v43, %v4083_v43  ;;  %v8397_v6 = vrot.slane %v4090_v36, %v7712_v54  ;;  %v4120_v7 = vrot.slane %v4092_v49, %v7712_v54 }
 0xf4c   :  { %v3680_v62 = vrot.slane %v3652_v45, %v7712_v54  ;;  %v3682_v56 = vcombine.high %v8376_v46, %v8376_v46  ;;  %v3692_v10 = vcombine.high %v3691_v50, %v3691_v50  ;;  %v4649_v11 = vcombine.low %v3982_v48, %v3997_v57 }
 0xf4d   :  { %v4226_v27 = vpop.permute.xlu1 %4225  ;;  %v4956_v14 = vcombine.low %v4049_v30, %v4051_v52  ;;  %v3699_v16 = vrot.slane %v3691_v50, %v7712_v54  ;;  %v4075_v20 = vrot.slane %v4061_v13, %v7712_v54  ;;  %v4131_v23 = vrot.slane %v3862_v24, %v7712_v54 }
 0xf4e   :  { %7065 = vmatpush3.xpose.msk.msra.mxu0 %vm1029_vm4, %v4226_v27  ;;  %v3684_v8 = vcombine.high %v3680_v62, %v3680_v62  ;;  %v4609_v15 = vcombine.low %v3680_v62, %v3682_v56  ;;  %v3706_v61 = vrot.slane %v3692_v10, %v7712_v54  ;;  %v4517_v63 = vcombine.low %v4502_v18, %v4509_v2 }
 0xf4f   :  { %7069 = vmatprep.subr.mxu0 %v7466_v21  ;;  %v4971_v22 = vrot.slane %v4957_v9, %v7712_v54  ;;  %v4099_v55 = vrot.slane %v4083_v43, %v7712_v54  ;;  %v4113_v28 = vrot.slane %v4091_v5, %v7712_v54  ;;  %v4122_v57 = vcombine.high %v8397_v6, %v8397_v6 }
 0xf50   :  { %v4610_v29 = vcombine.low %v3684_v8, %v3699_v16  ;;  %v4124_v24 = vcombine.high %v4120_v7, %v4120_v7  ;;  %v4524_v30 = vrot.slane %v4517_v63, %v7712_v54  ;;  %v4631_v34 = vrot.slane %v3706_v61, %v7712_v54 }
 0xf51   :  { %7067 = vmatmul.mubr.msk.f32.vlgmr.msra.gmra.mrb[18].mxu0 %vm1029_vm4, %v4185_v32  ;;  %v4531_v32 = vrot.slane %v4516_v44, %v7712_v54  ;;  %v4663_v35 = vrot.slane %v4649_v11, %v7712_v54  ;;  %v4132_v36 = vcombine.high %v4131_v23, %v4131_v23  ;;  %v4139_v25 = vrot.slane %v4131_v23, %v7712_v54 }
 0xf52   :  { %v4380_v53 = vpop.permute.xlu0 %4379  ;;  %7071 = vmatprep.mubr.msk.f32.mxu0 %vm7468_vm3, %v7466_v21  ;;  %v4624_v33 = vrot.slane %v4610_v29, %v7712_v54  ;;  %v4656_v39 = vrot.slane %v4648_v1, %v7712_v54  ;;  %v4810_v27 = vrot.slane %v4802_v3, %v7712_v54  ;;  %v4817_v12 = vrot.slane %v6701_v58, %v7712_v54 }
 0xf53   :  { %7070 = vmatpush3.xpose.msk.msra.mxu0 %vm1029_vm4, %v4380_v53  ;;  %v8421_v31 = vcombine.low %v4524_v30, %v4531_v32  ;;  %v4978_v51 = vrot.slane %v4075_v20, %v7712_v54  ;;  %v5110_v60 = vcombine.low %v4099_v55, %v4113_v28  ;;  %v5265_v42 = vcombine.low %v4124_v24, %v4139_v25 }
 0xf54   :  { %7074 = vmatprep.subr.mxu0 %v7466_v21  ;;  %v4671_v43 = vcombine.low %v4656_v39, %v4663_v35  ;;  %v4964_v45 = vrot.slane %v4956_v14, %v7712_v54  ;;  %v6707_v48 = vcombine.high %v4099_v55, %v4113_v28  ;;  %v5264_v44 = vcombine.low %v4120_v7, %v4122_v57  ;;  %v3558_v55 = vpop.permute.xlu1 %3557 }
 0xf55   :  { %4533 = vrot.lane.b32.xlu0 %v8421_v31, %s7467_s19  ;;  %v4646_v50 = vrot.slane %v4631_v34, %v7712_v54  ;;  %v4146_v52 = vrot.slane %v4132_v36, %v7712_v54  ;;  %v4685_v62 = vrot.slane %v4670_v37, %v7712_v54  ;;  %v4824_v18 = vrot.slane %v8367_v38, %v7712_v54 }
 0xf56   :  { %7072 = vmatmul.mubr.msk.f32.vlgmr.msra.gmra.mrb[20].mxu0 %vm1029_vm4, %v8314_v4  ;;  %v4617_v4 = vrot.slane %v4609_v15, %v7712_v54  ;;  %v4678_v59 = vrot.slane %v4671_v43, %v7712_v54  ;;  %v4979_v56 = vcombine.low %v4964_v45, %v4971_v22  ;;  %v5279_v1 = vrot.slane %v5265_v42, %v7712_v54 }
 0xf57   :  { %7076 = vmatprep.mubr.msk.f32.mxu0 %vm7468_vm3, %v7466_v21  ;;  %v4993_v3 = vrot.slane %v4978_v51, %v7712_v54  ;;  %v5118_v58 = vrot.slane %v5110_v60, %v7712_v54  ;;  %v4825_v9 = vcombine.low %v4810_v27, %v4817_v12  ;;  %v5125_v26 = vrot.slane %v6707_v48, %v7712_v54 }
 0xf58   :  { %v4632_v40 = vcombine.low %v4617_v4, %v4624_v33  ;;  %v8443_v13 = vcombine.low %v4678_v59, %v4685_v62  ;;  %v4986_v53 = vrot.slane %v4979_v56, %v7712_v54  ;;  %v5286_v37 = vrot.slane %v4146_v52, %v7712_v54  ;;  %v3562_v57 = vpop.permute.xlu1 %3561 }
 0xf59   :  { %v5272_v5 = vrot.slane %v5264_v44, %v7712_v54  ;;  %v4832_v7 = vrot.slane %v4825_v9, %v7712_v54  ;;  %v4839_v8 = vrot.slane %v4824_v18, %v7712_v54  ;;  %v5132_v14 = vrot.slane %v8397_v6, %v7712_v54 }
 0xf5a   :  { %v4639_v49 = vrot.slane %v4632_v40, %v7712_v54  ;;  %4687 = vrot.lane.b32.xlu0 %v8443_v13, %s7467_s19  ;;  %v8452_v38 = vcombine.low %v4986_v53, %v4993_v3  ;;  %v5301_v16 = vrot.slane %v5286_v37, %v7712_v54  ;;  %v5133_v20 = vcombine.low %v5118_v58, %v5125_v26 }
 0xf5b   :  { %v5287_v10 = vcombine.low %v5272_v5, %v5279_v1  ;;  %v8459_v11 = vcombine.low %v4832_v7, %v4839_v8  ;;  %v5147_v63 = vrot.slane %v5132_v14, %v7712_v54  ;;  %v3643_v6 = vrot.slane %v8341_v17, %v7712_v54 }
 0xf5c   :  { %v8440_v2 = vcombine.low %v4639_v49, %v4646_v50  ;;  %4995 = vrot.lane.b32.xlu1 %v8452_v38, %s7467_s19  ;;  %v5140_v61 = vrot.slane %v5133_v20, %v7712_v54  ;;  %v3707_v24 = vcombine.high %v3558_v55, %v3558_v55  ;;  %v3714_v32 = vrot.slane %v3558_v55, %v7712_v54  ;;  %v3560_v36 = vpop.permute.xlu1 %3559 }
 0xf5d   :  { %v5294_v15 = vrot.slane %v5287_v10, %v7712_v54  ;;  %v3651_v28 = vcombine.high %v3643_v6, %v3643_v6  ;;  %v3659_v30 = vrot.slane %v3643_v6, %v7712_v54  ;;  %v3778_v35 = vcombine.high %v3562_v57, %v3562_v57 }
 0xf5e   :  { %4841 = vrot.lane.b32.xlu0 %v8459_v11, %s7467_s19  ;;  %v8473_v22 = vcombine.low %v5140_v61, %v5147_v63  ;;  %v3721_v34 = vrot.slane %v3707_v24, %v7712_v54  ;;  %v3722_v25 = vcombine.high %v3714_v32, %v3714_v32  ;;  %v3785_v51 = vrot.slane %v3562_v57, %v7712_v54 }
 0xf5f   :  { %v8467_v23 = vcombine.low %v5294_v15, %v5301_v16  ;;  %v3673_v29 = vrot.slane %v3651_v28, %v7712_v54  ;;  %v3792_v12 = vrot.slane %v3778_v35, %v7712_v54  ;;  %v3762_v60 = vrot.slane %v3560_v36, %v7712_v54 }
 0xf60   :  { %v3723_v27 = vcombine.high %v3721_v34, %v3721_v34  ;;  %v3744_v40 = vrot.slane %v3722_v25, %v7712_v54  ;;  %v3564_v43 = vpop.permute.xlu1 %3563  ;;  %v3730_v45 = vrot.slane %v3714_v32, %v7712_v54  ;;  %v3737_v48 = vrot.slane %v3721_v34, %v7712_v54 }
 0xf61   :  { %5303 = vrot.lane.b32.xlu1 %v8467_v23, %s7467_s19  ;;  %v4455_v4 = vcombine.low %v3659_v30, %v3673_v29  ;;  %v6694_v33 = vcombine.high %v3659_v30, %v3673_v29  ;;  %v3794_v49 = vcombine.high %v3792_v12, %v3792_v12  ;;  %v4477_v50 = vrot.slane %v8376_v46, %v7712_v54 }
 0xf62   :  { %5149 = vrot.lane.b32.xlu0 %v8473_v22, %s7467_s19  ;;  %v3751_v44 = vrot.slane %v3723_v27, %v7712_v54  ;;  %v3793_v52 = vcombine.high %v3785_v51, %v3785_v51  ;;  %v4763_v59 = vcombine.low %v3730_v45, %v3744_v40  ;;  %v6700_v62 = vcombine.high %v3730_v45, %v3744_v40 }
 0xf63   :  { %v4463_v39 = vrot.slane %v4455_v4, %v7712_v54  ;;  %v4470_v17 = vrot.slane %v6694_v33, %v7712_v54  ;;  %v3770_v56 = vrot.slane %v3762_v60, %v7712_v54  ;;  %v3833_v18 = vrot.slane %v3564_v43, %v7712_v54 }
 0xf64   :  { %v3753_v53 = vcombine.high %v3737_v48, %v3737_v48  ;;  %v8498_v3 = vrot.slane %v3792_v12, %v7712_v54  ;;  %v3822_v58 = vrot.slane %v3794_v49, %v7712_v54  ;;  %v3755_v9 = vcombine.high %v3751_v44, %v3751_v44 }
 0xf65   :  { %v4478_v42 = vcombine.low %v4463_v39, %v4470_v17  ;;  %v4492_v26 = vrot.slane %v4477_v50, %v7712_v54  ;;  %v3815_v46 = vrot.slane %v3793_v52, %v7712_v54  ;;  %v4771_v5 = vrot.slane %v4763_v59, %v7712_v54 }
 0xf66   :  { %v4778_v7 = vrot.slane %v6700_v62, %v7712_v54  ;;  %v4918_v8 = vcombine.low %v3755_v9, %v3770_v56  ;;  %v3841_v10 = vrot.slane %v3833_v18, %v7712_v54  ;;  %v3801_v15 = vrot.slane %v3785_v51, %v7712_v54 }
 0xf67   :  { %v4485_v1 = vrot.slane %v4478_v42, %v7712_v54  ;;  %v4917_v16 = vcombine.low %v3751_v44, %v3753_v53  ;;  %v3824_v20 = vcombine.high %v8498_v3, %v8498_v3  ;;  %v3763_v61 = vcombine.high %v3762_v60, %v3762_v60 }
 0xf68   :  { %v3826_v63 = vcombine.high %v3822_v58, %v3822_v58  ;;  %v5071_v6 = vcombine.low %v3801_v15, %v3815_v46  ;;  %v6706_v55 = vcombine.high %v3801_v15, %v3815_v46  ;;  %v4786_v28 = vcombine.low %v4771_v5, %v4778_v7 }
 0xf69   :  { %v4493_v14 = vcombine.low %v4485_v1, %v4492_v26  ;;  %v4932_v29 = vrot.slane %v4918_v8, %v7712_v54  ;;  %v4785_v24 = vrot.slane %v3737_v48, %v7712_v54  ;;  %v5225_v32 = vcombine.low %v3822_v58, %v3824_v20 }
 0xf6a   :  { %v5226_v57 = vcombine.low %v3826_v63, %v3841_v10  ;;  %v4925_v4 = vrot.slane %v4917_v16, %v7712_v54  ;;  %v3777_v33 = vrot.slane %v3763_v61, %v7712_v54  ;;  %v3834_v34 = vcombine.high %v3833_v18, %v3833_v18 }
 0xf6b   :  { %v5079_v35 = vrot.slane %v5071_v6, %v7712_v54  ;;  %v5086_v36 = vrot.slane %v6706_v55, %v7712_v54  ;;  %v4793_v25 = vrot.slane %v4786_v28, %v7712_v54  ;;  %v4800_v27 = vrot.slane %v4785_v24, %v7712_v54 }
 0xf6c   :  { %v4940_v39 = vcombine.low %v4925_v4, %v4932_v29  ;;  %v5240_v17 = vrot.slane %v5226_v57, %v7712_v54  ;;  %v4939_v12 = vrot.slane %v3777_v33, %v7712_v54  ;;  %v5233_v51 = vrot.slane %v5225_v32, %v7712_v54 }
 0xf6d   :  { %v3848_v40 = vrot.slane %v3834_v34, %v7712_v54  ;;  %v5094_v42 = vcombine.low %v5079_v35, %v5086_v36  ;;  %v4801_v43 = vcombine.low %v4793_v25, %v4800_v27  ;;  %v5093_v44 = vrot.slane %v8498_v3, %v7712_v54 }
 0xf6e   :  { %v4947_v45 = vrot.slane %v4940_v39, %v7712_v54  ;;  %v5248_v48 = vcombine.low %v5233_v51, %v5240_v17  ;;  %v4954_v49 = vrot.slane %v4939_v12, %v7712_v54 }
 0xf6f   :  { %v5247_v50 = vrot.slane %v3848_v40, %v7712_v54  ;;  %v5101_v52 = vrot.slane %v5094_v42, %v7712_v54  ;;  %v5108_v56 = vrot.slane %v5093_v44, %v7712_v54 }
 0xf70   :  { %v4955_v59 = vcombine.low %v4947_v45, %v4954_v49  ;;  %v5255_v62 = vrot.slane %v5248_v48, %v7712_v54 }
 0xf71   :  { %v5262_v1 = vrot.slane %v5247_v50, %v7712_v54  ;;  %v5109_v3 = vcombine.low %v5101_v52, %v5108_v56 }
 0xf73   :  { %v5263_v58 = vcombine.low %v5255_v62, %v5262_v1 }
 0xfc7   :  { %v4534_v37 = vpop.permute.xlu0 %4533 }
 0xfc8   :  { %7075 = vmatpush3.xpose.msk.msra.mxu0 %vm1029_vm4, %v4534_v37 }
 0xfc9   :  { %7079 = vmatprep.subr.mxu0 %v7466_v21 }
 0xfcb   :  { %7077 = vmatmul.mubr.msk.f32.vlgmr.msra.gmra.mrb[22].mxu0 %vm1029_vm4, %v4493_v14 }
 0xfcc   :  { %7081 = vmatprep.mubr.msk.f32.mxu0 %vm7468_vm3, %v7466_v21  ;;  %v4688_v30 = vpop.permute.xlu0 %4687 }
 0xfcd   :  { %7080 = vmatpush3.xpose.msk.msra.mxu0 %vm1029_vm4, %v4688_v30 }
 0xfce   :  { %7084 = vmatprep.subr.mxu0 %v7466_v21 }
 0xfd0   :  { %7082 = vmatmul.mubr.msk.f32.vlgmr.msra.gmra.mrb[24].mxu0 %vm1029_vm4, %v8440_v2  ;;  %v4842_v60 = vpop.permute.xlu0 %4841  ;;  %v4996_v2 = vpop.permute.xlu1 %4995 }
 0xfd1   :  { %7086 = vmatprep.mubr.msk.f32.mxu0 %vm7468_vm3, %v7466_v21  ;;  %7085 = vmatpush3.xpose.msk.msra.mxu0 %vm1029_vm4, %v4842_v60 }
 0xfd2   :  { %7089 = vmatprep.subr.mxu0 %v7466_v21 }
 0xfd4   :  { %7087 = vmatmul.mubr.msk.f32.vlgmr.msra.gmra.mrb[26].mxu0 %vm1029_vm4, %v4801_v43  ;;  %v5150_v18 = vpop.permute.xlu0 %5149  ;;  %v5304_v53 = vpop.permute.xlu1 %5303 }
 0xfd5   :  { %7090 = vmatpush3.xpose.msk.msra.mxu0 %vm1029_vm4, %v4996_v2  ;;  %7091 = vmatprep.mubr.msk.f32.mxu0 %vm7468_vm3, %v7466_v21 }
 0xfd6   :  { %7099 = vmatprep.subr.mxu0 %v7466_v21  ;;  %7095 = vmatpush3.xpose.msk.msra.mxu1 %vm1029_vm4, %v5150_v18 }
 0xfd7   :  { %7104 = vmatprep.subr.mxu1 %v7466_v21 }
 0xfd8   :  { %7092 = vmatmul.mubr.msk.f32.vlgmr.msra.gmra.mrb[28].mxu0 %vm1029_vm4, %v4955_v59 }
 0xfd9   :  { %7100 = vmatpush3.xpose.msk.msra.mxu0 %vm1029_vm4, %v5304_v53  ;;  %7101 = vmatprep.mubr.msk.f32.mxu0 %vm7468_vm3, %v7466_v21 }
 0xfda   :  { %7109 = vmatprep.subr.mxu0 %v7466_v21  ;;  %7097 = vmatmul.mubr.msk.f32.vlgmr.msra.gmra.mrb[28].mxu1 %vm1029_vm4, %v5109_v3 }
 0xfdb   :  { %7106 = vmatprep.mubr.msk.f32.mxu1 %vm7468_vm3, %v7466_v21 }
 0xfdc   :  { %7102 = vmatmul.mubr.msk.f32.vlgmr.msra.gmra.mrb[30].mxu0 %vm1029_vm4, %v5263_v58 }
 0xfdd   :  { %7111 = vmatprep.mubr.msk.f32.mxu0 %vm7468_vm3, %v7466_v21 }
0x1024   :  { %v4297_v9 = vpop.f32.mrb[18].mxu0 }
0x1025   :  { %v7068_v26 = vpop.f32.mrb[19].mxu0  ;;  %v5379_v46 = vsel %vm2182_vm5, %v4297_v9, -inf }
0x1026   :  { %5380 = vmax.xlane.f32.xlu0 %v5379_v46 }
0x1029   :  { %v4451_v37 = vpop.f32.mrb[20].mxu0 }
0x102a   :  { %v7073_v5 = vpop.f32.mrb[21].mxu0  ;;  %v5382_v7 = vsel %vm2182_vm5, %v4451_v37, -inf }
0x102b   :  { %5383 = vmax.xlane.f32.xlu1 %v5382_v7 }
0x109e   :  { %v4605_v8 = vpop.f32.mrb[22].mxu0 }
0x109f   :  { %v7078_v10 = vpop.f32.mrb[23].mxu0  ;;  %v5385_v14 = vsel %vm2182_vm5, %v4605_v8, -inf }
0x10a0   :  { %5386 = vmax.xlane.f32.xlu0 %v5385_v14 }
0x10a3   :  { %v4759_v15 = vpop.f32.mrb[24].mxu0 }
0x10a4   :  { %v7083_v16 = vpop.f32.mrb[25].mxu0  ;;  %v5388_v20 = vsel %vm2182_vm5, %v4759_v15, -inf }
0x10a5   :  { %5389 = vmax.xlane.f32.xlu0 %v5388_v20 }
0x10a7   :  { %v4913_v61 = vpop.f32.mrb[26].mxu0 }
0x10a8   :  { %v7088_v63 = vpop.f32.mrb[27].mxu0  ;;  %v5391_v6 = vsel %vm2182_vm5, %v4913_v61, -inf }
0x10a9   :  { %5392 = vmax.xlane.f32.xlu0 %v5391_v6 }
0x10ab   :  { %v5067_v55 = vpop.f32.mrb[28].mxu0 }
0x10ac   :  { %v7093_v28 = vpop.f32.mrb[29].mxu0  ;;  %v5394_v29 = vsel %vm2182_vm5, %v5067_v55, -inf }
0x10ad   :  { %5395 = vmax.xlane.f32.xlu1 %v5394_v29  ;;  %v5221_v57 = vpop.f32.mrb[28].mxu1 }
0x10ae   :  { %v7098_v24 = vpop.f32.mrb[29].mxu1  ;;  %v5397_v30 = vsel %vm2182_vm5, %v5221_v57, -inf }
0x10af   :  { %v5375_v32 = vpop.f32.mrb[30].mxu0  ;;  %5398 = vmax.xlane.f32.xlu0 %v5397_v30 }
0x10b0   :  { %v7103_v4 = vpop.f32.mrb[31].mxu0  ;;  %v5400_v33 = vsel %vm2182_vm5, %v5375_v32, -inf }
0x10b1   :  { %5401 = vmax.xlane.f32.xlu1 %v5400_v33 }
0x10b3   :  { %v5381_v34 = vpop.xlane.xlu0 %5380 }
0x10b4   :  { %v5403_v35 = vsub.f32 %v4297_v9, %v5381_v34 }
0x10b6   :  { %v5411_v36 = vmul.f32 1.442695, %v5403_v35 }
0x10b8   :  { %v5384_v25 = vpop.xlane.xlu1 %5383  ;;  %7417 = vpow2.f32 %v5411_v36 }
0x10c2   :  { %5544 = vrot.lane.b32.xlu1 %v8310_v47, %s7469_s3  ;;  %v5404_v47 = vsub.f32 %v4451_v37, %v5384_v25 }
0x10c4   :  { %v5413_v39 = vmul.f32 1.442695, %v5404_v47 }
0x10c5   :  { %5467 = vrot.lane.b32.xlu0 %v8299_v41, %s7469_s3  ;;  %v8581_v41 = vpop.eup %7417 }
0x10c6   :  { %5621 = vrot.lane.b32.xlu1 %v8421_v31, %s7469_s3  ;;  %7419 = vpow2.f32 %v5413_v39  ;;  %v5427_v31 = vsel %vm2182_vm5, %v8581_v41, 0.0 }
0x10c9   :  { %5775 = vrot.lane.b32.xlu0 %v8459_v11, %s7469_s3 }
0x10ca   :  { %5698 = vrot.lane.b32.xlu1 %v8443_v13, %s7469_s3 }
0x10ce   :  { %5852 = vrot.lane.b32.xlu1 %v8452_v38, %s7469_s3 }
0x10d0   :  { %v8585_v11 = vpop.eup %7419 }
0x10d1   :  { %v5430_v13 = vsel %vm2182_vm5, %v8585_v11, 0.0 }
0x10e8   :  { %5428 = vadd.xlane.f32.xlu0 %v5427_v31 }
0x10f2   :  { %5431 = vadd.xlane.f32.xlu1 %v5430_v13 }
0x112d   :  { %v5387_v38 = vpop.xlane.xlu0 %5386 }
0x112e   :  { %v5405_v17 = vsub.f32 %v4605_v8, %v5387_v38 }
0x1130   :  { %v5415_v27 = vmul.f32 1.442695, %v5405_v17 }
0x1132   :  { %7421 = vpow2.f32 %v5415_v27  ;;  %v5390_v12 = vpop.xlane.xlu0 %5389 }
0x1133   :  { %v5406_v51 = vsub.f32 %v4759_v15, %v5390_v12 }
0x1135   :  { %v5417_v40 = vmul.f32 1.442695, %v5406_v51 }
0x1136   :  { %v5393_v60 = vpop.xlane.xlu0 %5392 }
0x1137   :  { %7423 = vpow2.f32 %v5417_v40  ;;  %v5407_v2 = vsub.f32 %v4913_v61, %v5393_v60 }
0x1139   :  { %v5419_v56 = vmul.f32 1.442695, %v5407_v2 }
0x113a   :  { %v5396_v43 = vpop.xlane.xlu1 %5395 }
0x113b   :  { %v5408_v45 = vsub.f32 %v5067_v55, %v5396_v43 }
0x113c   :  { %v8589_v42 = vpop.eup %7421  ;;  %v5399_v44 = vpop.xlane.xlu0 %5398 }
0x113d   :  { %v5433_v48 = vsel %vm2182_vm5, %v8589_v42, 0.0  ;;  %v5421_v49 = vmul.f32 1.442695, %v5408_v45  ;;  %v5409_v50 = vsub.f32 %v5221_v57, %v5399_v44 }
0x113e   :  { %5434 = vadd.xlane.f32.xlu0 %v5433_v48  ;;  %v5402_v52 = vpop.xlane.xlu1 %5401 }
0x113f   :  { %7425 = vpow2.f32 %v5421_v49  ;;  %v5410_v59 = vsub.f32 %v5375_v32, %v5402_v52  ;;  %v5423_v18 = vmul.f32 1.442695, %v5409_v50  ;;  %v6728_v52 = vld [vmem:[%s8797_s9 + $0x20] sm:$0xff] }
0x1140   :  { %v5468_v1 = vpop.permute.xlu0 %5467 }
0x1141   :  { %v7424_v62 = vpop.eup %7423  ;;  %v5425_v53 = vmul.f32 1.442695, %v5410_v59  ;;  %7427 = vpow2.f32 %v5423_v18  ;;  %7105 = vmatpush3.msk.msra.mxu1 %vm2277_vm6, %v5468_v1  ;;  %v6729_v59 = vld [vmem:[%s8797_s9 + $0x28] sm:$0xff]  ;;  %v6731_v1 = vld [vmem:[%s8797_s9 + $0x38] sm:$0xff] }
0x1142   :  { %v5436_v3 = vsel %vm2182_vm5, %v7424_v62, 0.0  ;;  %v5545_v58 = vpop.permute.xlu1 %5544  ;;  %7114 = vmatprep.subr.mxu1 %v7466_v21  ;;  %v7301_v18 = vpack.c.bf16 %v6729_v59, %v6728_v52 }
0x1143   :  { %5437 = vadd.xlane.f32.xlu1 %v5436_v3  ;;  %7429 = vpow2.f32 %v5425_v53  ;;  %7110 = vmatpush3.msk.msra.mxu0 %vm2277_vm6, %v5545_v58 }
0x1144   :  { %7431 = vpow2.f32 %v5419_v56  ;;  %7119 = vmatprep.subr.mxu0 %v7466_v21  ;;  %v5776_v15 = vpop.permute.xlu0 %5775 }
0x1146   :  { %v5622_v14 = vpop.permute.xlu1 %5621 }
0x1149   :  { %v7426_v9 = vpop.eup %7425 }
0x114a   :  { %v5442_v26 = vsel %vm2182_vm5, %v7426_v9, 0.0  ;;  %v5699_v16 = vpop.permute.xlu1 %5698 }
0x114b   :  { %5443 = vadd.xlane.f32.xlu1 %v5442_v26  ;;  %v8599_v46 = vpop.eup %7427 }
0x114c   :  { %v5445_v5 = vsel %vm2182_vm5, %v8599_v46, 0.0 }
0x114d   :  { %v7430_v37 = vpop.eup %7429  ;;  %5446 = vadd.xlane.f32.xlu0 %v5445_v5 }
0x114e   :  { %v7432_v7 = vpop.eup %7431  ;;  %v5448_v8 = vsel %vm2182_vm5, %v7430_v37, 0.0  ;;  %v5853_v61 = vpop.permute.xlu1 %5852 }
0x114f   :  { %5449 = vadd.xlane.f32.xlu1 %v5448_v8  ;;  %v5439_v10 = vsel %vm2182_vm5, %v7432_v7, 0.0 }
0x1151   :  { %5440 = vadd.xlane.f32.xlu0 %v5439_v10 }
0x1160   :  { %6006 = vrot.lane.b32.xlu1 %v8467_v23, %s7469_s3 }
0x1167   :  { %5929 = vrot.lane.b32.xlu0 %v8473_v22, %s7469_s3 }
0x1175   :  { %v5429_v20 = vpop.xlane.xlu0 %5428 }
0x1176   :  { %7433 = vrcp.f32 %v5429_v20 }
0x117f   :  { %v5432_v63 = vpop.xlane.xlu1 %5431 }
0x1180   :  { %7435 = vrcp.f32 %v5432_v63  ;;  %v7434_v6 = vpop.eup %7433 }
0x1181   :  { %v5459_v55 = vmul.f32 %v7434_v6, %v8581_v41 }
0x1183   :  { %7107 = vmatmul.mubr.msk.f32.vlgmr.msra.gmra.mrb[30].mxu1 %vm2273_vm7, %v5459_v55 }
0x1184   :  { %7115 = vmatpush3.msk.msra.mxu1 %vm2277_vm6, %v5622_v14  ;;  %7116 = vmatprep.mubr.msk.f32.mxu1 %vm7468_vm3, %v7466_v21 }
0x1185   :  { %7124 = vmatprep.subr.mxu1 %v7466_v21 }
0x118a   :  { %v7436_v23 = vpop.eup %7435 }
0x118b   :  { %v5460_v22 = vmul.f32 %v7436_v23, %v8585_v11 }
0x118d   :  { %7112 = vmatmul.mubr.msk.f32.vlgmr.msra.gmra.mrb[32].mxu0 %vm2273_vm7, %v5460_v22 }
0x118e   :  { %7120 = vmatpush3.msk.msra.mxu0 %vm2277_vm6, %v5699_v16  ;;  %7121 = vmatprep.mubr.msk.f32.mxu0 %vm7468_vm3, %v7466_v21 }
0x118f   :  { %7129 = vmatprep.subr.mxu0 %v7466_v21 }
0x11cb   :  { %v5435_v28 = vpop.xlane.xlu0 %5434 }
0x11cc   :  { %7437 = vrcp.f32 %v5435_v28 }
0x11d0   :  { %v5438_v29 = vpop.xlane.xlu1 %5437 }
0x11d1   :  { %7439 = vrcp.f32 %v5438_v29 }
0x11d6   :  { %v7438_v57 = vpop.eup %7437 }
0x11d7   :  { %v5461_v24 = vmul.f32 %v7438_v57, %v8589_v42 }
0x11d8   :  { %v5444_v30 = vpop.xlane.xlu1 %5443 }
0x11d9   :  { %7117 = vmatmul.mubr.msk.f32.vlgmr.msra.gmra.mrb[32].mxu1 %vm2273_vm7, %v5461_v24  ;;  %7441 = vrcp.f32 %v5444_v30 }
0x11da   :  { %7125 = vmatpush3.msk.msra.mxu1 %vm2277_vm6, %v5776_v15  ;;  %7126 = vmatprep.mubr.msk.f32.mxu1 %vm7468_vm3, %v7466_v21  ;;  %v5447_v33 = vpop.xlane.xlu0 %5446 }
0x11db   :  { %7134 = vmatprep.subr.mxu1 %v7466_v21  ;;  %v7440_v32 = vpop.eup %7439 }
0x11dc   :  { %v5462_v4 = vmul.f32 %v7440_v32, %v7424_v62  ;;  %v5450_v34 = vpop.xlane.xlu1 %5449  ;;  %v6730_v62 = vld [vmem:[%s8797_s9 + $0x30] sm:$0xff] }
0x11dd   :  { %7443 = vrcp.f32 %v5450_v34  ;;  %v7305_v3 = vpack.c.bf16 %v6731_v1, %v6730_v62 }
0x11de   :  { %7122 = vmatmul.mubr.msk.f32.vlgmr.msra.gmra.mrb[34].mxu0 %vm2273_vm7, %v5462_v4  ;;  %v5441_v35 = vpop.xlane.xlu0 %5440 }
0x11df   :  { %7130 = vmatpush3.msk.msra.mxu0 %vm2277_vm6, %v5853_v61  ;;  %7131 = vmatprep.mubr.msk.f32.mxu0 %vm7468_vm3, %v7466_v21  ;;  %7445 = vrcp.f32 %v5441_v35 }
0x11e0   :  { %7139 = vmatprep.subr.mxu0 %v7466_v21  ;;  %7447 = vrcp.f32 %v5447_v33  ;;  %v6007_v47 = vpop.permute.xlu1 %6006 }
0x11e2   :  { %v5930_v38 = vpop.permute.xlu0 %5929 }
0x11e3   :  { %v7442_v36 = vpop.eup %7441 }
0x11e4   :  { %v5464_v25 = vmul.f32 %v7442_v36, %v7426_v9 }
0x11e6   :  { %7132 = vmatmul.mubr.msk.f32.vlgmr.msra.gmra.mrb[36].mxu0 %vm2273_vm7, %v5464_v25 }
0x11e7   :  { %v7444_v39 = vpop.eup %7443  ;;  %7140 = vmatpush3.msk.msra.mxu0 %vm2277_vm6, %v6007_v47  ;;  %7141 = vmatprep.mubr.msk.f32.mxu0 %vm7468_vm3, %v7466_v21 }
0x11e8   :  { %v5466_v41 = vmul.f32 %v7444_v39, %v7430_v37 }
0x11e9   :  { %v7446_v31 = vpop.eup %7445 }
0x11ea   :  { %7142 = vmatmul.mubr.msk.f32.vlgmr.msra.gmra.mrb[38].mxu0 %vm2273_vm7, %v5466_v41  ;;  %v5463_v11 = vmul.f32 %v7446_v31, %v7432_v7  ;;  %v7448_v13 = vpop.eup %7447 }
0x11eb   :  { %v5465_v17 = vmul.f32 %v7448_v13, %v8599_v46 }
0x11ec   :  { %7127 = vmatmul.mubr.msk.f32.vlgmr.msra.gmra.mrb[34].mxu1 %vm2273_vm7, %v5463_v11 }
0x11ed   :  { %7135 = vmatpush3.msk.msra.mxu1 %vm2277_vm6, %v5930_v38  ;;  %7136 = vmatprep.mubr.msk.f32.mxu1 %vm7468_vm3, %v7466_v21 }
0x11ee   :  { %7302 = vmatprep.subr.bf16.mxu1 %v7301_v18 }
0x11f0   :  { %7137 = vmatmul.mubr.msk.f32.vlgmr.msra.gmra.mrb[36].mxu1 %vm2273_vm7, %v5465_v17 }
0x11f1   :  { %7304 = vmatpush3.bf16.msra.mxu1 %v7301_v18 }
0x11f2   :  { %7306 = vmatprep.subr.bf16.mxu1 %v7305_v3 }
0x11f5   :  { %7308 = vmatpush3.bf16.msra.mxu1 %v7305_v3  ;;  %v6741_v3 = vld [vmem:[%s8799_s13 + $0x20] sm:$0xff] }
0x1256   :  { %v5540_v27 = vpop.f32.mrb[30].mxu1 }
0x1257   :  { %v7108_v12 = vpop.f32.mrb[31].mxu1 }
0x1260   :  { %v5617_v51 = vpop.f32.mrb[32].mxu0 }
0x1261   :  { %v7113_v40 = vpop.f32.mrb[33].mxu0 }
0x12ac   :  { %v5694_v60 = vpop.f32.mrb[32].mxu1 }
0x12ad   :  { %6085 = vrot.lane.b32.xlu0 %v5694_v60, %s7470_s4  ;;  %v7118_v42 = vpop.f32.mrb[33].mxu1 }
0x12ae   :  { %v6733_v42 = vld [vmem:[%s8798_s10 + $0x1] ss:$0 sm:$0xff] }
0x12b1   :  { %v5771_v43 = vpop.f32.mrb[34].mxu0 }
0x12b2   :  { %6087 = vrot.lane.b32.xlu1 %v5771_v43, %s7470_s4  ;;  %v7123_v45 = vpop.f32.mrb[35].mxu0 }
0x12b9   :  { %v5925_v48 = vpop.f32.mrb[36].mxu0 }
0x12ba   :  { %6095 = vrot.lane.b32.xlu1 %v5925_v48, %s7471_s0  ;;  %v7133_v21 = vpop.f32.mrb[37].mxu0 }
0x12bd   :  { %v6079_v2 = vpop.f32.mrb[38].mxu0 }
0x12be   :  { %6103 = vrot.lane.b32.xlu1 %v6079_v2, %s7472_s20  ;;  %v7143_v44 = vpop.f32.mrb[39].mxu0 }
0x12bf   :  { %v5848_v49 = vpop.f32.mrb[34].mxu1 }
0x12c0   :  { %6093 = vrot.lane.b32.xlu0 %v5848_v49, %s7471_s0  ;;  %v7128_v50 = vpop.f32.mrb[35].mxu1 }
0x12c3   :  { %v6002_v56 = vpop.f32.mrb[36].mxu1 }
0x12c4   :  { %6101 = vrot.lane.b32.xlu0 %v6002_v56, %s7472_s20  ;;  %v7138_v53 = vpop.f32.mrb[37].mxu1 }
0x131f   :  { %v6086_v26 = vpop.permute.xlu0 %6085 }
0x1320   :  { %v6107_v16 = vsel %vm1029_vm4, %v5540_v27, %v6086_v26 }
0x1324   :  { %v6088_v58 = vpop.permute.xlu1 %6087 }
0x1325   :  { %v6108_v46 = vsel %vm1029_vm4, %v5617_v51, %v6088_v58  ;;  %v6742_v58 = vld [vmem:[%s8799_s13 + $0x28] sm:$0xff] }
0x1326   :  { %v7309_v26 = vpack.c.bf16 %v6742_v58, %v6741_v3  ;;  %v6768_v58 = vld [vmem:[%s8804_s16 + $0x1] ss:$0 sm:$0xff] }
0x1328   :  { %7310 = vmatprep.subr.bf16.mxu0 %v7309_v26 }
0x1329   :  { %7312 = vmatpush3.bf16.msra.mxu0 %v7309_v26 }
0x132c   :  { %v6096_v9 = vpop.permute.xlu1 %6095 }
0x132d   :  { %v6110_v37 = vsel %vm2915_vm8, %v6108_v46, %v6096_v9  ;;  %v6743_v9 = vld [vmem:[%s8799_s13 + $0x30] sm:$0xff]  ;;  %v6744_v46 = vld [vmem:[%s8799_s13 + $0x38] sm:$0xff] }
0x1330   :  { %v6104_v5 = vpop.permute.xlu1 %6103 }
0x1331   :  { %v6112_v7 = vsel %vm2918_vm9, %v6110_v37, %v6104_v5  ;;  %v7313_v37 = vpack.c.bf16 %v6744_v46, %v6743_v9 }
0x1332   :  { %v6161_v8 = vrot.slane %v6112_v7, %v7712_v54  ;;  %v6094_v10 = vpop.permute.xlu0 %6093  ;;  %v6154_v20 = vcombine.high %v6112_v7, %v6112_v7 }
0x1333   :  { %v6109_v61 = vsel %vm2915_vm8, %v6107_v16, %v6094_v10  ;;  %7314 = vmatprep.subr.bf16.mxu0 %v7313_v37 }
0x1334   :  { %v6169_v14 = vcombine.high %v6161_v8, %v6161_v8  ;;  %v6176_v15 = vrot.slane %v6161_v8, %v7712_v54  ;;  %v6168_v29 = vrot.slane %v6154_v20, %v7712_v54  ;;  %7316 = vmatpush3.bf16.msra.mxu0 %v7313_v37  ;;  %v6739_v20 = vld [vmem:[%s8800_s11 + $0x1] ss:$0 sm:$0xff] }
0x1336   :  { %v6102_v63 = vpop.permute.xlu0 %6101  ;;  %v6190_v6 = vrot.slane %v6169_v14, %v7712_v54  ;;  %v6191_v23 = vcombine.high %v6176_v15, %v6176_v15  ;;  %v6183_v35 = vrot.slane %v6168_v29, %v7712_v54 }
0x1337   :  { %v6111_v55 = vsel %vm2918_vm9, %v6109_v61, %v6102_v63  ;;  %v6740_v63 = vld [vmem:[%s8801_s12 + $0x1] ss:$0 sm:$0xff] }
0x1338   :  { %v6115_v22 = vcombine.high %v6111_v55, %v6111_v55  ;;  %v6122_v28 = vrot.slane %v6111_v55, %v7712_v54  ;;  %v6192_v30 = vcombine.high %v6190_v6, %v6190_v6  ;;  %v6209_v32 = vcombine.low %v6190_v6, %v6191_v23 }
0x133a   :  { %v6129_v57 = vrot.slane %v6115_v22, %v7712_v54  ;;  %v6130_v24 = vcombine.high %v6122_v28, %v6122_v28  ;;  %v6137_v4 = vrot.slane %v6122_v28, %v7712_v54  ;;  %v6255_v39 = vcombine.low %v6192_v30, %v6183_v35  ;;  %v6756_v35 = vld [vmem:[%s8802_s15 + $0xa8] sm:$0xff] }
0x133b   :  { %v6237_v41 = vrot.slane %v6209_v32, %v7712_v54  ;;  %v6753_v32 = vld [vmem:[%s8802_s15 + $0x90] sm:$0xff] }
0x133c   :  { %v6144_v33 = vrot.slane %v6129_v57, %v7712_v54  ;;  %v6151_v34 = vrot.slane %v6130_v24, %v7712_v54  ;;  %v6262_v27 = vrot.slane %v6255_v39, %v7712_v54  ;;  %v6751_v57 = vld [vmem:[%s8802_s15 + $0x80] sm:$0xff]  ;;  %v6752_v24 = vld [vmem:[%s8802_s15 + $0x88] sm:$0xff] }
0x133d   :  { %v7317_v30 = vpack.c.bf16 %v6752_v24, %v6751_v57 }
0x133e   :  { %v6206_v36 = vcombine.low %v6137_v4, %v6151_v34  ;;  %v6734_v25 = vcombine.high %v6137_v4, %v6151_v34  ;;  %v6208_v47 = vcombine.low %v6144_v33, %v6176_v15  ;;  %v6269_v60 = vrot.slane %v6262_v27, %v7712_v54  ;;  %v6754_v4 = vld [vmem:[%s8802_s15 + $0x98] sm:$0xff]  ;;  %v6755_v34 = vld [vmem:[%s8802_s15 + $0xa0] sm:$0xff] }
0x133f   :  { %7318 = vmatprep.subr.bf16.mxu1 %v7317_v30  ;;  %v7321_v33 = vpack.c.bf16 %v6754_v4, %v6753_v32  ;;  %v6763_v27 = vld [vmem:[%s8802_s15 + $0xe0] sm:$0xff] }
0x1340   :  { %v6216_v31 = vrot.slane %v6206_v36, %v7712_v54  ;;  %v6223_v11 = vrot.slane %v6734_v25, %v7712_v54  ;;  %v6230_v13 = vrot.slane %v6208_v47, %v7712_v54  ;;  %v7325_v36 = vpack.c.bf16 %v6756_v35, %v6755_v34  ;;  %v6757_v25 = vld [vmem:[%s8802_s15 + $0xb0] sm:$0xff]  ;;  %v6758_v47 = vld [vmem:[%s8802_s15 + $0xb8] sm:$0xff] }
0x1341   :  { %v7329_v39 = vpack.c.bf16 %v6758_v47, %v6757_v25 }
0x1342   :  { %v6238_v38 = vcombine.low %v6216_v31, %v6223_v11  ;;  %v6239_v17 = vcombine.low %v6230_v13, %v6237_v41  ;;  %v6759_v41 = vld [vmem:[%s8802_s15 + $0xc0] sm:$0xff]  ;;  %v6760_v31 = vld [vmem:[%s8802_s15 + $0xc8] sm:$0xff]  ;;  %v6761_v13 = vld [vmem:[%s8802_s15 + $0xd0] sm:$0xff] }
0x1343   :  { %v7333_v11 = vpack.c.bf16 %v6760_v31, %v6759_v41 }
0x1344   :  { %v6246_v12 = vrot.slane %v6238_v38, %v7712_v54  ;;  %v6253_v51 = vrot.slane %v6239_v17, %v7712_v54  ;;  %v6762_v38 = vld [vmem:[%s8802_s15 + $0xd8] sm:$0xff] }
0x1345   :  { %v7337_v17 = vpack.c.bf16 %v6762_v38, %v6761_v13 }
0x1346   :  { %v6254_v40 = vcombine.low %v6246_v12, %v6253_v51  ;;  %v6764_v12 = vld [vmem:[%s8802_s15 + $0xe8] sm:$0xff]  ;;  %v6765_v51 = vld [vmem:[%s8802_s15 + $0xf0] sm:$0xff] }
0x1348   :  { %7152 = vmatprep.mubr.msk.f32.mxu1 %vm170_vm1, %v6254_v40  ;;  %v7341_v40 = vpack.c.bf16 %v6764_v12, %v6763_v27 }
0x1349   :  { %7153 = vmatmul.mubr.msk.f32.vlgmr.msra.gmra.mrb[38].mxu1 %vm170_vm1, %v6269_v60  ;;  %v6766_v60 = vld [vmem:[%s8802_s15 + $0xf8] sm:$0xff] }
0x134a   :  { %7320 = vmatpush3.bf16.msra.mxu1 %v7317_v30 }
0x134b   :  { %7322 = vmatprep.subr.bf16.mxu1 %v7321_v33 }
0x134e   :  { %7324 = vmatpush3.bf16.msra.mxu1 %v7321_v33 }
0x134f   :  { %7326 = vmatprep.subr.bf16.mxu1 %v7325_v36 }
0x1352   :  { %7328 = vmatpush3.bf16.msra.mxu1 %v7325_v36 }
0x1353   :  { %7330 = vmatprep.subr.bf16.mxu1 %v7329_v39 }
0x1356   :  { %7332 = vmatpush3.bf16.msra.mxu1 %v7329_v39 }
0x1357   :  { %7334 = vmatprep.subr.bf16.mxu1 %v7333_v11 }
0x135a   :  { %7336 = vmatpush3.bf16.msra.mxu1 %v7333_v11 }
0x135b   :  { %7338 = vmatprep.subr.bf16.mxu1 %v7337_v17 }
0x135e   :  { %7340 = vmatpush3.bf16.msra.mxu1 %v7337_v17 }
0x135f   :  { %7342 = vmatprep.subr.bf16.mxu1 %v7341_v40 }
0x1362   :  { %7344 = vmatpush3.bf16.msra.mxu1 %v7341_v40 }
0x141c   :  { %v7154_v43 = vpop.f32.mrb[38].mxu1 }
0x141d   :  { %v6346_v45 = vadd.f32 %v7154_v43, %v6733_v42  ;;  %v6340_v48 = vpop.f32.mrb[39].mxu1  ;;  %v6746_v43 = vld [vmem:[%s8803_s14 + $0x1] ss:$0 sm:$0xff] }
0x141e   :  { %v6341_v21 = vadd.f32 %v6733_v42, %v6340_v48  ;;  %v7345_v42 = vpack.c.bf16 %v6766_v60, %v6765_v51 }
0x141f   :  { %v8691_v2 = vadd.f32 %v6346_v45, %v8216_v0 }
0x1420   :  { %v8694_v44 = vadd.f32 %v6341_v21, %v8219_v19  ;;  %7346 = vmatprep.subr.bf16.mxu1 %v7345_v42 }
0x1421   :  { %v6358_v54 = vsel %vm174_vm2, %v8691_v2, 0.0  ;;  %7348 = vmatpush3.bf16.msra.mxu1 %v7345_v42 }
0x1422   :  { %6359 = vadd.xlane.f32.xlu1 %v6358_v54  ;;  %v6355_v49 = vsel %vm170_vm1, %v8694_v44, 0.0 }
0x1423   :  { %6356 = vadd.xlane.f32.xlu0 %v6355_v49 }
0x14af   :  { %v6360_v50 = vpop.xlane.xlu1 %6359 }
0x14b0   :  { %v6362_v52 = vmul.f32 0.03125, %v6360_v50  ;;  %v6357_v59 = vpop.xlane.xlu0 %6356 }
0x14b1   :  { %v6361_v62 = vmul.f32 0.03125, %v6357_v59 }
0x14b2   :  { %v6364_v56 = vsub.f32 %v8691_v2, %v6362_v52 }
0x14b3   :  { %v6363_v0 = vsub.f32 %v8694_v44, %v6361_v62 }
0x14b4   :  { %v6366_v1 = vmul.f32 %v6364_v56, %v6364_v56 }
0x14b5   :  { %v6365_v18 = vmul.f32 %v6363_v0, %v6363_v0 }
0x14b6   :  { %v6370_v53 = vsel %vm174_vm2, %v6366_v1, 0.0 }
0x14b7   :  { %v6367_v19 = vsel %vm170_vm1, %v6365_v18, 0.0 }
0x14b8   :  { %6368 = vadd.xlane.f32.xlu0 %v6367_v19 }
0x14bc   :  { %6371 = vadd.xlane.f32.xlu0 %v6370_v53 }
0x1545   :  { %v6369_v5 = vpop.xlane.xlu0 %6368 }
0x1546   :  { %v6373_v7 = vmul.f32 0.03125, %v6369_v5 }
0x1548   :  { %v6375_v8 = vadd.f32 1e-05, %v6373_v7 }
0x1549   :  { %v6372_v10 = vpop.xlane.xlu0 %6371 }
0x154a   :  { %7449 = vrsqrt.f32 %v6375_v8  ;;  %v6374_v14 = vmul.f32 0.03125, %v6372_v10 }
0x154c   :  { %v6376_v15 = vadd.f32 1e-05, %v6374_v14 }
0x154e   :  { %7451 = vrsqrt.f32 %v6376_v15 }
0x1554   :  { %v7450_v16 = vpop.eup %7449 }
0x1555   :  { %v6379_v61 = vmul.f32 %v7450_v16, %v6363_v0 }
0x1557   :  { %v6387_v6 = vmul.f32 %v6739_v20, %v6379_v61 }
0x1558   :  { %v7452_v55 = vpop.eup %7451 }
0x1559   :  { %v6380_v23 = vmul.f32 %v7452_v55, %v6364_v56  ;;  %v6395_v22 = vadd.f32 %v6740_v63, %v6387_v6 }
0x155b   :  { %v6388_v28 = vmul.f32 %v6739_v20, %v6380_v23  ;;  %7163 = vmatprep.mubr.msk.f32.mxu0 %vm170_vm1, %v6395_v22 }
0x155d   :  { %v6396_v29 = vadd.f32 %v6740_v63, %v6388_v28 }
0x155f   :  { %7164 = vmatmul.mubr.msk.f32.vlgmr.msra.gmra.mrb[40].mxu0 %vm170_vm1, %v6396_v29 }
0x1632   :  { %v7165_v45 = vpop.f32.mrb[40].mxu0 }
0x1633   :  { %v6488_v48 = vadd.f32 %v7165_v45, %v6746_v43  ;;  %v6482_v21 = vpop.f32.mrb[41].mxu0 }
0x1634   :  { %v6483_v54 = vadd.f32 %v6746_v43, %v6482_v21 }
0x1635   :  { %v6750_v49 = vmul.f32 -1.702, %v6488_v48 }
0x1636   :  { %v6749_v50 = vmul.f32 -1.702, %v6483_v54 }
0x1637   :  { %v6497_v52 = vmul.f32 1.442695, %v6750_v49 }
0x1638   :  { %v6495_v59 = vmul.f32 1.442695, %v6749_v50 }
0x1639   :  { %7453 = vpow2.f32 %v6497_v52 }
0x163a   :  { %7455 = vpow2.f32 %v6495_v59 }
0x1643   :  { %v7454_v62 = vpop.eup %7453 }
0x1644   :  { %v7456_v56 = vpop.eup %7455  ;;  %v6500_v0 = vadd.f32 1.0, %v7454_v62 }
0x1645   :  { %v6499_v18 = vadd.f32 1.0, %v7456_v56 }
0x1646   :  { %7457 = vrcp.f32 %v6500_v0 }
0x1647   :  { %7459 = vrcp.f32 %v6499_v18 }
0x1650   :  { %v7458_v19 = vpop.eup %7457 }
0x1651   :  { %v7460_v1 = vpop.eup %7459  ;;  %v6506_v3 = vmul.f32 %v7458_v19, %v6488_v48 }
0x1652   :  { %v6505_v53 = vmul.f32 %v7460_v1, %v6483_v54 }
0x1654   :  { %7198 = vmatprep.mubr.f32.mxu1 %v6505_v53 }
0x1655   :  { %7199 = vmatmul.mubr.f32.vlgmr.msra.gmra.mrb[40].mxu1 %v6506_v3 }
0x1728   :  { %v7200_v9 = vpop.f32.mrb[40].mxu1 }
0x1729   :  { %v6604_v26 = vadd.f32 %v7200_v9, %v6768_v58  ;;  %v6598_v46 = vpop.f32.mrb[41].mxu1 }
0x172a   :  { %v6599_v37 = vadd.f32 %v6768_v58, %v6598_v46 }
0x172b   :  { %v6608_v5 = vadd.f32 %v6604_v26, %v8691_v2 }
0x172c   :  { %v6607_v7 = vadd.f32 %v6599_v37, %v8694_v44 }
0x172d   :  { %6610 = vst.msk [vmem:[%s8805_s17 + $0x8] sm:$0x3] %vm174_vm2, %v6608_v5 }
0x172e   :  { %6609 = vst.msk [vmem:[%s8805_s17] sm:$0xff] %vm170_vm1, %v6607_v7 }

</bundles_post_ra>
